<compile_context>
chip_gen: v6e
topology: v6e:2x2x1
jax: 0.10.0
libtpu: 0.0.40
codegen_flags: <defaults>
</compile_context>

<pallas_src>
import jax
import jax.numpy as jnp
from jax.experimental import pallas as pl
from jax.experimental.pallas import tpu as pltpu


def _residual_block_kernel(x_ref, w1_ref, b1_ref, w2_ref, b2_ref, alpha_ref,
                           out_ref, xp_ref, a_ref, ap_ref, patch_ref):
    # x_ref : (H, W, C)        whole image, resident per batch element
    # w*_ref: (KP, C) bf16     resident (KP = 9*C zero-padded to a lane multiple)
    # b*_ref: (1, C) f32       alpha_ref: (1,) f32 in SMEM
    # out_ref: (TH, W, C)      one output strip
    # xp_ref : (TA+2, W+2, C)  f32 reflect-padded input rows for conv1
    # a_ref  : (TA, W, C)      f32 conv1+PReLU activation strip (1-row halo)
    # ap_ref : (TH+2, W+2, C)  f32 reflect-padded activation rows for conv2
    # patch_ref: (TA*W, KP)    bf16 im2col buffer shared by both convs
    H, W, C = x_ref.shape
    TH = out_ref.shape[0]
    TA = a_ref.shape[0]
    K = 9 * C
    KP = patch_ref.shape[1]
    M1 = TA * W
    M2 = TH * W

    row0 = pl.program_id(1) * TH                       # first output row of this strip
    # conv1 is evaluated on the contiguous activation rows [alo, alo+TA);
    # this window always contains every (reflected) row conv2 needs.
    alo = jnp.clip(row0 - 1, 0, H - TA)
    d0 = row0 - alo                                    # index of row `row0` inside a_ref

    # Zero the K-padding tail (matching weight rows are zero, so the matmul is
    # exact; keeps the contraction dim lane-aligned).
    if KP > K:
        patch_ref[:, K:KP] = jnp.zeros((M1, KP - K), patch_ref.dtype)

    # ---- reflect-pad-1 input rows [alo-1, alo+TA] into xp_ref ---------------
    # Interior rows are one contiguous copy; the two halo rows use reflected
    # scalar indices (a width-1 reflection never needs a reversal).
    xp_ref[1:TA + 1, 1:W + 1, :] = x_ref[pl.ds(alo, TA), :, :].astype(jnp.float32)
    top = jnp.where(alo > 0, alo - 1, 1)               # reflect(alo - 1)
    bot = jnp.where(alo + TA < H, alo + TA, H - 2)     # reflect(alo + TA)
    xp_ref[0:1, 1:W + 1, :] = x_ref[pl.ds(top, 1), :, :].astype(jnp.float32)
    xp_ref[TA + 1:TA + 2, 1:W + 1, :] = x_ref[pl.ds(bot, 1), :, :].astype(jnp.float32)
    xp_ref[:, 0:1, :] = xp_ref[:, 2:3, :]              # col -1 -> col 1
    xp_ref[:, W + 1:W + 2, :] = xp_ref[:, W - 1:W, :]  # col W  -> col W-2

    # ---- conv1: im2col (bf16) -> one MXU matmul -> bias -> PReLU ------------
    for kh in range(3):
        for kw in range(3):
            k = kh * 3 + kw
            patch_ref[0:M1, k * C:(k + 1) * C] = (
                xp_ref[kh:kh + TA, kw:kw + W, :].reshape(M1, C)
                .astype(patch_ref.dtype))
    y = jnp.dot(patch_ref[...], w1_ref[...],
                preferred_element_type=jnp.float32)     # (M1, C) f32 accum
    y = y + b1_ref[...]
    alpha = alpha_ref[0]                                # SMEM scalar
    y = jnp.maximum(y, 0.0) + alpha * jnp.minimum(y, 0.0)
    a_ref[...] = y.reshape(TA, W, C)

    # ---- reflect-pad-1 the activation rows conv2 needs into ap_ref ----------
    ap_ref[1:TH + 1, 1:W + 1, :] = a_ref[pl.ds(d0, TH), :, :]
    a_top = jnp.where(row0 > 0, d0 - 1, 1)                       # reflect(row0-1)
    a_bot = jnp.where(row0 + TH < H, d0 + TH, d0 + TH - 2)       # reflect(row0+TH)
    ap_ref[0:1, 1:W + 1, :] = a_ref[pl.ds(a_top, 1), :, :]
    ap_ref[TH + 1:TH + 2, 1:W + 1, :] = a_ref[pl.ds(a_bot, 1), :, :]
    ap_ref[:, 0:1, :] = ap_ref[:, 2:3, :]
    ap_ref[:, W + 1:W + 2, :] = ap_ref[:, W - 1:W, :]

    # ---- conv2 -> *0.1 + residual -------------------------------------------
    for kh in range(3):
        for kw in range(3):
            k = kh * 3 + kw
            patch_ref[0:M2, k * C:(k + 1) * C] = (
                ap_ref[kh:kh + TH, kw:kw + W, :].reshape(M2, C)
                .astype(patch_ref.dtype))
    out = jnp.dot(patch_ref[0:M2, :], w2_ref[...],
                  preferred_element_type=jnp.float32)   # (M2, C) f32 accum
    out = out + b2_ref[...]
    # Residual read from the resident input block here (not kept live across
    # both convs), per perf feedback.
    res = x_ref[pl.ds(row0, TH), :, :].astype(jnp.float32).reshape(M2, C)
    out = out * 0.1 + res
    out_ref[...] = out.reshape(TH, W, C).astype(out_ref.dtype)


def _pick_strip_rows(H):
    """Strip height TH: a multiple of 8 that divides H, close to 32 rows and
    giving >= 2 strips; falls back to the whole image for small / odd H."""
    if H % 8 != 0:
        return H
    best = None
    for th in range(8, H, 8):
        if H % th == 0 and (best is None or abs(th - 32) < abs(best - 32)):
            best = th
    return best if best is not None else H


def _vmem_limit_bytes():
    # Perf feedback: don't request all of v7x's 64 MiB; gate the limit per chip.
    try:
        cap = int(pltpu.get_tpu_info().vmem_capacity_bytes)
    except Exception:
        cap = None
    if cap is None:
        return 48 * 1024 * 1024          # safe on every generation
    return min(64 * 1024 * 1024, (3 * cap) // 4)   # 48 MiB on v7x, 64 MiB on v5e/v6e


def residual_block_forward(x_nchw, params):
    """x_nchw: (N, C, H, W), matching the PyTorch module's input layout.

    params: w1/w2 stored as (kh, kw, in_c, out_c), b1/b2 as (1, C), alpha scalar.
    NOTE: a real PyTorch Conv2d weight is (out_c, in_c, kh, kw) and must be
    permuted with .transpose(2, 3, 1, 0) before being passed here.
    """
    w1, b1, alpha, w2, b2 = (params["w1"], params["b1"], params["alpha"],
                             params["w2"], params["b2"])
    x = jnp.transpose(x_nchw, (0, 2, 3, 1))            # NCHW -> NHWC
    N, H, W, C = x.shape
    assert H >= 2 and W >= 2, "reflection padding needs spatial dims >= 2"
    dtype = x.dtype

    TH = _pick_strip_rows(H)                           # output rows per strip
    S = H // TH                                        # strips per image
    TA = min(TH + 2, H)                                # conv1 rows per strip (1-row halo)
    K = 9 * C
    KP = ((K + 127) // 128) * 128                      # K zero-padded to a lane multiple

    # (kh, kw, ci, co) -> ((kh*3+kw)*C + ci, co): matches the im2col layout.
    # bf16 MXU operands; accumulation stays f32 inside the kernel.
    w1m = jnp.pad(w1.reshape(K, C), ((0, KP - K), (0, 0))).astype(jnp.bfloat16)
    w2m = jnp.pad(w2.reshape(K, C), ((0, KP - K), (0, 0))).astype(jnp.bfloat16)
    b1f = b1.reshape(1, C).astype(jnp.float32)
    b2f = b2.reshape(1, C).astype(jnp.float32)
    alpha1 = alpha.reshape(1).astype(jnp.float32)      # scalar for SMEM

    out = pl.pallas_call(
        _residual_block_kernel,
        out_shape=jax.ShapeDtypeStruct((N, H, W, C), dtype),
        grid=(N, S),
        in_specs=[
            # whole image, index constant across the strip axis -> DMA'd once
            # per image and kept VMEM-resident (halo + residual source).
            pl.BlockSpec((None, H, W, C), lambda n, s: (n, 0, 0, 0)),
            pl.BlockSpec((KP, C), lambda n, s: (0, 0)),            # w1 resident
            pl.BlockSpec((1, C), lambda n, s: (0, 0)),             # b1
            pl.BlockSpec((KP, C), lambda n, s: (0, 0)),            # w2 resident
            pl.BlockSpec((1, C), lambda n, s: (0, 0)),             # b2
            pl.BlockSpec(memory_space=pltpu.MemorySpace.SMEM),     # PReLU alpha
        ],
        out_specs=pl.BlockSpec((None, TH, W, C), lambda n, s: (n, s, 0, 0)),
        scratch_shapes=[
            pltpu.VMEM((TA + 2, W + 2, C), jnp.float32),   # reflect-padded x strip
            pltpu.VMEM((TA, W, C), jnp.float32),           # conv1 activation strip
            pltpu.VMEM((TH + 2, W + 2, C), jnp.float32),   # reflect-padded activation
            pltpu.VMEM((TA * W, KP), jnp.bfloat16),        # im2col patches (bf16)
        ],
        compiler_params=pltpu.CompilerParams(
            dimension_semantics=("parallel", "parallel"),
            vmem_limit_bytes=_vmem_limit_bytes(),
        ),
    )(x, w1m, b1f, w2m, b2f, alpha1)

    return jnp.transpose(out, (0, 3, 1, 2))            # NHWC -> NCHW


def init_params(key, channels):
    # Deterministic synthetic init: shapes follow nn.Conv2d(channels, channels, 3)
    # and nn.PReLU() (single shared parameter initialized to 0.25).
    k1, k2, k3, k4 = jax.random.split(key, 4)
    fan_in = channels * 9
    scale = 1.0 / jnp.sqrt(fan_in)
    # weights stored as (kh, kw, in_c, out_c) for the NHWC kernel
    w1 = jax.random.uniform(k1, (3, 3, channels, channels), jnp.float32,
                            -scale, scale)
    b1 = jax.random.uniform(k2, (1, channels), jnp.float32, -scale, scale)
    w2 = jax.random.uniform(k3, (3, 3, channels, channels), jnp.float32,
                            -scale, scale)
    b2 = jax.random.uniform(k4, (1, channels), jnp.float32, -scale, scale)
    alpha = jnp.full((1, 1), 0.25, jnp.float32)        # nn.PReLU default
    return {"w1": w1, "b1": b1, "alpha": alpha, "w2": w2, "b2": b2}


if __name__ == "__main__":
    key = jax.random.PRNGKey(0)
    kx, kp = jax.random.split(key)

    N, C, H, W = 2, 4, 16, 16
    x = jax.random.normal(kx, (N, C, H, W), jnp.float32)
    params = init_params(kp, C)

    out = residual_block_forward(x, params)
    jax.block_until_ready(out)
    assert out.shape == (N, C, H, W), out.shape
    print("KERNEL_OK")
</pallas_src>

<mosaic_0001>
module attributes {stable_mosaic.version = 11 : i64} {
  func.func @_residual_block_kernel(%arg0: i32, %arg1: i32, %arg2: memref<1x16x16x4xf32, #tpu.memory_space<vmem>>, %arg3: memref<128x4xbf16, #tpu.memory_space<vmem>>, %arg4: memref<1x4xf32, #tpu.memory_space<vmem>>, %arg5: memref<128x4xbf16, #tpu.memory_space<vmem>>, %arg6: memref<1x4xf32, #tpu.memory_space<vmem>>, %arg7: memref<1xf32, #tpu.memory_space<smem>>, %arg8: memref<1x8x16x4xf32, #tpu.memory_space<vmem>>, %arg9: memref<12x18x4xf32, #tpu.memory_space<vmem>>, %arg10: memref<10x16x4xf32, #tpu.memory_space<vmem>>, %arg11: memref<10x18x4xf32, #tpu.memory_space<vmem>>, %arg12: memref<160x128xbf16, #tpu.memory_space<vmem>>) attributes {dimension_semantics = [#tpu.dimension_semantics<parallel>, #tpu.dimension_semantics<parallel>], iteration_bounds = array<i64: 2, 2>, scalar_prefetch = 0 : i64, scratch_operands = 4 : i64, tpu.core_type = #tpu.core_type<tc>, window_params = [{transform_indices = @transform_0, window_bounds = array<i64: 1, 16, 16, 4>}, {pipeline_mode = #tpu.pipeline_mode<synchronous>, transform_indices = @transform_1, window_bounds = array<i64: 128, 4>}, {pipeline_mode = #tpu.pipeline_mode<synchronous>, transform_indices = @transform_2, window_bounds = array<i64: 1, 4>}, {pipeline_mode = #tpu.pipeline_mode<synchronous>, transform_indices = @transform_3, window_bounds = array<i64: 128, 4>}, {pipeline_mode = #tpu.pipeline_mode<synchronous>, transform_indices = @transform_4, window_bounds = array<i64: 1, 4>}, {transform_indices = @transform_5, window_bounds = array<i64: 1>}, {transform_indices = @transform_6, window_bounds = array<i64: 1, 8, 16, 4>}]} {
    %c8_i32 = arith.constant 8 : i32
    %0 = arith.muli %arg1, %c8_i32 : i32
    %c1_i32 = arith.constant 1 : i32
    %1 = arith.subi %0, %c1_i32 : i32
    %c0_i32 = arith.constant 0 : i32
    %c6_i32 = arith.constant 6 : i32
    %2 = arith.maxsi %c0_i32, %1 : i32
    %3 = arith.minsi %c6_i32, %2 : i32
    %4 = arith.subi %0, %3 : i32
    %cst = arith.constant 0.000000e+00 : bf16
    %5 = vector.broadcast %cst : bf16 to vector<160x92xbf16>
    %c0 = arith.constant 0 : index
    %c36 = arith.constant 36 : index
    %6 = vector.load %arg12[%c0, %c36] : memref<160x128xbf16, #tpu.memory_space<vmem>>, vector<160x92xbf16>
    tpu.vector_store %arg12[%c0, %c36], %5 {strides = array<i32>} : memref<160x128xbf16, #tpu.memory_space<vmem>>, vector<160x92xbf16>,
    %c0_0 = arith.constant 0 : index
    %7 = arith.index_cast %3 : i32 to index
    %c0_1 = arith.constant 0 : index
    %c0_2 = arith.constant 0 : index
    %8 = vector.load %arg2[%c0_0, %7, %c0_1, %c0_2] : memref<1x16x16x4xf32, #tpu.memory_space<vmem>>, vector<1x10x16x4xf32>
    %9 = vector.shape_cast %8 : vector<1x10x16x4xf32> to vector<10x16x4xf32>
    %c1 = arith.constant 1 : index
    %c1_3 = arith.constant 1 : index
    %c0_4 = arith.constant 0 : index
    %10 = vector.load %arg9[%c1, %c1_3, %c0_4] : memref<12x18x4xf32, #tpu.memory_space<vmem>>, vector<10x16x4xf32>
    tpu.vector_store %arg9[%c1, %c1_3, %c0_4], %9 {strides = array<i32>} : memref<12x18x4xf32, #tpu.memory_space<vmem>>, vector<10x16x4xf32>,
    %c0_i32_5 = arith.constant 0 : i32
    %11 = arith.cmpi sgt, %3, %c0_i32_5 : i32
    %c1_i32_6 = arith.constant 1 : i32
    %12 = arith.subi %3, %c1_i32_6 : i32
    %c1_i32_7 = arith.constant 1 : i32
    %13 = arith.select %11, %12, %c1_i32_7 : i32
    %c10_i32 = arith.constant 10 : i32
    %14 = arith.addi %3, %c10_i32 : i32
    %c16_i32 = arith.constant 16 : i32
    %15 = arith.cmpi slt, %14, %c16_i32 : i32
    %c10_i32_8 = arith.constant 10 : i32
    %16 = arith.addi %3, %c10_i32_8 : i32
    %c14_i32 = arith.constant 14 : i32
    %17 = arith.select %15, %16, %c14_i32 : i32
    %c0_9 = arith.constant 0 : index
    %18 = arith.index_cast %13 : i32 to index
    %c0_10 = arith.constant 0 : index
    %c0_11 = arith.constant 0 : index
    %19 = vector.load %arg2[%c0_9, %18, %c0_10, %c0_11] : memref<1x16x16x4xf32, #tpu.memory_space<vmem>>, vector<1x1x16x4xf32>
    %20 = vector.shape_cast %19 : vector<1x1x16x4xf32> to vector<1x16x4xf32>
    %c0_12 = arith.constant 0 : index
    %c1_13 = arith.constant 1 : index
    %c0_14 = arith.constant 0 : index
    %21 = vector.load %arg9[%c0_12, %c1_13, %c0_14] : memref<12x18x4xf32, #tpu.memory_space<vmem>>, vector<1x16x4xf32>
    tpu.vector_store %arg9[%c0_12, %c1_13, %c0_14], %20 {strides = array<i32>} : memref<12x18x4xf32, #tpu.memory_space<vmem>>, vector<1x16x4xf32>,
    %c0_15 = arith.constant 0 : index
    %22 = arith.index_cast %17 : i32 to index
    %c0_16 = arith.constant 0 : index
    %c0_17 = arith.constant 0 : index
    %23 = vector.load %arg2[%c0_15, %22, %c0_16, %c0_17] : memref<1x16x16x4xf32, #tpu.memory_space<vmem>>, vector<1x1x16x4xf32>
    %24 = vector.shape_cast %23 : vector<1x1x16x4xf32> to vector<1x16x4xf32>
    %c11 = arith.constant 11 : index
    %c1_18 = arith.constant 1 : index
    %c0_19 = arith.constant 0 : index
    %25 = vector.load %arg9[%c11, %c1_18, %c0_19] : memref<12x18x4xf32, #tpu.memory_space<vmem>>, vector<1x16x4xf32>
    tpu.vector_store %arg9[%c11, %c1_18, %c0_19], %24 {strides = array<i32>} : memref<12x18x4xf32, #tpu.memory_space<vmem>>, vector<1x16x4xf32>,
    %c0_20 = arith.constant 0 : index
    %c2 = arith.constant 2 : index
    %c0_21 = arith.constant 0 : index
    %26 = vector.load %arg9[%c0_20, %c2, %c0_21] : memref<12x18x4xf32, #tpu.memory_space<vmem>>, vector<12x1x4xf32>
    %c0_22 = arith.constant 0 : index
    %c0_23 = arith.constant 0 : index
    %c0_24 = arith.constant 0 : index
    %27 = vector.load %arg9[%c0_22, %c0_23, %c0_24] : memref<12x18x4xf32, #tpu.memory_space<vmem>>, vector<12x1x4xf32>
    tpu.vector_store %arg9[%c0_22, %c0_23, %c0_24], %26 {strides = array<i32>} : memref<12x18x4xf32, #tpu.memory_space<vmem>>, vector<12x1x4xf32>,
    %c0_25 = arith.constant 0 : index
    %c15 = arith.constant 15 : index
    %c0_26 = arith.constant 0 : index
    %28 = vector.load %arg9[%c0_25, %c15, %c0_26] : memref<12x18x4xf32, #tpu.memory_space<vmem>>, vector<12x1x4xf32>
    %c0_27 = arith.constant 0 : index
    %c17 = arith.constant 17 : index
    %c0_28 = arith.constant 0 : index
    %29 = vector.load %arg9[%c0_27, %c17, %c0_28] : memref<12x18x4xf32, #tpu.memory_space<vmem>>, vector<12x1x4xf32>
    tpu.vector_store %arg9[%c0_27, %c17, %c0_28], %28 {strides = array<i32>} : memref<12x18x4xf32, #tpu.memory_space<vmem>>, vector<12x1x4xf32>,
    %c0_29 = arith.constant 0 : index
    %c0_30 = arith.constant 0 : index
    %c0_31 = arith.constant 0 : index
    %30 = vector.load %arg9[%c0_29, %c0_30, %c0_31] : memref<12x18x4xf32, #tpu.memory_space<vmem>>, vector<10x16x4xf32>
    %31 = vector.shape_cast %30 : vector<10x16x4xf32> to vector<160x4xf32>
    %32 = arith.truncf %31 : vector<160x4xf32> to vector<160x4xbf16>
    %c0_32 = arith.constant 0 : index
    %c0_33 = arith.constant 0 : index
    %33 = vector.load %arg12[%c0_32, %c0_33] : memref<160x128xbf16, #tpu.memory_space<vmem>>, vector<160x4xbf16>
    tpu.vector_store %arg12[%c0_32, %c0_33], %32 {strides = array<i32>} : memref<160x128xbf16, #tpu.memory_space<vmem>>, vector<160x4xbf16>,
    %c0_34 = arith.constant 0 : index
    %c1_35 = arith.constant 1 : index
    %c0_36 = arith.constant 0 : index
    %34 = vector.load %arg9[%c0_34, %c1_35, %c0_36] : memref<12x18x4xf32, #tpu.memory_space<vmem>>, vector<10x16x4xf32>
    %35 = vector.shape_cast %34 : vector<10x16x4xf32> to vector<160x4xf32>
    %36 = arith.truncf %35 : vector<160x4xf32> to vector<160x4xbf16>
    %c0_37 = arith.constant 0 : index
    %c4 = arith.constant 4 : index
    %37 = vector.load %arg12[%c0_37, %c4] : memref<160x128xbf16, #tpu.memory_space<vmem>>, vector<160x4xbf16>
    tpu.vector_store %arg12[%c0_37, %c4], %36 {strides = array<i32>} : memref<160x128xbf16, #tpu.memory_space<vmem>>, vector<160x4xbf16>,
    %c0_38 = arith.constant 0 : index
    %c2_39 = arith.constant 2 : index
    %c0_40 = arith.constant 0 : index
    %38 = vector.load %arg9[%c0_38, %c2_39, %c0_40] : memref<12x18x4xf32, #tpu.memory_space<vmem>>, vector<10x16x4xf32>
    %39 = vector.shape_cast %38 : vector<10x16x4xf32> to vector<160x4xf32>
    %40 = arith.truncf %39 : vector<160x4xf32> to vector<160x4xbf16>
    %c0_41 = arith.constant 0 : index
    %c8 = arith.constant 8 : index
    %41 = vector.load %arg12[%c0_41, %c8] : memref<160x128xbf16, #tpu.memory_space<vmem>>, vector<160x4xbf16>
    tpu.vector_store %arg12[%c0_41, %c8], %40 {strides = array<i32>} : memref<160x128xbf16, #tpu.memory_space<vmem>>, vector<160x4xbf16>,
    %c1_42 = arith.constant 1 : index
    %c0_43 = arith.constant 0 : index
    %c0_44 = arith.constant 0 : index
    %42 = vector.load %arg9[%c1_42, %c0_43, %c0_44] : memref<12x18x4xf32, #tpu.memory_space<vmem>>, vector<10x16x4xf32>
    %43 = vector.shape_cast %42 : vector<10x16x4xf32> to vector<160x4xf32>
    %44 = arith.truncf %43 : vector<160x4xf32> to vector<160x4xbf16>
    %c0_45 = arith.constant 0 : index
    %c12 = arith.constant 12 : index
    %45 = vector.load %arg12[%c0_45, %c12] : memref<160x128xbf16, #tpu.memory_space<vmem>>, vector<160x4xbf16>
    tpu.vector_store %arg12[%c0_45, %c12], %44 {strides = array<i32>} : memref<160x128xbf16, #tpu.memory_space<vmem>>, vector<160x4xbf16>,
    %c1_46 = arith.constant 1 : index
    %c1_47 = arith.constant 1 : index
    %c0_48 = arith.constant 0 : index
    %46 = vector.load %arg9[%c1_46, %c1_47, %c0_48] : memref<12x18x4xf32, #tpu.memory_space<vmem>>, vector<10x16x4xf32>
    %47 = vector.shape_cast %46 : vector<10x16x4xf32> to vector<160x4xf32>
    %48 = arith.truncf %47 : vector<160x4xf32> to vector<160x4xbf16>
    %c0_49 = arith.constant 0 : index
    %c16 = arith.constant 16 : index
    %49 = vector.load %arg12[%c0_49, %c16] : memref<160x128xbf16, #tpu.memory_space<vmem>>, vector<160x4xbf16>
    tpu.vector_store %arg12[%c0_49, %c16], %48 {strides = array<i32>} : memref<160x128xbf16, #tpu.memory_space<vmem>>, vector<160x4xbf16>,
    %c1_50 = arith.constant 1 : index
    %c2_51 = arith.constant 2 : index
    %c0_52 = arith.constant 0 : index
    %50 = vector.load %arg9[%c1_50, %c2_51, %c0_52] : memref<12x18x4xf32, #tpu.memory_space<vmem>>, vector<10x16x4xf32>
    %51 = vector.shape_cast %50 : vector<10x16x4xf32> to vector<160x4xf32>
    %52 = arith.truncf %51 : vector<160x4xf32> to vector<160x4xbf16>
    %c0_53 = arith.constant 0 : index
    %c20 = arith.constant 20 : index
    %53 = vector.load %arg12[%c0_53, %c20] : memref<160x128xbf16, #tpu.memory_space<vmem>>, vector<160x4xbf16>
    tpu.vector_store %arg12[%c0_53, %c20], %52 {strides = array<i32>} : memref<160x128xbf16, #tpu.memory_space<vmem>>, vector<160x4xbf16>,
    %c2_54 = arith.constant 2 : index
    %c0_55 = arith.constant 0 : index
    %c0_56 = arith.constant 0 : index
    %54 = vector.load %arg9[%c2_54, %c0_55, %c0_56] : memref<12x18x4xf32, #tpu.memory_space<vmem>>, vector<10x16x4xf32>
    %55 = vector.shape_cast %54 : vector<10x16x4xf32> to vector<160x4xf32>
    %56 = arith.truncf %55 : vector<160x4xf32> to vector<160x4xbf16>
    %c0_57 = arith.constant 0 : index
    %c24 = arith.constant 24 : index
    %57 = vector.load %arg12[%c0_57, %c24] : memref<160x128xbf16, #tpu.memory_space<vmem>>, vector<160x4xbf16>
    tpu.vector_store %arg12[%c0_57, %c24], %56 {strides = array<i32>} : memref<160x128xbf16, #tpu.memory_space<vmem>>, vector<160x4xbf16>,
    %c2_58 = arith.constant 2 : index
    %c1_59 = arith.constant 1 : index
    %c0_60 = arith.constant 0 : index
    %58 = vector.load %arg9[%c2_58, %c1_59, %c0_60] : memref<12x18x4xf32, #tpu.memory_space<vmem>>, vector<10x16x4xf32>
    %59 = vector.shape_cast %58 : vector<10x16x4xf32> to vector<160x4xf32>
    %60 = arith.truncf %59 : vector<160x4xf32> to vector<160x4xbf16>
    %c0_61 = arith.constant 0 : index
    %c28 = arith.constant 28 : index
    %61 = vector.load %arg12[%c0_61, %c28] : memref<160x128xbf16, #tpu.memory_space<vmem>>, vector<160x4xbf16>
    tpu.vector_store %arg12[%c0_61, %c28], %60 {strides = array<i32>} : memref<160x128xbf16, #tpu.memory_space<vmem>>, vector<160x4xbf16>,
    %c2_62 = arith.constant 2 : index
    %c2_63 = arith.constant 2 : index
    %c0_64 = arith.constant 0 : index
    %62 = vector.load %arg9[%c2_62, %c2_63, %c0_64] : memref<12x18x4xf32, #tpu.memory_space<vmem>>, vector<10x16x4xf32>
    %63 = vector.shape_cast %62 : vector<10x16x4xf32> to vector<160x4xf32>
    %64 = arith.truncf %63 : vector<160x4xf32> to vector<160x4xbf16>
    %c0_65 = arith.constant 0 : index
    %c32 = arith.constant 32 : index
    %65 = vector.load %arg12[%c0_65, %c32] : memref<160x128xbf16, #tpu.memory_space<vmem>>, vector<160x4xbf16>
    tpu.vector_store %arg12[%c0_65, %c32], %64 {strides = array<i32>} : memref<160x128xbf16, #tpu.memory_space<vmem>>, vector<160x4xbf16>,
    %c0_66 = arith.constant 0 : index
    %c0_67 = arith.constant 0 : index
    %66 = vector.load %arg12[%c0_66, %c0_67] : memref<160x128xbf16, #tpu.memory_space<vmem>>, vector<160x128xbf16>
    %c0_68 = arith.constant 0 : index
    %c0_69 = arith.constant 0 : index
    %67 = vector.load %arg3[%c0_68, %c0_69] : memref<128x4xbf16, #tpu.memory_space<vmem>>, vector<128x4xbf16>
    %cst_70 = arith.constant dense<0.000000e+00> : vector<160x4xf32>
    %68 = tpu.matmul %66, %67, %cst_70 {dimension_numbers = #tpu.dot_dimension_numbers<[1], [0], [0], [1], [0, 0, 1, 1], [], []>} : vector<160x128xbf16>, vector<128x4xbf16>, vector<160x4xf32> -> vector<160x4xf32>
    %c0_71 = arith.constant 0 : index
    %c0_72 = arith.constant 0 : index
    %69 = vector.load %arg4[%c0_71, %c0_72] : memref<1x4xf32, #tpu.memory_space<vmem>>, vector<1x4xf32>
    %70 = vector.broadcast %69 : vector<1x4xf32> to vector<160x4xf32>
    %71 = arith.addf %68, %70 : vector<160x4xf32>
    %c0_73 = arith.constant 0 : index
    %72 = memref.load %arg7[%c0_73] : memref<1xf32, #tpu.memory_space<smem>>
    %cst_74 = arith.constant 0.000000e+00 : f32
    %73 = vector.broadcast %cst_74 : f32 to vector<160x4xf32>
    %74 = arith.maximumf %71, %73 : vector<160x4xf32>
    %cst_75 = arith.constant 0.000000e+00 : f32
    %75 = vector.broadcast %cst_75 : f32 to vector<160x4xf32>
    %76 = arith.minimumf %71, %75 : vector<160x4xf32>
    %77 = vector.broadcast %72 : f32 to vector<160x4xf32>
    %78 = arith.mulf %77, %76 : vector<160x4xf32>
    %79 = arith.addf %74, %78 : vector<160x4xf32>
    %80 = vector.shape_cast %79 : vector<160x4xf32> to vector<10x16x4xf32>
    %c0_76 = arith.constant 0 : index
    %c0_77 = arith.constant 0 : index
    %c0_78 = arith.constant 0 : index
    %81 = vector.load %arg10[%c0_76, %c0_77, %c0_78] : memref<10x16x4xf32, #tpu.memory_space<vmem>>, vector<10x16x4xf32>
    tpu.vector_store %arg10[%c0_76, %c0_77, %c0_78], %80 {strides = array<i32>} : memref<10x16x4xf32, #tpu.memory_space<vmem>>, vector<10x16x4xf32>,
    %82 = arith.index_cast %4 : i32 to index
    %c0_79 = arith.constant 0 : index
    %c0_80 = arith.constant 0 : index
    %83 = vector.load %arg10[%82, %c0_79, %c0_80] : memref<10x16x4xf32, #tpu.memory_space<vmem>>, vector<8x16x4xf32>
    %c1_81 = arith.constant 1 : index
    %c1_82 = arith.constant 1 : index
    %c0_83 = arith.constant 0 : index
    %84 = vector.load %arg11[%c1_81, %c1_82, %c0_83] : memref<10x18x4xf32, #tpu.memory_space<vmem>>, vector<8x16x4xf32>
    tpu.vector_store %arg11[%c1_81, %c1_82, %c0_83], %83 {strides = array<i32>} : memref<10x18x4xf32, #tpu.memory_space<vmem>>, vector<8x16x4xf32>,
    %c0_i32_84 = arith.constant 0 : i32
    %85 = arith.cmpi sgt, %0, %c0_i32_84 : i32
    %c1_i32_85 = arith.constant 1 : i32
    %86 = arith.subi %4, %c1_i32_85 : i32
    %c1_i32_86 = arith.constant 1 : i32
    %87 = arith.select %85, %86, %c1_i32_86 : i32
    %c8_i32_87 = arith.constant 8 : i32
    %88 = arith.addi %0, %c8_i32_87 : i32
    %c16_i32_88 = arith.constant 16 : i32
    %89 = arith.cmpi slt, %88, %c16_i32_88 : i32
    %c8_i32_89 = arith.constant 8 : i32
    %90 = arith.addi %4, %c8_i32_89 : i32
    %c8_i32_90 = arith.constant 8 : i32
    %91 = arith.addi %4, %c8_i32_90 : i32
    %c2_i32 = arith.constant 2 : i32
    %92 = arith.subi %91, %c2_i32 : i32
    %93 = arith.select %89, %90, %92 : i32
    %94 = arith.index_cast %87 : i32 to index
    %c0_91 = arith.constant 0 : index
    %c0_92 = arith.constant 0 : index
    %95 = vector.load %arg10[%94, %c0_91, %c0_92] : memref<10x16x4xf32, #tpu.memory_space<vmem>>, vector<1x16x4xf32>
    %c0_93 = arith.constant 0 : index
    %c1_94 = arith.constant 1 : index
    %c0_95 = arith.constant 0 : index
    %96 = vector.load %arg11[%c0_93, %c1_94, %c0_95] : memref<10x18x4xf32, #tpu.memory_space<vmem>>, vector<1x16x4xf32>
    tpu.vector_store %arg11[%c0_93, %c1_94, %c0_95], %95 {strides = array<i32>} : memref<10x18x4xf32, #tpu.memory_space<vmem>>, vector<1x16x4xf32>,
    %97 = arith.index_cast %93 : i32 to index
    %c0_96 = arith.constant 0 : index
    %c0_97 = arith.constant 0 : index
    %98 = vector.load %arg10[%97, %c0_96, %c0_97] : memref<10x16x4xf32, #tpu.memory_space<vmem>>, vector<1x16x4xf32>
    %c9 = arith.constant 9 : index
    %c1_98 = arith.constant 1 : index
    %c0_99 = arith.constant 0 : index
    %99 = vector.load %arg11[%c9, %c1_98, %c0_99] : memref<10x18x4xf32, #tpu.memory_space<vmem>>, vector<1x16x4xf32>
    tpu.vector_store %arg11[%c9, %c1_98, %c0_99], %98 {strides = array<i32>} : memref<10x18x4xf32, #tpu.memory_space<vmem>>, vector<1x16x4xf32>,
    %c0_100 = arith.constant 0 : index
    %c2_101 = arith.constant 2 : index
    %c0_102 = arith.constant 0 : index
    %100 = vector.load %arg11[%c0_100, %c2_101, %c0_102] : memref<10x18x4xf32, #tpu.memory_space<vmem>>, vector<10x1x4xf32>
    %c0_103 = arith.constant 0 : index
    %c0_104 = arith.constant 0 : index
    %c0_105 = arith.constant 0 : index
    %101 = vector.load %arg11[%c0_103, %c0_104, %c0_105] : memref<10x18x4xf32, #tpu.memory_space<vmem>>, vector<10x1x4xf32>
    tpu.vector_store %arg11[%c0_103, %c0_104, %c0_105], %100 {strides = array<i32>} : memref<10x18x4xf32, #tpu.memory_space<vmem>>, vector<10x1x4xf32>,
    %c0_106 = arith.constant 0 : index
    %c15_107 = arith.constant 15 : index
    %c0_108 = arith.constant 0 : index
    %102 = vector.load %arg11[%c0_106, %c15_107, %c0_108] : memref<10x18x4xf32, #tpu.memory_space<vmem>>, vector<10x1x4xf32>
    %c0_109 = arith.constant 0 : index
    %c17_110 = arith.constant 17 : index
    %c0_111 = arith.constant 0 : index
    %103 = vector.load %arg11[%c0_109, %c17_110, %c0_111] : memref<10x18x4xf32, #tpu.memory_space<vmem>>, vector<10x1x4xf32>
    tpu.vector_store %arg11[%c0_109, %c17_110, %c0_111], %102 {strides = array<i32>} : memref<10x18x4xf32, #tpu.memory_space<vmem>>, vector<10x1x4xf32>,
    %c0_112 = arith.constant 0 : index
    %c0_113 = arith.constant 0 : index
    %c0_114 = arith.constant 0 : index
    %104 = vector.load %arg11[%c0_112, %c0_113, %c0_114] : memref<10x18x4xf32, #tpu.memory_space<vmem>>, vector<8x16x4xf32>
    %105 = vector.shape_cast %104 : vector<8x16x4xf32> to vector<128x4xf32>
    %106 = arith.truncf %105 : vector<128x4xf32> to vector<128x4xbf16>
    %c0_115 = arith.constant 0 : index
    %c0_116 = arith.constant 0 : index
    %107 = vector.load %arg12[%c0_115, %c0_116] : memref<160x128xbf16, #tpu.memory_space<vmem>>, vector<128x4xbf16>
    tpu.vector_store %arg12[%c0_115, %c0_116], %106 {strides = array<i32>} : memref<160x128xbf16, #tpu.memory_space<vmem>>, vector<128x4xbf16>,
    %c0_117 = arith.constant 0 : index
    %c1_118 = arith.constant 1 : index
    %c0_119 = arith.constant 0 : index
    %108 = vector.load %arg11[%c0_117, %c1_118, %c0_119] : memref<10x18x4xf32, #tpu.memory_space<vmem>>, vector<8x16x4xf32>
    %109 = vector.shape_cast %108 : vector<8x16x4xf32> to vector<128x4xf32>
    %110 = arith.truncf %109 : vector<128x4xf32> to vector<128x4xbf16>
    %c0_120 = arith.constant 0 : index
    %c4_121 = arith.constant 4 : index
    %111 = vector.load %arg12[%c0_120, %c4_121] : memref<160x128xbf16, #tpu.memory_space<vmem>>, vector<128x4xbf16>
    tpu.vector_store %arg12[%c0_120, %c4_121], %110 {strides = array<i32>} : memref<160x128xbf16, #tpu.memory_space<vmem>>, vector<128x4xbf16>,
    %c0_122 = arith.constant 0 : index
    %c2_123 = arith.constant 2 : index
    %c0_124 = arith.constant 0 : index
    %112 = vector.load %arg11[%c0_122, %c2_123, %c0_124] : memref<10x18x4xf32, #tpu.memory_space<vmem>>, vector<8x16x4xf32>
    %113 = vector.shape_cast %112 : vector<8x16x4xf32> to vector<128x4xf32>
    %114 = arith.truncf %113 : vector<128x4xf32> to vector<128x4xbf16>
    %c0_125 = arith.constant 0 : index
    %c8_126 = arith.constant 8 : index
    %115 = vector.load %arg12[%c0_125, %c8_126] : memref<160x128xbf16, #tpu.memory_space<vmem>>, vector<128x4xbf16>
    tpu.vector_store %arg12[%c0_125, %c8_126], %114 {strides = array<i32>} : memref<160x128xbf16, #tpu.memory_space<vmem>>, vector<128x4xbf16>,
    %c1_127 = arith.constant 1 : index
    %c0_128 = arith.constant 0 : index
    %c0_129 = arith.constant 0 : index
    %116 = vector.load %arg11[%c1_127, %c0_128, %c0_129] : memref<10x18x4xf32, #tpu.memory_space<vmem>>, vector<8x16x4xf32>
    %117 = vector.shape_cast %116 : vector<8x16x4xf32> to vector<128x4xf32>
    %118 = arith.truncf %117 : vector<128x4xf32> to vector<128x4xbf16>
    %c0_130 = arith.constant 0 : index
    %c12_131 = arith.constant 12 : index
    %119 = vector.load %arg12[%c0_130, %c12_131] : memref<160x128xbf16, #tpu.memory_space<vmem>>, vector<128x4xbf16>
    tpu.vector_store %arg12[%c0_130, %c12_131], %118 {strides = array<i32>} : memref<160x128xbf16, #tpu.memory_space<vmem>>, vector<128x4xbf16>,
    %c1_132 = arith.constant 1 : index
    %c1_133 = arith.constant 1 : index
    %c0_134 = arith.constant 0 : index
    %120 = vector.load %arg11[%c1_132, %c1_133, %c0_134] : memref<10x18x4xf32, #tpu.memory_space<vmem>>, vector<8x16x4xf32>
    %121 = vector.shape_cast %120 : vector<8x16x4xf32> to vector<128x4xf32>
    %122 = arith.truncf %121 : vector<128x4xf32> to vector<128x4xbf16>
    %c0_135 = arith.constant 0 : index
    %c16_136 = arith.constant 16 : index
    %123 = vector.load %arg12[%c0_135, %c16_136] : memref<160x128xbf16, #tpu.memory_space<vmem>>, vector<128x4xbf16>
    tpu.vector_store %arg12[%c0_135, %c16_136], %122 {strides = array<i32>} : memref<160x128xbf16, #tpu.memory_space<vmem>>, vector<128x4xbf16>,
    %c1_137 = arith.constant 1 : index
    %c2_138 = arith.constant 2 : index
    %c0_139 = arith.constant 0 : index
    %124 = vector.load %arg11[%c1_137, %c2_138, %c0_139] : memref<10x18x4xf32, #tpu.memory_space<vmem>>, vector<8x16x4xf32>
    %125 = vector.shape_cast %124 : vector<8x16x4xf32> to vector<128x4xf32>
    %126 = arith.truncf %125 : vector<128x4xf32> to vector<128x4xbf16>
    %c0_140 = arith.constant 0 : index
    %c20_141 = arith.constant 20 : index
    %127 = vector.load %arg12[%c0_140, %c20_141] : memref<160x128xbf16, #tpu.memory_space<vmem>>, vector<128x4xbf16>
    tpu.vector_store %arg12[%c0_140, %c20_141], %126 {strides = array<i32>} : memref<160x128xbf16, #tpu.memory_space<vmem>>, vector<128x4xbf16>,
    %c2_142 = arith.constant 2 : index
    %c0_143 = arith.constant 0 : index
    %c0_144 = arith.constant 0 : index
    %128 = vector.load %arg11[%c2_142, %c0_143, %c0_144] : memref<10x18x4xf32, #tpu.memory_space<vmem>>, vector<8x16x4xf32>
    %129 = vector.shape_cast %128 : vector<8x16x4xf32> to vector<128x4xf32>
    %130 = arith.truncf %129 : vector<128x4xf32> to vector<128x4xbf16>
    %c0_145 = arith.constant 0 : index
    %c24_146 = arith.constant 24 : index
    %131 = vector.load %arg12[%c0_145, %c24_146] : memref<160x128xbf16, #tpu.memory_space<vmem>>, vector<128x4xbf16>
    tpu.vector_store %arg12[%c0_145, %c24_146], %130 {strides = array<i32>} : memref<160x128xbf16, #tpu.memory_space<vmem>>, vector<128x4xbf16>,
    %c2_147 = arith.constant 2 : index
    %c1_148 = arith.constant 1 : index
    %c0_149 = arith.constant 0 : index
    %132 = vector.load %arg11[%c2_147, %c1_148, %c0_149] : memref<10x18x4xf32, #tpu.memory_space<vmem>>, vector<8x16x4xf32>
    %133 = vector.shape_cast %132 : vector<8x16x4xf32> to vector<128x4xf32>
    %134 = arith.truncf %133 : vector<128x4xf32> to vector<128x4xbf16>
    %c0_150 = arith.constant 0 : index
    %c28_151 = arith.constant 28 : index
    %135 = vector.load %arg12[%c0_150, %c28_151] : memref<160x128xbf16, #tpu.memory_space<vmem>>, vector<128x4xbf16>
    tpu.vector_store %arg12[%c0_150, %c28_151], %134 {strides = array<i32>} : memref<160x128xbf16, #tpu.memory_space<vmem>>, vector<128x4xbf16>,
    %c2_152 = arith.constant 2 : index
    %c2_153 = arith.constant 2 : index
    %c0_154 = arith.constant 0 : index
    %136 = vector.load %arg11[%c2_152, %c2_153, %c0_154] : memref<10x18x4xf32, #tpu.memory_space<vmem>>, vector<8x16x4xf32>
    %137 = vector.shape_cast %136 : vector<8x16x4xf32> to vector<128x4xf32>
    %138 = arith.truncf %137 : vector<128x4xf32> to vector<128x4xbf16>
    %c0_155 = arith.constant 0 : index
    %c32_156 = arith.constant 32 : index
    %139 = vector.load %arg12[%c0_155, %c32_156] : memref<160x128xbf16, #tpu.memory_space<vmem>>, vector<128x4xbf16>
    tpu.vector_store %arg12[%c0_155, %c32_156], %138 {strides = array<i32>} : memref<160x128xbf16, #tpu.memory_space<vmem>>, vector<128x4xbf16>,
    %c0_157 = arith.constant 0 : index
    %c0_158 = arith.constant 0 : index
    %140 = vector.load %arg12[%c0_157, %c0_158] : memref<160x128xbf16, #tpu.memory_space<vmem>>, vector<128x128xbf16>
    %c0_159 = arith.constant 0 : index
    %c0_160 = arith.constant 0 : index
    %141 = vector.load %arg5[%c0_159, %c0_160] : memref<128x4xbf16, #tpu.memory_space<vmem>>, vector<128x4xbf16>
    %cst_161 = arith.constant dense<0.000000e+00> : vector<128x4xf32>
    %142 = tpu.matmul %140, %141, %cst_161 {dimension_numbers = #tpu.dot_dimension_numbers<[1], [0], [0], [1], [0, 0, 1, 1], [], []>} : vector<128x128xbf16>, vector<128x4xbf16>, vector<128x4xf32> -> vector<128x4xf32>
    %c0_162 = arith.constant 0 : index
    %c0_163 = arith.constant 0 : index
    %143 = vector.load %arg6[%c0_162, %c0_163] : memref<1x4xf32, #tpu.memory_space<vmem>>, vector<1x4xf32>
    %144 = vector.broadcast %143 : vector<1x4xf32> to vector<128x4xf32>
    %145 = arith.addf %142, %144 : vector<128x4xf32>
    %c0_164 = arith.constant 0 : index
    %146 = arith.index_cast %0 : i32 to index
    %c0_165 = arith.constant 0 : index
    %c0_166 = arith.constant 0 : index
    %147 = vector.load %arg2[%c0_164, %146, %c0_165, %c0_166] : memref<1x16x16x4xf32, #tpu.memory_space<vmem>>, vector<1x8x16x4xf32>
    %148 = vector.shape_cast %147 : vector<1x8x16x4xf32> to vector<8x16x4xf32>
    %149 = vector.shape_cast %148 : vector<8x16x4xf32> to vector<128x4xf32>
    %cst_167 = arith.constant 1.000000e-01 : f32
    %150 = vector.broadcast %cst_167 : f32 to vector<128x4xf32>
    %151 = arith.mulf %145, %150 : vector<128x4xf32>
    %152 = arith.addf %151, %149 : vector<128x4xf32>
    %153 = vector.shape_cast %152 : vector<128x4xf32> to vector<8x16x4xf32>
    %c0_168 = arith.constant 0 : index
    %c0_169 = arith.constant 0 : index
    %c0_170 = arith.constant 0 : index
    %c0_171 = arith.constant 0 : index
    %154 = vector.load %arg8[%c0_168, %c0_169, %c0_170, %c0_171] : memref<1x8x16x4xf32, #tpu.memory_space<vmem>>, vector<1x8x16x4xf32>
    %155 = vector.shape_cast %154 : vector<1x8x16x4xf32> to vector<8x16x4xf32>
    %156 = vector.shape_cast %153 : vector<8x16x4xf32> to vector<1x8x16x4xf32>
    tpu.vector_store %arg8[%c0_168, %c0_169, %c0_170, %c0_171], %156 {strides = array<i32>} : memref<1x8x16x4xf32, #tpu.memory_space<vmem>>, vector<1x8x16x4xf32>,
    return
  }
  func.func @transform_0(%arg0: i32, %arg1: i32) -> (i32, i32, i32, i32) {
    %c0_i32 = arith.constant 0 : i32
    %c0_i32_0 = arith.constant 0 : i32
    %c0_i32_1 = arith.constant 0 : i32
    %c0_i32_2 = arith.constant 0 : i32
    return %arg0, %c0_i32, %c0_i32_0, %c0_i32_1 : i32, i32, i32, i32
  }
  func.func @transform_1(%arg0: i32, %arg1: i32) -> (i32, i32) {
    %c0_i32 = arith.constant 0 : i32
    %c0_i32_0 = arith.constant 0 : i32
    %c0_i32_1 = arith.constant 0 : i32
    return %c0_i32, %c0_i32_0 : i32, i32
  }
  func.func @transform_2(%arg0: i32, %arg1: i32) -> (i32, i32) {
    %c0_i32 = arith.constant 0 : i32
    %c0_i32_0 = arith.constant 0 : i32
    %c0_i32_1 = arith.constant 0 : i32
    return %c0_i32, %c0_i32_0 : i32, i32
  }
  func.func @transform_3(%arg0: i32, %arg1: i32) -> (i32, i32) {
    %c0_i32 = arith.constant 0 : i32
    %c0_i32_0 = arith.constant 0 : i32
    %c0_i32_1 = arith.constant 0 : i32
    return %c0_i32, %c0_i32_0 : i32, i32
  }
  func.func @transform_4(%arg0: i32, %arg1: i32) -> (i32, i32) {
    %c0_i32 = arith.constant 0 : i32
    %c0_i32_0 = arith.constant 0 : i32
    %c0_i32_1 = arith.constant 0 : i32
    return %c0_i32, %c0_i32_0 : i32, i32
  }
  func.func @transform_5(%arg0: i32, %arg1: i32) -> i32 {
    %c0_i32 = arith.constant 0 : i32
    %c0_i32_0 = arith.constant 0 : i32
    return %c0_i32 : i32
  }
  func.func @transform_6(%arg0: i32, %arg1: i32) -> (i32, i32, i32, i32) {
    %c0_i32 = arith.constant 0 : i32
    %c0_i32_0 = arith.constant 0 : i32
    %c0_i32_1 = arith.constant 0 : i32
    return %arg0, %arg1, %c0_i32, %c0_i32_0 : i32, i32, i32, i32
  }
}

</mosaic_0001>

<bundles_post_ra>
// kernel: tpu_custom_call.1
= control target key start
LH: loop header
LB: loop body
LE: loop exit
PB: predicated region body
PF: predicated region fallthrough
CT: control target
= control target key end

     0   :  { %s4803_s23 = smov 0   ;;  %s4805_s24 = smov 0   ;;  %s6200_s0 = inlined_call_operand.vmem [shape: f32[2,16,16,4], index: 0, kind: input, shape index: {}]   ;;  %s6201_s1 = inlined_call_operand.vmem [shape: bf16[128,4], index: 1, kind: input, shape index: {}]   ;;  %s6202_s2 = inlined_call_operand.vmem [shape: f32[1,4], index: 2, kind: input, shape index: {}]   ;;  %s6203_s3 = inlined_call_operand.vmem [shape: bf16[128,4], index: 3, kind: input, shape index: {}]   ;;  %s6204_s4 = inlined_call_operand.vmem [shape: f32[1,4], index: 4, kind: input, shape index: {}]   ;;  %s6205_s5 = inlined_call_operand.<no memory space> [shape: f32[1], index: 5, kind: input, shape index: {}]   ;;  %s6206_s6 = inlined_call_operand.vmem [shape: f32[2,16,16,4], index: 6, kind: output, shape index: {}]  }
   0x1   :  { %11 = sst [smem:[#allocation6]] %s6205_s5  ;;  %s4807_s25 = smov 0  }
   0x2   :  { %s4809_s26 = smov 0   ;;  %s4811_s27 = smov 0  }
   0x3 LB: > { %s26_s5 = sadd.s32 1, %s4746_s25  ;;  %s29_s28 = sadd.s32 1, %s4750_s26  ;;  %s4754_s27 = sphi %s4811_s27, %s17_s27   ;;  %s4750_s26 = sphi %s4809_s26, %s6213_s26   ;;  %s4746_s25 = sphi %s4807_s25, %s6212_s25   ;;  %s4742_s24 = sphi %s4805_s24, %s6211_s24   ;;  %s4738_s23 = sphi %s4803_s23, %s6210_s23  }
   0x4   : > { %p27_p0 = scmp.ge.s32.totalorder %s26_s5, 2  ;;  %p3818_p1 = scmp.ge.s32.totalorder %s4754_s27, 1 }
   0x5   : > { %p227_p2 = scmp.lt.s32.totalorder %s4754_s27, 5 }
   0x6   : > { %s6215_s5 = smov (%p27_p0, %s26_s5), 0  ;;  %s6217_s28 = smov (!%p27_p0, %s29_s28), %s4750_s26 }
   0x7   : > { %p228_p3 = pnand %p3818_p1, %p227_p2  ;;  %p31_p4 = scmp.ge.s32.totalorder %s6217_s28, 2 }
   0x8   : > { %p262_p5 = scmp.lt.s32.totalorder (!%p228_p3), %s4742_s24, 1  ;;  %s4836_s29 = sshll.u32 (!%p228_p3), %s4738_s23, 3 }
   0x9   : > { %s6219_s28 = smov (%p31_p4, %s6217_s28), 0  ;;  %231 = sbr.rel (%p228_p3) target bundleno = 1290 (0x50a), region = 44 }
   0xa   : > { %s3826_s30 = sadd.s32 (!%p228_p3), 4294967295, %s4836_s29  ;;  %s4757_s16 = smov (!%p228_p3), 8  }
   0xb   : > { %p281_p6 = scmp.gt.s32.totalorder (!%p228_p3), %s3826_s30, 0  ;;  %p3827_p7 = scmp.lt.s32.totalorder (!%p228_p3), %s3826_s30, 6 }
   0xc   : > { %s4758_s17 = smov (!%p228_p3), 4   ;;  %s4759_s18 = smov (!%p228_p3), 16  }
   0xd   : > { %s4760_s19 = smov (!%p228_p3), 12   ;;  %s4761_s22 = smov (!%p228_p3), 20  }
   0xe   : > { %s6221_s24 = smov (!%p262_p5, %s4742_s24), 1  ;;  %s6223_s30 = smov (!%p281_p6, %s3826_s30), 0  ;;  %vm286_vm0 = vcmask 1043744   ;;  %v4756_v0 = vmov 0   ;;  %vm330_vm1 = vcmask 31744   ;;  %vm382_vm2 = vcmask 24576  }
   0xf   : > { %s4203_s7 = sshll.u32 %s6221_s24, 8  ;;  %s6225_s30 = smov (!%p3827_p7, %s6223_s30), 6  ;;  %289 = vst.msk [vmem:[#allocation5 + $0x8] sm:$0xf] %vm286_vm0, %v4756_v0  ;;  %287 = vst.msk [vmem:[#allocation5] sm:$0xf] %vm286_vm0, %v4756_v0 }
  0x10   : > { %s4845_s10 = scalar_lea.vmem %s6200_s0, %s4203_s7  ;;  %288 = vst.msk [vmem:[#allocation5 + $0x4] sm:$0xf] %vm286_vm0, %v4756_v0  ;;  %290 = vst.msk [vmem:[#allocation5 + $0xc] sm:$0xf] %vm286_vm0, %v4756_v0  ;;  %s3832_s11 = sshll.u32 %s6225_s30, 4  ;;  %vm519_vm3 = vcmask 27648  }
  0x11   : > { %291 = vst.msk [vmem:[#allocation5 + $0x10] sm:$0xf] %vm286_vm0, %v4756_v0  ;;  %292 = vst.msk [vmem:[#allocation5 + $0x14] sm:$0xf] %vm286_vm0, %v4756_v0  ;;  %p351_p8 = scmp.gt.s32.totalorder %s6225_s30, 0  ;;  %s4872_s12 = scalar_lea.vmem %s4845_s10, %s3832_s11  ;;  %vm680_vm4 = vcmask 60448  }
  0x12   : > { %293 = vst.msk [vmem:[#allocation5 + $0x18] sm:$0xf] %vm286_vm0, %v4756_v0  ;;  %294 = vst.msk [vmem:[#allocation5 + $0x1c] sm:$0xf] %vm286_vm0, %v4756_v0  ;;  %s3833_s13 = sadd.s32 4294967295, %s6225_s30  ;;  %v309_v1 = vld [vmem:[%s4872_s12] sm:$0xff]  ;;  %s285_s20 = ssub.s32 %s4836_s29, %s6225_s30 }
  0x13   : > { %295 = vst.msk [vmem:[#allocation5 + $0x20] sm:$0xf] %vm286_vm0, %v4756_v0  ;;  %296 = vst.msk [vmem:[#allocation5 + $0x24] sm:$0xf] %vm286_vm0, %v4756_v0  ;;  %v310_v2 = vld [vmem:[%s4872_s12 + $0x8] sm:$0xff]  ;;  %v311_v3 = vld [vmem:[%s4872_s12 + $0x10] sm:$0xff] }
  0x14   : > { %297 = vst.msk [vmem:[#allocation5 + $0x28] sm:$0xf] %vm286_vm0, %v4756_v0  ;;  %298 = vst.msk [vmem:[#allocation5 + $0x2c] sm:$0xf] %vm286_vm0, %v4756_v0  ;;  %s6227_s13 = smov (!%p351_p8, %s3833_s13), 1  ;;  %v312_v4 = vld [vmem:[%s4872_s12 + $0x18] sm:$0xff] }
  0x15   : > { %299 = vst.msk [vmem:[#allocation5 + $0x30] sm:$0xf] %vm286_vm0, %v4756_v0  ;;  %300 = vst.msk [vmem:[#allocation5 + $0x34] sm:$0xf] %vm286_vm0, %v4756_v0  ;;  %v313_v5 = vld [vmem:[%s4872_s12 + $0x20] sm:$0xff]  ;;  %v314_v6 = vld [vmem:[%s4872_s12 + $0x28] sm:$0xff] }
  0x16   : > { %301 = vst.msk [vmem:[#allocation5 + $0x38] sm:$0xf] %vm286_vm0, %v4756_v0  ;;  %302 = vst.msk [vmem:[#allocation5 + $0x3c] sm:$0xf] %vm286_vm0, %v4756_v0  ;;  %s3834_s14 = sshll.u32 %s6227_s13, 4  ;;  %v315_v7 = vld [vmem:[%s4872_s12 + $0x30] sm:$0xff] }
  0x17   : > { %303 = vst.msk [vmem:[#allocation5 + $0x40] sm:$0xf] %vm286_vm0, %v4756_v0  ;;  %304 = vst.msk [vmem:[#allocation5 + $0x44] sm:$0xf] %vm286_vm0, %v4756_v0  ;;  %v316_v8 = vld [vmem:[%s4872_s12 + $0x38] sm:$0xff]  ;;  %v317_v9 = vld [vmem:[%s4872_s12 + $0x40] sm:$0xff]  ;;  %s358_s15 = scalar_lea.vmem %s4845_s10, %s3834_s14 }
  0x18   : > { %305 = vst.msk [vmem:[#allocation5 + $0x48] sm:$0xf] %vm286_vm0, %v4756_v0  ;;  %306 = vst.msk [vmem:[#allocation5 + $0x4c] sm:$0xf] %vm286_vm0, %v4756_v0  ;;  %v318_v10 = vld [vmem:[%s4872_s12 + $0x48] sm:$0xff]  ;;  %v359_v11 = vld [vmem:[%s358_s15] sm:$0xff] }
  0x19   : > { %331 = vst.msk [vmem:[#allocation2 + $0x19] sm:$0xff] %vm330_vm1, %v309_v1  ;;  %332 = vst.msk [vmem:[#allocation2 + $0x21] sm:$0xff] %vm330_vm1, %v310_v2  ;;  %v360_v12 = vld [vmem:[%s358_s15 + $0x8] sm:$0xff]  ;;  %v319_v54 = vld [vmem:[%s4872_s12 + $0x50] sm:$0xff]  ;;  %s4762_s15 = smov 24   ;;  %s4763_s9 = smov 28  }
  0x1a   : > { %333 = vst.msk [vmem:[#allocation2 + $0x31] sm:$0xff] %vm330_vm1, %v311_v3  ;;  %334 = vst.msk [vmem:[#allocation2 + $0x39] sm:$0xff] %vm330_vm1, %v312_v4  ;;  %v320_v55 = vld [vmem:[%s4872_s12 + $0x58] sm:$0xff]  ;;  %s6207_s21 = smov 32   ;;  %vm841_vm5 = vcmask 93248   ;;  %vm1002_vm6 = vcmask 126048  }
  0x1b   : > { %335 = vst.msk [vmem:[#allocation2 + $0x49] sm:$0xff] %vm330_vm1, %v313_v5  ;;  %336 = vst.msk [vmem:[#allocation2 + $0x51] sm:$0xff] %vm330_vm1, %v314_v6  ;;  %vm1163_vm7 = vcmask 158848   ;;  %vm1324_vm8 = vcmask 191648   ;;  %vm1486_vm9 = vcmask 224448   ;;  %vm1647_vm10 = vcmask 257248  }
  0x1c   : > { %337 = vst.msk [vmem:[#allocation2 + $0x61] sm:$0xff] %vm330_vm1, %v315_v7  ;;  %338 = vst.msk [vmem:[#allocation2 + $0x69] sm:$0xff] %vm330_vm1, %v316_v8  ;;  %v4682_v8 = vld [vmem:[%s6201_s1 + $0x38] sm:$0xff]   ;;  %vm1808_vm11 = vcmask 290048   ;;  %s2093_s11 = sld [smem:[#allocation6]]  ;;  %p2230_p10 = scmp.gt.s32.totalorder %s4836_s29, 0 }
  0x1d   : > { %339 = vst.msk [vmem:[#allocation2 + $0x79] sm:$0xff] %vm330_vm1, %v317_v9  ;;  %340 = vst.msk [vmem:[#allocation2 + $0x81] sm:$0xff] %vm330_vm1, %v318_v10  ;;  %v321_v9 = vld [vmem:[%s4872_s12 + $0x60] sm:$0xff]  ;;  %4565 = vmatprep.subr.bf16.mxu0 %v4682_v8  ;;  %s4035_s13 = sshll.u32 %s285_s20, 4  ;;  %p270_p12 = scmp.lt.s32.totalorder %s4836_s29, 15 }
  0x1e   : > { %361 = vst.msk [vmem:[#allocation2 + $0x1] sm:$0xff] %vm330_vm1, %v359_v11  ;;  %362 = vst.msk [vmem:[#allocation2 + $0x9] sm:$0xff] %vm330_vm1, %v360_v12  ;;  %4566 = vmatpush3.bf16.msra.mxu0 %v4682_v8  ;;  %s2196_s14 = scalar_lea.vmem [#allocation3], %s4035_s13 }
  0x1f   : > { %341 = vst.msk [vmem:[#allocation2 + $0x91] sm:$0xff] %vm330_vm1, %v319_v54  ;;  %342 = vst.msk [vmem:[#allocation2 + $0x99] sm:$0xff] %vm330_vm1, %v320_v55 }
  0x20   : > { %v703_v13 = vld [vmem:[#allocation2 + $0x1a] sm:$0xff]  ;;  %v396_v22 = vld [vmem:[#allocation2 + $0x27] sm:$0x1]  ;;  %343 = vst.msk [vmem:[#allocation2 + $0xa9] sm:$0xff] %vm330_vm1, %v321_v9 }
  0x21   : > { %v542_v14 = vld [vmem:[#allocation2 + $0x19] sm:$0xff]  ;;  %v543_v15 = vld [vmem:[#allocation2 + $0x21] sm:$0xff]  ;;  %v4898_v16 = vpack.c.bf16 %v703_v13, %v703_v13  ;;  %408 = vst.msk [vmem:[#allocation2 + $0x29] sm:$0x1] %vm382_vm2, %v396_v22  ;;  %v372_v25 = vld [vmem:[#allocation2 + $0x32] sm:$0x1] }
  0x22   : > { %v4228_v17 = vpack.c.bf16 %v542_v14, %v542_v14  ;;  %v863_v18 = vld [vmem:[#allocation2 + $0x20] sm:$0xff]  ;;  %v865_v19 = vld [vmem:[#allocation2 + $0x38] sm:$0xff]  ;;  %v4905_v24 = vpack.c.bf16 %v543_v15, %v543_v15  ;;  %385 = vst.msk [vmem:[#allocation2 + $0x30] sm:$0x1] %vm382_vm2, %v372_v25  ;;  %v1349_v29 = vld [vmem:[#allocation2 + $0x50] sm:$0xff] }
  0x23   : > { %v4267_v20 = vpack.c.bf16 %v863_v18, %v863_v18  ;;  %v4900_v21 = vpack.c.bf16 %v865_v19, %v865_v19  ;;  %v371_v23 = vld [vmem:[#allocation2 + $0x1a] sm:$0x1]  ;;  %785 = vrot.lane.b32.xlu0 %v4898_v16, %s4757_s16  ;;  %v397_v26 = vld [vmem:[#allocation2 + $0x3f] sm:$0x1]  ;;  %v1025_v27 = vld [vmem:[#allocation2 + $0x31] sm:$0xff]  ;;  %v4915_v31 = vpack.c.bf16 %v1349_v29, %v1349_v29 }
  0x24   : > { %624 = vrot.lane.b32.xlu1 %v4228_v17, %s4758_s17  ;;  %384 = vst.msk [vmem:[#allocation2 + $0x18] sm:$0x1] %vm382_vm2, %v371_v23  ;;  %409 = vst.msk [vmem:[#allocation2 + $0x41] sm:$0x1] %vm382_vm2, %v397_v26  ;;  %v373_v30 = vld [vmem:[#allocation2 + $0x4a] sm:$0x1]  ;;  %v4921_v33 = vpack.c.bf16 %v1025_v27, %v1025_v27 }
  0x25   : > { %523 = vst.msk [vmem:[#allocation5 + $0xc] sm:$0xf] %vm519_vm3, %v4267_v20  ;;  %525 = vst.msk [vmem:[#allocation5 + $0x14] sm:$0xf] %vm519_vm3, %v4900_v21  ;;  %v395_v28 = vld [vmem:[#allocation2 + $0xf] sm:$0x1] }
  0x26   : > { %407 = vst.msk [vmem:[#allocation2 + $0x11] sm:$0x1] %vm382_vm2, %v395_v28  ;;  %386 = vst.msk [vmem:[#allocation2 + $0x48] sm:$0x1] %vm382_vm2, %v373_v30  ;;  %v398_v32 = vld [vmem:[#allocation2 + $0x57] sm:$0x1] }
  0x27   : > { %1103 = vrot.lane.b32.xlu0 %v4228_v17, %s4759_s18  ;;  %410 = vst.msk [vmem:[#allocation2 + $0x59] sm:$0x1] %vm382_vm2, %v398_v32  ;;  %v869_v34 = vld [vmem:[#allocation2 + $0x68] sm:$0xff]  ;;  %v374_v35 = vld [vmem:[#allocation2 + $0x62] sm:$0x1]  ;;  %v1026_v59 = vld [vmem:[#allocation2 + $0x39] sm:$0xff] }
  0x28   : > { %626 = vrot.lane.b32.xlu1 %v4905_v24, %s4758_s17  ;;  %v540_v36 = vld [vmem:[#allocation2 + $0x1] sm:$0xff]  ;;  %v4924_v37 = vpack.c.bf16 %v869_v34, %v869_v34  ;;  %387 = vst.msk [vmem:[#allocation2 + $0x60] sm:$0x1] %vm382_vm2, %v374_v35  ;;  %v399_v38 = vld [vmem:[#allocation2 + $0x6f] sm:$0x1]  ;;  %v4968_v0 = vpack.c.bf16 %v1026_v59, %v1026_v59  ;;  %v1186_v12 = vld [vmem:[#allocation2 + $0x32] sm:$0xff] }
  0x29   : > { %527 = vst.msk [vmem:[#allocation5 + $0x1c] sm:$0xf] %vm519_vm3, %v4915_v31  ;;  %v1353_v39 = vld [vmem:[#allocation2 + $0x80] sm:$0xff]  ;;  %v375_v40 = vld [vmem:[#allocation2 + $0x7a] sm:$0x1]  ;;  %v4226_v43 = vpack.c.bf16 %v540_v36, %v540_v36  ;;  %v864_v45 = vld [vmem:[#allocation2 + $0x30] sm:$0xff]  ;;  %v4996_v15 = vpack.c.bf16 %v1186_v12, %v1186_v12 }
  0x2a   : > { %411 = vst.msk [vmem:[#allocation2 + $0x71] sm:$0x1] %vm382_vm2, %v399_v38  ;;  %v4930_v42 = vpack.c.bf16 %v1353_v39, %v1353_v39  ;;  %388 = vst.msk [vmem:[#allocation2 + $0x78] sm:$0x1] %vm382_vm2, %v375_v40  ;;  %v541_v46 = vld [vmem:[#allocation2 + $0x9] sm:$0xff]  ;;  %v4938_v47 = vpack.c.bf16 %v864_v45, %v864_v45  ;;  %v4690_v34 = vld [vmem:[%s6201_s1] sm:$0xff]  }
  0x2b   : > { %v862_v41 = vld [vmem:[#allocation2 + $0x18] sm:$0xff]  ;;  %529 = vst.msk [vmem:[#allocation5 + $0x24] sm:$0xf] %vm519_vm3, %v4924_v37  ;;  %1107 = vrot.lane.b32.xlu0 %v4921_v33, %s4759_s18  ;;  %v370_v48 = vld [vmem:[#allocation2 + $0x2] sm:$0x1]  ;;  %v420_v51 = vld [vmem:[#allocation2 + $0x8] sm:$0xff]  ;;  %v4227_v56 = vpack.c.bf16 %v541_v46, %v541_v46 }
  0x2c   : > { %944 = vrot.lane.b32.xlu1 %v4267_v20, %s4760_s19  ;;  %v4266_v44 = vpack.c.bf16 %v862_v41, %v862_v41  ;;  %v400_v49 = vld [vmem:[#allocation2 + $0x87] sm:$0x1]  ;;  %531 = vst.msk [vmem:[#allocation5 + $0x2c] sm:$0xf] %vm519_vm3, %v4930_v42  ;;  %v4207_v53 = vpack.c.bf16 %v420_v51, %v420_v51  ;;  %524 = vst.msk [vmem:[#allocation5 + $0x10] sm:$0xf] %vm519_vm3, %v4938_v47 }
  0x2d   : > { %v1348_v50 = vld [vmem:[#allocation2 + $0x48] sm:$0xff]  ;;  %383 = vst.msk [vmem:[#allocation2] sm:$0x1] %vm382_vm2, %v370_v48  ;;  %412 = vst.msk [vmem:[#allocation2 + $0x89] sm:$0x1] %vm382_vm2, %v400_v49  ;;  %v1187_v11 = vld [vmem:[#allocation2 + $0x3a] sm:$0xff] }
  0x2e   : > { %522 = vst.msk [vmem:[#allocation5 + $0x8] sm:$0xf] %vm519_vm3, %v4266_v44  ;;  %v4945_v52 = vpack.c.bf16 %v1348_v50, %v1348_v50  ;;  %v701_v58 = vld [vmem:[#allocation2 + $0x2] sm:$0xff]  ;;  %521 = vst.msk [vmem:[#allocation5 + $0x4] sm:$0xf] %vm519_vm3, %v4207_v53  ;;  %v702_v6 = vld [vmem:[#allocation2 + $0xa] sm:$0xff]  ;;  %v4994_v14 = vpack.c.bf16 %v1187_v11, %v1187_v11 }
  0x2f   : > { %620 = vrot.lane.b32.xlu0 %v4226_v43, %s4758_s17  ;;  %v868_v57 = vld [vmem:[#allocation2 + $0x60] sm:$0xff]  ;;  %v4246_v63 = vpack.c.bf16 %v701_v58, %v701_v58  ;;  %v376_v4 = vld [vmem:[#allocation2 + $0x92] sm:$0x1]  ;;  %v401_v7 = vld [vmem:[#allocation2 + $0x9f] sm:$0x1]  ;;  %v4247_v10 = vpack.c.bf16 %v702_v6, %v702_v6 }
  0x30   : > { %948 = vrot.lane.b32.xlu1 %v4900_v21, %s4760_s19  ;;  %v4956_v60 = vpack.c.bf16 %v868_v57, %v868_v57  ;;  %526 = vst.msk [vmem:[#allocation5 + $0x18] sm:$0xf] %vm519_vm3, %v4945_v52  ;;  %v704_v1 = vld [vmem:[#allocation2 + $0x22] sm:$0xff]  ;;  %v4683_v13 = vld [vmem:[%s6201_s1 + $0x30] sm:$0xff]   ;;  %v377_v19 = vld [vmem:[#allocation2 + $0xaa] sm:$0x1] }
  0x31   : > { %v1352_v61 = vld [vmem:[#allocation2 + $0x78] sm:$0xff]  ;;  %v4249_v5 = vpack.c.bf16 %v704_v1, %v704_v1  ;;  %389 = vst.msk [vmem:[#allocation2 + $0x90] sm:$0x1] %vm382_vm2, %v376_v4  ;;  %413 = vst.msk [vmem:[#allocation2 + $0xa1] sm:$0x1] %vm382_vm2, %v401_v7  ;;  %4567 = vmatprep.subr.bf16.mxu0 %v4683_v13  ;;  %v322_v17 = vld [vmem:[%s4872_s12 + $0x68] sm:$0xff] }
  0x32   : > { %v4961_v62 = vpack.c.bf16 %v1352_v61, %v1352_v61  ;;  %528 = vst.msk [vmem:[#allocation5 + $0x20] sm:$0xf] %vm519_vm3, %v4956_v60  ;;  %4568 = vmatpush3.bf16.msra.mxu0 %v4683_v13  ;;  %v4684_v18 = vld [vmem:[%s6201_s1 + $0x28] sm:$0xff]   ;;  %v4687_v27 = vld [vmem:[%s6201_s1 + $0x10] sm:$0xff]   ;;  %v325_v51 = vld [vmem:[%s4872_s12 + $0x80] sm:$0xff] }
  0x33   : > { %622 = vrot.lane.b32.xlu0 %v4227_v56, %s4758_s17  ;;  %344 = vst.msk [vmem:[#allocation2 + $0xb1] sm:$0xff] %vm330_vm1, %v322_v17  ;;  %4569 = vmatprep.subr.bf16.mxu0 %v4684_v18  ;;  %v1509_v26 = vld [vmem:[#allocation2 + $0x49] sm:$0xff]  ;;  %v1671_v35 = vld [vmem:[#allocation2 + $0x52] sm:$0xff]  ;;  %v1029_v48 = vld [vmem:[#allocation2 + $0x61] sm:$0xff] }
  0x34   : > { %1105 = vrot.lane.b32.xlu1 %v4905_v24, %s4759_s18  ;;  %v419_v2 = vld [vmem:[#allocation2] sm:$0xff]  ;;  %530 = vst.msk [vmem:[#allocation5 + $0x28] sm:$0xf] %vm519_vm3, %v4961_v62  ;;  %v4686_v24 = vld [vmem:[%s6201_s1 + $0x18] sm:$0xff]   ;;  %v4348_v29 = vpack.c.bf16 %v1509_v26, %v1509_v26  ;;  %v4688_v30 = vld [vmem:[%s6201_s1 + $0x8] sm:$0xff]   ;;  %v4369_v38 = vpack.c.bf16 %v1671_v35, %v1671_v35  ;;  %v4292_v49 = vpack.c.bf16 %v1029_v48, %v1029_v48 }
  0x35   : > { %v4206_v3 = vpack.c.bf16 %v419_v2, %v419_v2  ;;  %390 = vst.msk [vmem:[#allocation2 + $0xa8] sm:$0x1] %vm382_vm2, %v377_v19  ;;  %v1670_v36 = vld [vmem:[#allocation2 + $0x4a] sm:$0xff]  ;;  %v1190_v53 = vld [vmem:[#allocation2 + $0x62] sm:$0xff]  ;;  %v1513_v1 = vld [vmem:[#allocation2 + $0x79] sm:$0xff] }
  0x36   : > { %4570 = vmatpush3.bf16.msra.mxu0 %v4684_v18  ;;  %v4368_v39 = vpack.c.bf16 %v1670_v36, %v1670_v36  ;;  %v323_v40 = vld [vmem:[%s4872_s12 + $0x70] sm:$0xff]  ;;  %347 = vst.msk [vmem:[#allocation2 + $0xd9] sm:$0xff] %vm330_vm1, %v325_v51  ;;  %v4312_v55 = vpack.c.bf16 %v1190_v53, %v1190_v53  ;;  %v326_v56 = vld [vmem:[%s4872_s12 + $0x88] sm:$0xff]  ;;  %v1674_v8 = vld [vmem:[#allocation2 + $0x7a] sm:$0xff] }
  0x37   : > { %781 = vrot.lane.b32.xlu0 %v4246_v63, %s4757_s16  ;;  %520 = vst.msk [vmem:[#allocation5] sm:$0xf] %vm519_vm3, %v4206_v3  ;;  %v1675_v7 = vld [vmem:[#allocation2 + $0x82] sm:$0xff]  ;;  %v5135_v12 = vpack.c.bf16 %v1674_v8, %v1674_v8  ;;  %v327_v18 = vld [vmem:[%s4872_s12 + $0x90] sm:$0xff]  ;;  %v873_v26 = vld [vmem:[#allocation2 + $0x98] sm:$0xff] }
  0x38   : > { %1109 = vrot.lane.b32.xlu1 %v4968_v0, %s4759_s18  ;;  %345 = vst.msk [vmem:[#allocation2 + $0xc1] sm:$0xff] %vm330_vm1, %v323_v40  ;;  %348 = vst.msk [vmem:[#allocation2 + $0xe1] sm:$0xff] %vm330_vm1, %v326_v56  ;;  %v5133_v11 = vpack.c.bf16 %v1675_v7, %v1675_v7  ;;  %v1194_v48 = vld [vmem:[#allocation2 + $0x92] sm:$0xff] }
  0x39   : > { %349 = vst.msk [vmem:[#allocation2 + $0xf1] sm:$0xff] %vm330_vm1, %v327_v18  ;;  %v5205_v51 = vpack.c.bf16 %v1194_v48, %v1194_v48 }
  0x3a   : > { %v1357_v20 = vld [vmem:[#allocation2 + $0xb0] sm:$0xff] }
  0x3b   : > { %942 = vrot.lane.b32.xlu0 %v4266_v44, %s4760_s19  ;;  %v5015_v22 = vpack.c.bf16 %v1357_v20, %v1357_v20  ;;  %v402_v32 = vld [vmem:[#allocation2 + $0xb7] sm:$0x1] }
  0x3c   : > { %787 = vrot.lane.b32.xlu1 %v4249_v5, %s4757_s16  ;;  %v1356_v23 = vld [vmem:[#allocation2 + $0xa8] sm:$0xff]  ;;  %414 = vst.msk [vmem:[#allocation2 + $0xb9] sm:$0x1] %vm382_vm2, %v402_v32 }
  0x3d   : > { %v5020_v25 = vpack.c.bf16 %v1356_v23, %v1356_v23  ;;  %535 = vst.msk [vmem:[#allocation5 + $0x3c] sm:$0xf] %vm519_vm3, %v5015_v22  ;;  %v379_v57 = vld [vmem:[#allocation2 + $0xda] sm:$0x1] }
  0x3e   : > { %392 = vst.msk [vmem:[#allocation2 + $0xd8] sm:$0x1] %vm382_vm2, %v379_v57 }
  0x3f   : > { %946 = vrot.lane.b32.xlu0 %v4938_v47, %s4760_s19  ;;  %534 = vst.msk [vmem:[#allocation5 + $0x38] sm:$0xf] %vm519_vm3, %v5020_v25  ;;  %v378_v41 = vld [vmem:[#allocation2 + $0xc2] sm:$0x1]  ;;  %v404_v6 = vld [vmem:[#allocation2 + $0xe7] sm:$0x1] }
  0x40   : > { %1266 = vrot.lane.b32.xlu1 %v4249_v5, %s4761_s22  ;;  %391 = vst.msk [vmem:[#allocation2 + $0xc0] sm:$0x1] %vm382_vm2, %v378_v41  ;;  %v1361_v58 = vld [vmem:[#allocation2 + $0xe0] sm:$0xff]  ;;  %416 = vst.msk [vmem:[#allocation2 + $0xe9] sm:$0x1] %vm382_vm2, %v404_v6 }
  0x41   : > { %v5103_v59 = vpack.c.bf16 %v1361_v58, %v1361_v58 }
  0x43   : > { %1264 = vrot.lane.b32.xlu0 %v4898_v16, %s4761_s22  ;;  %v4685_v16 = vld [vmem:[%s6201_s1 + $0x20] sm:$0xff]   ;;  %539 = vst.msk [vmem:[#allocation5 + $0x4c] sm:$0xf] %vm519_vm3, %v5103_v59 }
  0x44   : > { %783 = vrot.lane.b32.xlu1 %v4247_v10, %s4757_s16  ;;  %4571 = vmatprep.subr.bf16.mxu0 %v4685_v16 }
  0x45   : > { %4572 = vmatpush3.bf16.msra.mxu0 %v4685_v16  ;;  %v1360_v61 = vld [vmem:[#allocation2 + $0xd8] sm:$0xff] }
  0x46   : > { %4573 = vmatprep.subr.bf16.mxu0 %v4686_v24  ;;  %v5109_v63 = vpack.c.bf16 %v1360_v61, %v1360_v61 }
  0x47   : > { %1268 = vrot.lane.b32.xlu0 %v4996_v15, %s4761_s22  ;;  %v876_v44 = vld [vmem:[#allocation2 + $0xc0] sm:$0xff] }
  0x48   : > { %1270 = vrot.lane.b32.xlu1 %v4994_v14, %s4761_s22  ;;  %v5075_v46 = vpack.c.bf16 %v876_v44, %v876_v44  ;;  %538 = vst.msk [vmem:[#allocation5 + $0x48] sm:$0xf] %vm519_vm3, %v5109_v63 }
  0x49   : > { %4574 = vmatpush3.bf16.msra.mxu0 %v4686_v24  ;;  %v328_v24 = vld [vmem:[%s4872_s12 + $0x98] sm:$0xff] }
  0x4a   : > { %4575 = vmatprep.subr.bf16.mxu0 %v4687_v27  ;;  %536 = vst.msk [vmem:[#allocation5 + $0x40] sm:$0xf] %vm519_vm3, %v5075_v46 }
  0x4b   : > { %1426 = vrot.lane.b32.xlu0 %v4938_v47, %s4762_s15  ;;  %v1030_v47 = vld [vmem:[#allocation2 + $0x69] sm:$0xff]  ;;  %350 = vst.msk [vmem:[#allocation2 + $0xf9] sm:$0xff] %vm330_vm1, %v328_v24 }
  0x4c   : > { %1428 = vrot.lane.b32.xlu1 %v4900_v21, %s4762_s15  ;;  %v1510_v21 = vld [vmem:[#allocation2 + $0x51] sm:$0xff] }
  0x4d   : > { %v4349_v28 = vpack.c.bf16 %v1510_v21, %v1510_v21  ;;  %4576 = vmatpush3.bf16.msra.mxu0 %v4687_v27  ;;  %v380_v21 = vld [vmem:[#allocation2 + $0xf2] sm:$0x1] }
  0x4e   : > { %4577 = vmatprep.subr.bf16.mxu0 %v4688_v30  ;;  %393 = vst.msk [vmem:[#allocation2 + $0xf0] sm:$0x1] %vm382_vm2, %v380_v21  ;;  %v872_v27 = vld [vmem:[#allocation2 + $0x90] sm:$0xff] }
  0x4f   : > { %1430 = vrot.lane.b32.xlu0 %v4945_v52, %s4762_s15  ;;  %v4276_v32 = vpack.c.bf16 %v872_v27, %v872_v27 }
  0x50   : > { %1432 = vrot.lane.b32.xlu1 %v4915_v31, %s4762_s15 }
  0x51   : > { %4578 = vmatpush3.bf16.msra.mxu0 %v4688_v30  ;;  %v4277_v30 = vpack.c.bf16 %v873_v26, %v873_v26 }
  0x52   : > { %4579 = vmatprep.subr.bf16.mxu0 %v4690_v34 }
  0x53   : > { %1587 = vrot.lane.b32.xlu0 %v4921_v33, %s4763_s9 }
  0x54   : > { %1589 = vrot.lane.b32.xlu1 %v4968_v0, %s4763_s9 }
  0x55   : > { %4580 = vmatpush3.bf16.msra.mxu0 %v4690_v34 }
  0x57   : > { %1591 = vrot.lane.b32.xlu0 %v4348_v29, %s4763_s9 }
  0x58   : > { %1593 = vrot.lane.b32.xlu1 %v4349_v28, %s4763_s9 }
  0x5b   : > { %1748 = vrot.lane.b32.xlu0 %v4996_v15, %s6207_s21 }
  0x5c   : > { %1750 = vrot.lane.b32.xlu1 %v4994_v14, %s6207_s21 }
  0x5f   : > { %628 = vrot.lane.b32.xlu0 %v4921_v33, %s4758_s17  ;;  %v324_v33 = vld [vmem:[%s4872_s12 + $0x78] sm:$0xff]  ;;  %s354_s12 = sadd.s32 10, %s6225_s30 }
  0x60   : > { %630 = vrot.lane.b32.xlu1 %v4968_v0, %s4758_s17  ;;  %346 = vst.msk [vmem:[#allocation2 + $0xc9] sm:$0xff] %vm330_vm1, %v324_v33  ;;  %v1514_v0 = vld [vmem:[#allocation2 + $0x81] sm:$0xff]  ;;  %p355_p9 = scmp.lt.s32.totalorder %s354_s12, 16 }
  0x62   : > { %s6229_s12 = smov (!%p355_p9, %s354_s12), 14 }
  0x63   : > { %1752 = vrot.lane.b32.xlu0 %v4368_v39, %s6207_s21  ;;  %s3835_s7 = sshll.u32 %s6229_s12, 4  ;;  %s2233_s12 = sadd.s32 8, %s4836_s29 }
  0x64   : > { %1754 = vrot.lane.b32.xlu1 %v4369_v38, %s6207_s21  ;;  %s364_s8 = scalar_lea.vmem %s4845_s10, %s3835_s7  ;;  %s4036_s7 = sadd.s32 4294967295, %s285_s20 }
  0x65   : > { %v365_v44 = vld [vmem:[%s364_s8] sm:$0xff]  ;;  %p2234_p11 = scmp.lt.s32.totalorder %s2233_s12, 16  ;;  %s6231_s7 = smov (!%p2230_p10, %s4036_s7), 1 }
  0x66   : > { %368 = vst.msk [vmem:[#allocation2 + $0x109] sm:$0xff] %vm330_vm1, %v365_v44  ;;  %s4037_s30 = sshll.u32 %s6231_s7, 4  ;;  %s6235_s29 = smov (!%p270_p12, %s4836_s29), 15 }
  0x67   : > { %632 = vrot.lane.b32.xlu0 %v4348_v29, %s4758_s17  ;;  %v877_v43 = vld [vmem:[#allocation2 + $0xc8] sm:$0xff] }
  0x68   : > { %634 = vrot.lane.b32.xlu1 %v4349_v28, %s4758_s17  ;;  %v5073_v45 = vpack.c.bf16 %v877_v43, %v877_v43  ;;  %v403_v50 = vld [vmem:[#allocation2 + $0xcf] sm:$0x1]  ;;  %v405_v43 = vld [vmem:[#allocation2 + $0xff] sm:$0x1] }
  0x69   : > { %415 = vst.msk [vmem:[#allocation2 + $0xd1] sm:$0x1] %vm382_vm2, %v403_v50  ;;  %417 = vst.msk [vmem:[#allocation2 + $0x101] sm:$0x1] %vm382_vm2, %v405_v43  ;;  %v1198_v43 = vld [vmem:[#allocation2 + $0xc2] sm:$0xff] }
  0x6a   : > { %537 = vst.msk [vmem:[#allocation5 + $0x44] sm:$0xf] %vm519_vm3, %v5073_v45 }
  0x6b   : > { %789 = vrot.lane.b32.xlu0 %v4996_v15, %s4757_s16 }
  0x6c   : > { %791 = vrot.lane.b32.xlu1 %v4994_v14, %s4757_s16 }
  0x6f   : > { %793 = vrot.lane.b32.xlu0 %v4368_v39, %s4757_s16 }
  0x70   : > { %795 = vrot.lane.b32.xlu1 %v4369_v38, %s4757_s16 }
  0x73   : > { %950 = vrot.lane.b32.xlu0 %v4945_v52, %s4760_s19  ;;  %v1191_v52 = vld [vmem:[#allocation2 + $0x6a] sm:$0xff] }
  0x74   : > { %952 = vrot.lane.b32.xlu1 %v4915_v31, %s4760_s19  ;;  %v4293_v31 = vpack.c.bf16 %v1030_v47, %v1030_v47  ;;  %v4313_v54 = vpack.c.bf16 %v1191_v52, %v1191_v52  ;;  %v1195_v47 = vld [vmem:[#allocation2 + $0x9a] sm:$0xff] }
  0x75   : > { %v5203_v50 = vpack.c.bf16 %v1195_v47, %v1195_v47 }
  0x77   : > { %954 = vrot.lane.b32.xlu0 %v4956_v60, %s4760_s19 }
  0x78   : > { %956 = vrot.lane.b32.xlu1 %v4924_v37, %s4760_s19 }
  0x7b   : > { %1111 = vrot.lane.b32.xlu0 %v4348_v29, %s4759_s18 }
  0x7c   : > { %1113 = vrot.lane.b32.xlu1 %v4349_v28, %s4759_s18 }
  0x7f   : > { %1115 = vrot.lane.b32.xlu0 %v4292_v49, %s4759_s18 }
  0x80   : > { %1117 = vrot.lane.b32.xlu1 %v4293_v31, %s4759_s18 }
  0x83   : > { %1272 = vrot.lane.b32.xlu0 %v4368_v39, %s4761_s22 }
  0x84   : > { %1274 = vrot.lane.b32.xlu1 %v4369_v38, %s4761_s22 }
  0x87   : > { %1276 = vrot.lane.b32.xlu0 %v4312_v55, %s4761_s22 }
  0x88   : > { %1278 = vrot.lane.b32.xlu1 %v4313_v54, %s4761_s22 }
  0x8b   : > { %1434 = vrot.lane.b32.xlu0 %v4956_v60, %s4762_s15  ;;  %v5119_v60 = vpack.c.bf16 %v1513_v1, %v1513_v1  ;;  %v431_v1 = vld [vmem:[#allocation2 + $0x90] sm:$0xff] }
  0x8c   : > { %1436 = vrot.lane.b32.xlu1 %v4924_v37, %s4762_s15  ;;  %v5117_v37 = vpack.c.bf16 %v1514_v0, %v1514_v0  ;;  %v432_v0 = vld [vmem:[#allocation2 + $0x98] sm:$0xff] }
  0x8f   : > { %1438 = vrot.lane.b32.xlu0 %v4961_v62, %s4762_s15 }
  0x90   : > { %1440 = vrot.lane.b32.xlu1 %v4930_v42, %s4762_s15 }
  0x93   : > { %1595 = vrot.lane.b32.xlu0 %v4292_v49, %s4763_s9 }
  0x94   : > { %1597 = vrot.lane.b32.xlu1 %v4293_v31, %s4763_s9 }
  0x95   : > { %v786_v2 = vpop.permute.xlu0 %785 }
  0x96   : > { %v625_v3 = vpop.permute.xlu1 %624 }
  0x97   : > { %683 = vst.msk [vmem:[#allocation5 + $0x8] sm:$0xf] %vm680_vm4, %v625_v3  ;;  %1599 = vrot.lane.b32.xlu0 %v5119_v60, %s4763_s9  ;;  %v4218_v3 = vpack.c.bf16 %v431_v1, %v431_v1 }
  0x98   : > { %1601 = vrot.lane.b32.xlu1 %v5117_v37, %s4763_s9  ;;  %844 = vst.msk [vmem:[#allocation5 + $0x8] sm:$0xf] %vm841_vm5, %v786_v2  ;;  %v4219_v2 = vpack.c.bf16 %v432_v0, %v432_v0 }
  0x99   : > { %v1104_v4 = vpop.permute.xlu0 %1103  ;;  %532 = vst.msk [vmem:[#allocation5 + $0x30] sm:$0xf] %vm519_vm3, %v4218_v3  ;;  %v1682_v3 = vld [vmem:[#allocation2 + $0xda] sm:$0xff] }
  0x9a   : > { %v627_v5 = vpop.permute.xlu1 %626  ;;  %533 = vst.msk [vmem:[#allocation5 + $0x34] sm:$0xf] %vm519_vm3, %v4219_v2  ;;  %v1683_v2 = vld [vmem:[#allocation2 + $0xe2] sm:$0xff] }
  0x9b   : > { %684 = vst.msk [vmem:[#allocation5 + $0xc] sm:$0xf] %vm680_vm4, %v627_v5  ;;  %1756 = vrot.lane.b32.xlu0 %v4312_v55, %s6207_s21 }
  0x9c   : > { %1758 = vrot.lane.b32.xlu1 %v4313_v54, %s6207_s21 }
  0x9d   : > { %v1108_v9 = vpop.permute.xlu0 %1107 }
  0x9e   : > { %v945_v10 = vpop.permute.xlu1 %944 }
  0x9f   : > { %636 = vrot.lane.b32.xlu0 %v4292_v49, %s4758_s17 }
  0xa0   : > { %638 = vrot.lane.b32.xlu1 %v4293_v31, %s4758_s17 }
  0xa1   : > { %v621_v13 = vpop.permute.xlu0 %620 }
  0xa2   : > { %v949_v14 = vpop.permute.xlu1 %948  ;;  %681 = vst.msk [vmem:[#allocation5] sm:$0xf] %vm680_vm4, %v621_v13 }
  0xa3   : > { %1760 = vrot.lane.b32.xlu0 %v5135_v12, %s6207_s21 }
  0xa4   : > { %1762 = vrot.lane.b32.xlu1 %v5133_v11, %s6207_s21 }
  0xa5   : > { %v623_v15 = vpop.permute.xlu0 %622 }
  0xa6   : > { %v1106_v17 = vpop.permute.xlu1 %1105  ;;  %682 = vst.msk [vmem:[#allocation5 + $0x4] sm:$0xf] %vm680_vm4, %v623_v15  ;;  %v1678_v15 = vld [vmem:[#allocation2 + $0xaa] sm:$0xff] }
  0xa7   : > { %640 = vrot.lane.b32.xlu0 %v5119_v60, %s4758_s17 }
  0xa8   : > { %642 = vrot.lane.b32.xlu1 %v5117_v37, %s4758_s17 }
  0xa9   : > { %v782_v19 = vpop.permute.xlu0 %781 }
  0xaa   : > { %v1110_v16 = vpop.permute.xlu1 %1109  ;;  %842 = vst.msk [vmem:[#allocation5] sm:$0xf] %vm841_vm5, %v782_v19 }
  0xab   : > { %797 = vrot.lane.b32.xlu0 %v4312_v55, %s4757_s16  ;;  %v381_v55 = vld [vmem:[#allocation2 + $0x10a] sm:$0x1] }
  0xac   : > { %799 = vrot.lane.b32.xlu1 %v4313_v54, %s4757_s16  ;;  %v366_v54 = vld [vmem:[%s364_s8 + $0x8] sm:$0xff]  ;;  %394 = vst.msk [vmem:[#allocation2 + $0x108] sm:$0x1] %vm382_vm2, %v381_v55  ;;  %s2235_s8 = sadd.s32 8, %s285_s20 }
  0xad   : > { %v943_v23 = vpop.permute.xlu0 %942  ;;  %369 = vst.msk [vmem:[#allocation2 + $0x111] sm:$0xff] %vm330_vm1, %v366_v54  ;;  %v1522_v55 = vld [vmem:[#allocation2 + $0xe1] sm:$0xff] }
  0xae   : > { %v788_v20 = vpop.permute.xlu1 %787  ;;  %1003 = vst.msk [vmem:[#allocation5] sm:$0xf] %vm1002_vm6, %v943_v23 }
  0xaf   : > { %845 = vst.msk [vmem:[#allocation5 + $0xc] sm:$0xf] %vm841_vm5, %v788_v20  ;;  %801 = vrot.lane.b32.xlu0 %v5135_v12, %s4757_s16  ;;  %v4376_v20 = vpack.c.bf16 %v1678_v15, %v1678_v15 }
  0xb0   : > { %1006 = vst.msk [vmem:[#allocation5 + $0xc] sm:$0xf] %vm1002_vm6, %v949_v14  ;;  %803 = vrot.lane.b32.xlu1 %v5133_v11, %s4757_s16  ;;  %v1679_v14 = vld [vmem:[#allocation2 + $0xb2] sm:$0xff] }
  0xb1   : > { %1164 = vst.msk [vmem:[#allocation5] sm:$0xf] %vm1163_vm7, %v1104_v4  ;;  %1167 = vst.msk [vmem:[#allocation5 + $0xc] sm:$0xf] %vm1163_vm7, %v1110_v16  ;;  %v947_v29 = vpop.permute.xlu0 %946  ;;  %v4377_v16 = vpack.c.bf16 %v1679_v14, %v1679_v14 }
  0xb2   : > { %v1267_v28 = vpop.permute.xlu1 %1266  ;;  %1005 = vst.msk [vmem:[#allocation5 + $0x8] sm:$0xf] %vm1002_vm6, %v947_v29 }
  0xb3   : > { %958 = vrot.lane.b32.xlu0 %v4961_v62, %s4760_s19  ;;  %1166 = vst.msk [vmem:[#allocation5 + $0x8] sm:$0xf] %vm1163_vm7, %v1108_v9  ;;  %v1033_v62 = vld [vmem:[#allocation2 + $0x91] sm:$0xff] }
  0xb4   : > { %960 = vrot.lane.b32.xlu1 %v4930_v42, %s4760_s19  ;;  %v1034_v42 = vld [vmem:[#allocation2 + $0x99] sm:$0xff]  ;;  %v5186_v40 = vpack.c.bf16 %v1033_v62, %v1033_v62  ;;  %v1038_v62 = vld [vmem:[#allocation2 + $0xc9] sm:$0xff] }
  0xb5   : > { %v1265_v35 = vpop.permute.xlu0 %1264  ;;  %v5184_v39 = vpack.c.bf16 %v1034_v42, %v1034_v42 }
  0xb6   : > { %v784_v34 = vpop.permute.xlu1 %783  ;;  %1325 = vst.msk [vmem:[#allocation5] sm:$0xf] %vm1324_vm8, %v1265_v35 }
  0xb7   : > { %843 = vst.msk [vmem:[#allocation5 + $0x4] sm:$0xf] %vm841_vm5, %v784_v34  ;;  %962 = vrot.lane.b32.xlu0 %v4276_v32, %s4760_s19 }
  0xb8   : > { %1004 = vst.msk [vmem:[#allocation5 + $0x4] sm:$0xf] %vm1002_vm6, %v945_v10  ;;  %964 = vrot.lane.b32.xlu1 %v4277_v30, %s4760_s19 }
  0xb9   : > { %1165 = vst.msk [vmem:[#allocation5 + $0x4] sm:$0xf] %vm1163_vm7, %v1106_v17  ;;  %v1269_v38 = vpop.permute.xlu0 %1268 }
  0xba   : > { %1326 = vst.msk [vmem:[#allocation5 + $0x4] sm:$0xf] %vm1324_vm8, %v1267_v28  ;;  %v1271_v36 = vpop.permute.xlu1 %1270  ;;  %1327 = vst.msk [vmem:[#allocation5 + $0x8] sm:$0xf] %vm1324_vm8, %v1269_v38 }
  0xbb   : > { %1328 = vst.msk [vmem:[#allocation5 + $0xc] sm:$0xf] %vm1324_vm8, %v1271_v36  ;;  %1119 = vrot.lane.b32.xlu0 %v5119_v60, %s4759_s18  ;;  %v1517_v60 = vld [vmem:[#allocation2 + $0xa9] sm:$0xff]  ;;  %v1037_v36 = vld [vmem:[#allocation2 + $0xc1] sm:$0xff] }
  0xbc   : > { %1121 = vrot.lane.b32.xlu1 %v5117_v37, %s4759_s18  ;;  %v1518_v37 = vld [vmem:[#allocation2 + $0xb1] sm:$0xff]  ;;  %v5235_v7 = vpack.c.bf16 %v1517_v60, %v1517_v60 }
  0xbd   : > { %v1427_v41 = vpop.permute.xlu0 %1426  ;;  %v5233_v6 = vpack.c.bf16 %v1518_v37, %v1518_v37 }
  0xbe   : > { %v1429_v33 = vpop.permute.xlu1 %1428  ;;  %1487 = vst.msk [vmem:[#allocation5] sm:$0xf] %vm1486_vm9, %v1427_v41  ;;  %v1199_v41 = vld [vmem:[#allocation2 + $0xca] sm:$0xff] }
  0xbf   : > { %1488 = vst.msk [vmem:[#allocation5 + $0x4] sm:$0xf] %vm1486_vm9, %v1429_v33  ;;  %1123 = vrot.lane.b32.xlu0 %v5186_v40, %s4759_s18  ;;  %v5308_v48 = vpack.c.bf16 %v1199_v41, %v1199_v41 }
  0xc0   : > { %1125 = vrot.lane.b32.xlu1 %v5184_v39, %s4759_s18 }
  0xc1   : > { %v1431_v49 = vpop.permute.xlu0 %1430 }
  0xc2   : > { %v1433_v31 = vpop.permute.xlu1 %1432  ;;  %1489 = vst.msk [vmem:[#allocation5 + $0x8] sm:$0xf] %vm1486_vm9, %v1431_v49 }
  0xc3   : > { %1490 = vst.msk [vmem:[#allocation5 + $0xc] sm:$0xf] %vm1486_vm9, %v1433_v31  ;;  %1280 = vrot.lane.b32.xlu0 %v5135_v12, %s4761_s22  ;;  %v5310_v31 = vpack.c.bf16 %v1198_v43, %v1198_v43 }
  0xc4   : > { %1282 = vrot.lane.b32.xlu1 %v5133_v11, %s4761_s22  ;;  %v406_v11 = vld [vmem:[#allocation2 + $0x117] sm:$0x1] }
  0xc5   : > { %v1588_v53 = vpop.permute.xlu0 %1587  ;;  %418 = vst.msk [vmem:[#allocation2 + $0x119] sm:$0x1] %vm382_vm2, %v406_v11 }
  0xc6   : > { %v1590_v52 = vpop.permute.xlu1 %1589  ;;  %1648 = vst.msk [vmem:[#allocation5] sm:$0xf] %vm1647_vm10, %v1588_v53 }
  0xc7   : > { %1649 = vst.msk [vmem:[#allocation5 + $0x4] sm:$0xf] %vm1647_vm10, %v1590_v52  ;;  %1284 = vrot.lane.b32.xlu0 %v5205_v51, %s4761_s22 }
  0xc8   : > { %1286 = vrot.lane.b32.xlu1 %v5203_v50, %s4761_s22 }
  0xc9   : > { %v1592_v57 = vpop.permute.xlu0 %1591 }
  0xca   : > { %v1594_v56 = vpop.permute.xlu1 %1593  ;;  %1650 = vst.msk [vmem:[#allocation5 + $0x8] sm:$0xf] %vm1647_vm10, %v1592_v57 }
  0xcb   : > { %1651 = vst.msk [vmem:[#allocation5 + $0xc] sm:$0xf] %vm1647_vm10, %v1594_v56  ;;  %1442 = vrot.lane.b32.xlu0 %v4276_v32, %s4762_s15  ;;  %v1521_v56 = vld [vmem:[#allocation2 + $0xd9] sm:$0xff] }
  0xcc   : > { %1444 = vrot.lane.b32.xlu1 %v4277_v30, %s4762_s15 }
  0xcd   : > { %v1749_v61 = vpop.permute.xlu0 %1748 }
  0xce   : > { %v1751_v58 = vpop.permute.xlu1 %1750  ;;  %1809 = vst.msk [vmem:[#allocation5] sm:$0xf] %vm1808_vm11, %v1749_v61 }
  0xcf   : > { %1810 = vst.msk [vmem:[#allocation5 + $0x4] sm:$0xf] %vm1808_vm11, %v1751_v58  ;;  %1446 = vrot.lane.b32.xlu0 %v5020_v25, %s4762_s15 }
  0xd0   : > { %1448 = vrot.lane.b32.xlu1 %v5015_v22, %s4762_s15 }
  0xd1   : > { %v629_v5 = vpop.permute.xlu0 %628 }
  0xd2   : > { %v631_v4 = vpop.permute.xlu1 %630  ;;  %685 = vst.msk [vmem:[#allocation5 + $0x10] sm:$0xf] %vm680_vm4, %v629_v5 }
  0xd3   : > { %686 = vst.msk [vmem:[#allocation5 + $0x14] sm:$0xf] %vm680_vm4, %v631_v4  ;;  %1603 = vrot.lane.b32.xlu0 %v5186_v40, %s4763_s9 }
  0xd4   : > { %1605 = vrot.lane.b32.xlu1 %v5184_v39, %s4763_s9 }
  0xd5   : > { %v1753_v9 = vpop.permute.xlu0 %1752 }
  0xd6   : > { %v1755_v8 = vpop.permute.xlu1 %1754  ;;  %v4689_v10 = vld [vmem:[#allocation5] sm:$0xff]   ;;  %1811 = vst.msk [vmem:[#allocation5 + $0x8] sm:$0xf] %vm1808_vm11, %v1753_v9 }
  0xd7   : > { %1812 = vst.msk [vmem:[#allocation5 + $0xc] sm:$0xf] %vm1808_vm11, %v1755_v8  ;;  %1607 = vrot.lane.b32.xlu0 %v5235_v7, %s4763_s9  ;;  %4581 = vmatprep.mubr.bf16.mxu0 %v4689_v10  ;;  %v5360_v8 = vpack.c.bf16 %v1682_v3, %v1682_v3 }
  0xd8   : > { %1609 = vrot.lane.b32.xlu1 %v5233_v6, %s4763_s9 }
  0xd9   : > { %v633_v13 = vpop.permute.xlu0 %632 }
  0xda   : > { %v635_v12 = vpop.permute.xlu1 %634  ;;  %687 = vst.msk [vmem:[#allocation5 + $0x18] sm:$0xf] %vm680_vm4, %v633_v13 }
  0xdb   : > { %688 = vst.msk [vmem:[#allocation5 + $0x1c] sm:$0xf] %vm680_vm4, %v635_v12  ;;  %1764 = vrot.lane.b32.xlu0 %v5205_v51, %s6207_s21 }
  0xdc   : > { %1766 = vrot.lane.b32.xlu1 %v5203_v50, %s6207_s21 }
  0xdd   : > { %v790_v18 = vpop.permute.xlu0 %789 }
  0xde   : > { %v792_v17 = vpop.permute.xlu1 %791  ;;  %v4691_v19 = vld [vmem:[#allocation5 + $0x8] sm:$0xff]   ;;  %846 = vst.msk [vmem:[#allocation5 + $0x10] sm:$0xf] %vm841_vm5, %v790_v18 }
  0xdf   : > { %847 = vst.msk [vmem:[#allocation5 + $0x14] sm:$0xf] %vm841_vm5, %v792_v17  ;;  %644 = vrot.lane.b32.xlu0 %v5186_v40, %s4758_s17  ;;  %4582 = vmatmul.mubr.bf16.vlgmr.msra.gmra.mxu0 %v4691_v19  ;;  %v881_v18 = vld [vmem:[#allocation2 + $0xf8] sm:$0xff]  ;;  %v880_v19 = vld [vmem:[#allocation2 + $0xf0] sm:$0xff] }
  0xe0   : > { %646 = vrot.lane.b32.xlu1 %v5184_v39, %s4758_s17 }
  0xe1   : > { %v794_v24 = vpop.permute.xlu0 %793 }
  0xe2   : > { %v796_v23 = vpop.permute.xlu1 %795  ;;  %848 = vst.msk [vmem:[#allocation5 + $0x18] sm:$0xf] %vm841_vm5, %v794_v24  ;;  %v4284_v24 = vpack.c.bf16 %v880_v19, %v880_v19 }
  0xe3   : > { %849 = vst.msk [vmem:[#allocation5 + $0x1c] sm:$0xf] %vm841_vm5, %v796_v23  ;;  %1768 = vrot.lane.b32.xlu0 %v4376_v20, %s6207_s21  ;;  %v4285_v23 = vpack.c.bf16 %v881_v18, %v881_v18 }
  0xe4   : > { %1770 = vrot.lane.b32.xlu1 %v4377_v16, %s6207_s21 }
  0xe5   : > { %v951_v26 = vpop.permute.xlu0 %950 }
  0xe6   : > { %v953_v21 = vpop.permute.xlu1 %952  ;;  %1007 = vst.msk [vmem:[#allocation5 + $0x10] sm:$0xf] %vm1002_vm6, %v951_v26 }
  0xe7   : > { %1008 = vst.msk [vmem:[#allocation5 + $0x14] sm:$0xf] %vm1002_vm6, %v953_v21  ;;  %648 = vrot.lane.b32.xlu0 %v5235_v7, %s4758_s17 }
  0xe8   : > { %650 = vrot.lane.b32.xlu1 %v5233_v6, %s4758_s17 }
  0xe9   : > { %v955_v28 = vpop.permute.xlu0 %954 }
  0xea   : > { %v957_v27 = vpop.permute.xlu1 %956  ;;  %1009 = vst.msk [vmem:[#allocation5 + $0x18] sm:$0xf] %vm1002_vm6, %v955_v28  ;;  %v1041_v28 = vld [vmem:[#allocation2 + $0xf1] sm:$0xff] }
  0xeb   : > { %1010 = vst.msk [vmem:[#allocation5 + $0x1c] sm:$0xf] %vm1002_vm6, %v957_v27  ;;  %805 = vrot.lane.b32.xlu0 %v5205_v51, %s4757_s16  ;;  %v1042_v27 = vld [vmem:[#allocation2 + $0xf9] sm:$0xff] }
  0xec   : > { %807 = vrot.lane.b32.xlu1 %v5203_v50, %s4757_s16 }
  0xed   : > { %v1112_v30 = vpop.permute.xlu0 %1111 }
  0xee   : > { %v1114_v29 = vpop.permute.xlu1 %1113  ;;  %1168 = vst.msk [vmem:[#allocation5 + $0x10] sm:$0xf] %vm1163_vm7, %v1112_v30 }
  0xef   : > { %1169 = vst.msk [vmem:[#allocation5 + $0x14] sm:$0xf] %vm1163_vm7, %v1114_v29  ;;  %809 = vrot.lane.b32.xlu0 %v4376_v20, %s4757_s16 }
  0xf0   : > { %811 = vrot.lane.b32.xlu1 %v4377_v16, %s4757_s16 }
  0xf1   : > { %v1116_v34 = vpop.permute.xlu0 %1115 }
  0xf2   : > { %v1118_v32 = vpop.permute.xlu1 %1117  ;;  %1170 = vst.msk [vmem:[#allocation5 + $0x18] sm:$0xf] %vm1163_vm7, %v1116_v34 }
  0xf3   : > { %1171 = vst.msk [vmem:[#allocation5 + $0x1c] sm:$0xf] %vm1163_vm7, %v1118_v32  ;;  %966 = vrot.lane.b32.xlu0 %v5020_v25, %s4760_s19  ;;  %v5296_v25 = vpack.c.bf16 %v1037_v36, %v1037_v36 }
  0xf4   : > { %968 = vrot.lane.b32.xlu1 %v5015_v22, %s4760_s19  ;;  %v5294_v22 = vpack.c.bf16 %v1038_v62, %v1038_v62 }
  0xf5   : > { %v1273_v42 = vpop.permute.xlu0 %1272 }
  0xf6   : > { %v1275_v35 = vpop.permute.xlu1 %1274  ;;  %1329 = vst.msk [vmem:[#allocation5 + $0x10] sm:$0xf] %vm1324_vm8, %v1273_v42  ;;  %v1202_v42 = vld [vmem:[#allocation2 + $0xf2] sm:$0xff] }
  0xf7   : > { %1330 = vst.msk [vmem:[#allocation5 + $0x14] sm:$0xf] %vm1324_vm8, %v1275_v35  ;;  %970 = vrot.lane.b32.xlu0 %v5075_v46, %s4760_s19  ;;  %v1203_v35 = vld [vmem:[#allocation2 + $0xfa] sm:$0xff] }
  0xf8   : > { %972 = vrot.lane.b32.xlu1 %v5073_v45, %s4760_s19 }
  0xf9   : > { %v1277_v39 = vpop.permute.xlu0 %1276 }
  0xfa   : > { %v1279_v38 = vpop.permute.xlu1 %1278  ;;  %1331 = vst.msk [vmem:[#allocation5 + $0x18] sm:$0xf] %vm1324_vm8, %v1277_v39  ;;  %v4324_v39 = vpack.c.bf16 %v1202_v42, %v1202_v42 }
  0xfb   : > { %1332 = vst.msk [vmem:[#allocation5 + $0x1c] sm:$0xf] %vm1324_vm8, %v1279_v38  ;;  %1127 = vrot.lane.b32.xlu0 %v5235_v7, %s4759_s18  ;;  %v5358_v7 = vpack.c.bf16 %v1683_v2, %v1683_v2  ;;  %v4325_v38 = vpack.c.bf16 %v1203_v35, %v1203_v35 }
  0xfc   : > { %1129 = vrot.lane.b32.xlu1 %v5233_v6, %s4759_s18 }
  0xfd   : > { %v1435_v33 = vpop.permute.xlu0 %1434 }
  0xfe   : > { %v1437_v40 = vpop.permute.xlu1 %1436  ;;  %1491 = vst.msk [vmem:[#allocation5 + $0x10] sm:$0xf] %vm1486_vm9, %v1435_v33  ;;  %v1364_v33 = vld [vmem:[#allocation2 + $0x108] sm:$0xff] }
  0xff   : > { %1492 = vst.msk [vmem:[#allocation5 + $0x14] sm:$0xf] %vm1486_vm9, %v1437_v40  ;;  %1131 = vrot.lane.b32.xlu0 %v5296_v25, %s4759_s18  ;;  %v1365_v40 = vld [vmem:[#allocation2 + $0x110] sm:$0xff] }
 0x100   : > { %1133 = vrot.lane.b32.xlu1 %v5294_v22, %s4759_s18 }
 0x101   : > { %v1439_v47 = vpop.permute.xlu0 %1438 }
 0x102   : > { %v1441_v44 = vpop.permute.xlu1 %1440  ;;  %1493 = vst.msk [vmem:[#allocation5 + $0x18] sm:$0xf] %vm1486_vm9, %v1439_v47  ;;  %v4344_v47 = vpack.c.bf16 %v1364_v33, %v1364_v33  ;;  %v5478_v33 = vstv %s2093_s11  ;;  %s2236_s11 = sadd.s32 6, %s285_s20  ;;  %s2239_s20 = scalar_lea.vmem [#allocation3], %s4037_s30 }
 0x103   : > { %1494 = vst.msk [vmem:[#allocation5 + $0x1c] sm:$0xf] %vm1486_vm9, %v1441_v44  ;;  %1288 = vrot.lane.b32.xlu0 %v4376_v20, %s4761_s22  ;;  %v4345_v44 = vpack.c.bf16 %v1365_v40, %v1365_v40  ;;  %s6233_s8 = smov (!%p2234_p11, %s2235_s8), %s2236_s11 }
 0x104   : > { %1290 = vrot.lane.b32.xlu1 %v4377_v16, %s4761_s22 }
 0x105   : > { %v1596_v50 = vpop.permute.xlu0 %1595 }
 0x106   : > { %v1598_v49 = vpop.permute.xlu1 %1597  ;;  %1652 = vst.msk [vmem:[#allocation5 + $0x10] sm:$0xf] %vm1647_vm10, %v1596_v50  ;;  %v1525_v50 = vld [vmem:[#allocation2 + $0x109] sm:$0xff] }
 0x107   : > { %1653 = vst.msk [vmem:[#allocation5 + $0x14] sm:$0xf] %vm1647_vm10, %v1598_v49  ;;  %1292 = vrot.lane.b32.xlu0 %v5310_v31, %s4761_s22  ;;  %v1526_v49 = vld [vmem:[#allocation2 + $0x111] sm:$0xff] }
 0x108   : > { %1294 = vrot.lane.b32.xlu1 %v5308_v48, %s4761_s22 }
 0x109   : > { %v1600_v52 = vpop.permute.xlu0 %1599 }
 0x10a   : > { %v1602_v51 = vpop.permute.xlu1 %1601  ;;  %1654 = vst.msk [vmem:[#allocation5 + $0x18] sm:$0xf] %vm1647_vm10, %v1600_v52 }
 0x10b   : > { %1655 = vst.msk [vmem:[#allocation5 + $0x1c] sm:$0xf] %vm1647_vm10, %v1602_v51  ;;  %1450 = vrot.lane.b32.xlu0 %v5075_v46, %s4762_s15  ;;  %v5338_v46 = vpack.c.bf16 %v1521_v56, %v1521_v56 }
 0x10c   : > { %1452 = vrot.lane.b32.xlu1 %v5073_v45, %s4762_s15  ;;  %v5336_v45 = vpack.c.bf16 %v1522_v55, %v1522_v55 }
 0x10d   : > { %v1757_v54 = vpop.permute.xlu0 %1756 }
 0x10e   : > { %v1759_v53 = vpop.permute.xlu1 %1758  ;;  %1813 = vst.msk [vmem:[#allocation5 + $0x10] sm:$0xf] %vm1808_vm11, %v1757_v54  ;;  %v4364_v54 = vpack.c.bf16 %v1525_v50, %v1525_v50 }
 0x10f   : > { %1814 = vst.msk [vmem:[#allocation5 + $0x14] sm:$0xf] %vm1808_vm11, %v1759_v53  ;;  %1454 = vrot.lane.b32.xlu0 %v5109_v63, %s4762_s15  ;;  %v4365_v53 = vpack.c.bf16 %v1526_v49, %v1526_v49 }
 0x110   : > { %1456 = vrot.lane.b32.xlu1 %v5103_v59, %s4762_s15 }
 0x111   : > { %v637_v58 = vpop.permute.xlu0 %636 }
 0x112   : > { %v639_v57 = vpop.permute.xlu1 %638  ;;  %689 = vst.msk [vmem:[#allocation5 + $0x20] sm:$0xf] %vm680_vm4, %v637_v58  ;;  %v1687_v58 = vld [vmem:[#allocation2 + $0x112] sm:$0xff] }
 0x113   : > { %690 = vst.msk [vmem:[#allocation5 + $0x24] sm:$0xf] %vm680_vm4, %v639_v57  ;;  %1611 = vrot.lane.b32.xlu0 %v5296_v25, %s4763_s9 }
 0x114   : > { %1613 = vrot.lane.b32.xlu1 %v5294_v22, %s4763_s9 }
 0x115   : > { %v1761_v0 = vpop.permute.xlu0 %1760 }
 0x116   : > { %v1763_v61 = vpop.permute.xlu1 %1762  ;;  %v4692_v1 = vld [vmem:[#allocation5 + $0x10] sm:$0xff]   ;;  %1815 = vst.msk [vmem:[#allocation5 + $0x18] sm:$0xf] %vm1808_vm11, %v1761_v0  ;;  %v4385_v0 = vpack.c.bf16 %v1687_v58, %v1687_v58 }
 0x117   : > { %1816 = vst.msk [vmem:[#allocation5 + $0x1c] sm:$0xf] %vm1808_vm11, %v1763_v61  ;;  %1615 = vrot.lane.b32.xlu0 %v5338_v46, %s4763_s9  ;;  %4585 = vmatprep.mubr.bf16.mxu0 %v4692_v1 }
 0x118   : > { %1617 = vrot.lane.b32.xlu1 %v5336_v45, %s4763_s9 }
 0x119   : > { %v641_v60 = vpop.permute.xlu0 %640 }
 0x11a   : > { %v643_v37 = vpop.permute.xlu1 %642  ;;  %691 = vst.msk [vmem:[#allocation5 + $0x28] sm:$0xf] %vm680_vm4, %v641_v60 }
 0x11b   : > { %692 = vst.msk [vmem:[#allocation5 + $0x2c] sm:$0xf] %vm680_vm4, %v643_v37  ;;  %1772 = vrot.lane.b32.xlu0 %v5310_v31, %s6207_s21 }
 0x11c   : > { %1774 = vrot.lane.b32.xlu1 %v5308_v48, %s6207_s21 }
 0x11d   : > { %v798_v5 = vpop.permute.xlu0 %797 }
 0x11e   : > { %v800_v4 = vpop.permute.xlu1 %799  ;;  %v4693_v6 = vld [vmem:[#allocation5 + $0x18] sm:$0xff]   ;;  %850 = vst.msk [vmem:[#allocation5 + $0x20] sm:$0xf] %vm841_vm5, %v798_v5 }
 0x11f   : > { %851 = vst.msk [vmem:[#allocation5 + $0x24] sm:$0xf] %vm841_vm5, %v800_v4  ;;  %652 = vrot.lane.b32.xlu0 %v5296_v25, %s4758_s17  ;;  %4586 = vmatmul.mubr.bf16.gmra.mxu0 %v4693_v6 }
 0x120   : > { %654 = vrot.lane.b32.xlu1 %v5294_v22, %s4758_s17 }
 0x121   : > { %v802_v10 = vpop.permute.xlu0 %801 }
 0x122   : > { %v804_v9 = vpop.permute.xlu1 %803  ;;  %852 = vst.msk [vmem:[#allocation5 + $0x28] sm:$0xf] %vm841_vm5, %v802_v10 }
 0x123   : > { %853 = vst.msk [vmem:[#allocation5 + $0x2c] sm:$0xf] %vm841_vm5, %v804_v9  ;;  %1776 = vrot.lane.b32.xlu0 %v5360_v8, %s6207_s21 }
 0x124   : > { %1778 = vrot.lane.b32.xlu1 %v5358_v7, %s6207_s21 }
 0x125   : > { %v959_v12 = vpop.permute.xlu0 %958 }
 0x126   : > { %v961_v11 = vpop.permute.xlu1 %960  ;;  %1011 = vst.msk [vmem:[#allocation5 + $0x20] sm:$0xf] %vm1002_vm6, %v959_v12 }
 0x127   : > { %1012 = vst.msk [vmem:[#allocation5 + $0x24] sm:$0xf] %vm1002_vm6, %v961_v11  ;;  %656 = vrot.lane.b32.xlu0 %v5338_v46, %s4758_s17 }
 0x128   : > { %658 = vrot.lane.b32.xlu1 %v5336_v45, %s4758_s17 }
 0x129   : > { %v963_v14 = vpop.permute.xlu0 %962 }
 0x12a   : > { %v965_v13 = vpop.permute.xlu1 %964  ;;  %1013 = vst.msk [vmem:[#allocation5 + $0x28] sm:$0xf] %vm1002_vm6, %v963_v14 }
 0x12b   : > { %1014 = vst.msk [vmem:[#allocation5 + $0x2c] sm:$0xf] %vm1002_vm6, %v965_v13  ;;  %813 = vrot.lane.b32.xlu0 %v5310_v31, %s4757_s16 }
 0x12c   : > { %815 = vrot.lane.b32.xlu1 %v5308_v48, %s4757_s16 }
 0x12d   : > { %v1120_v17 = vpop.permute.xlu0 %1119 }
 0x12e   : > { %v1122_v15 = vpop.permute.xlu1 %1121  ;;  %1172 = vst.msk [vmem:[#allocation5 + $0x20] sm:$0xf] %vm1163_vm7, %v1120_v17 }
 0x12f   : > { %1173 = vst.msk [vmem:[#allocation5 + $0x24] sm:$0xf] %vm1163_vm7, %v1122_v15  ;;  %817 = vrot.lane.b32.xlu0 %v5360_v8, %s4757_s16 }
 0x130   : > { %819 = vrot.lane.b32.xlu1 %v5358_v7, %s4757_s16 }
 0x131   : > { %v1124_v20 = vpop.permute.xlu0 %1123 }
 0x132   : > { %v1126_v16 = vpop.permute.xlu1 %1125  ;;  %1174 = vst.msk [vmem:[#allocation5 + $0x28] sm:$0xf] %vm1163_vm7, %v1124_v20 }
 0x133   : > { %1175 = vst.msk [vmem:[#allocation5 + $0x2c] sm:$0xf] %vm1163_vm7, %v1126_v16  ;;  %974 = vrot.lane.b32.xlu0 %v5109_v63, %s4760_s19  ;;  %v4304_v63 = vpack.c.bf16 %v1041_v28, %v1041_v28 }
 0x134   : > { %976 = vrot.lane.b32.xlu1 %v5103_v59, %s4760_s19  ;;  %v4305_v59 = vpack.c.bf16 %v1042_v27, %v1042_v27 }
 0x135   : > { %v1281_v26 = vpop.permute.xlu0 %1280 }
 0x136   : > { %v1283_v21 = vpop.permute.xlu1 %1282  ;;  %1333 = vst.msk [vmem:[#allocation5 + $0x20] sm:$0xf] %vm1324_vm8, %v1281_v26 }
 0x137   : > { %1334 = vst.msk [vmem:[#allocation5 + $0x24] sm:$0xf] %vm1324_vm8, %v1283_v21  ;;  %978 = vrot.lane.b32.xlu0 %v4284_v24, %s4760_s19 }
 0x138   : > { %980 = vrot.lane.b32.xlu1 %v4285_v23, %s4760_s19 }
 0x139   : > { %v1285_v30 = vpop.permute.xlu0 %1284 }
 0x13a   : > { %v1287_v29 = vpop.permute.xlu1 %1286  ;;  %1335 = vst.msk [vmem:[#allocation5 + $0x28] sm:$0xf] %vm1324_vm8, %v1285_v30 }
 0x13b   : > { %1336 = vst.msk [vmem:[#allocation5 + $0x2c] sm:$0xf] %vm1324_vm8, %v1287_v29  ;;  %1135 = vrot.lane.b32.xlu0 %v5338_v46, %s4759_s18 }
 0x13c   : > { %1137 = vrot.lane.b32.xlu1 %v5336_v45, %s4759_s18  ;;  %v1686_v45 = vld [vmem:[#allocation2 + $0x10a] sm:$0xff] }
 0x13d   : > { %v1443_v34 = vpop.permute.xlu0 %1442  ;;  %v4384_v1 = vpack.c.bf16 %v1686_v45, %v1686_v45 }
 0x13e   : > { %v1445_v32 = vpop.permute.xlu1 %1444  ;;  %1495 = vst.msk [vmem:[#allocation5 + $0x20] sm:$0xf] %vm1486_vm9, %v1443_v34 }
 0x13f   : > { %1496 = vst.msk [vmem:[#allocation5 + $0x24] sm:$0xf] %vm1486_vm9, %v1445_v32  ;;  %1139 = vrot.lane.b32.xlu0 %v4304_v63, %s4759_s18 }
 0x140   : > { %1141 = vrot.lane.b32.xlu1 %v4305_v59, %s4759_s18 }
 0x141   : > { %v1447_v36 = vpop.permute.xlu0 %1446 }
 0x142   : > { %v1449_v62 = vpop.permute.xlu1 %1448  ;;  %1497 = vst.msk [vmem:[#allocation5 + $0x28] sm:$0xf] %vm1486_vm9, %v1447_v36 }
 0x143   : > { %1498 = vst.msk [vmem:[#allocation5 + $0x2c] sm:$0xf] %vm1486_vm9, %v1449_v62  ;;  %1296 = vrot.lane.b32.xlu0 %v5360_v8, %s4761_s22 }
 0x144   : > { %1298 = vrot.lane.b32.xlu1 %v5358_v7, %s4761_s22 }
 0x145   : > { %v1604_v25 = vpop.permute.xlu0 %1603 }
 0x146   : > { %v1606_v22 = vpop.permute.xlu1 %1605  ;;  %1656 = vst.msk [vmem:[#allocation5 + $0x20] sm:$0xf] %vm1647_vm10, %v1604_v25 }
 0x147   : > { %1657 = vst.msk [vmem:[#allocation5 + $0x24] sm:$0xf] %vm1647_vm10, %v1606_v22  ;;  %1300 = vrot.lane.b32.xlu0 %v4324_v39, %s4761_s22 }
 0x148   : > { %1302 = vrot.lane.b32.xlu1 %v4325_v38, %s4761_s22 }
 0x149   : > { %v1608_v43 = vpop.permute.xlu0 %1607 }
 0x14a   : > { %v1610_v41 = vpop.permute.xlu1 %1609  ;;  %1658 = vst.msk [vmem:[#allocation5 + $0x28] sm:$0xf] %vm1647_vm10, %v1608_v43 }
 0x14b   : > { %1659 = vst.msk [vmem:[#allocation5 + $0x2c] sm:$0xf] %vm1647_vm10, %v1610_v41  ;;  %1458 = vrot.lane.b32.xlu0 %v4284_v24, %s4762_s15 }
 0x14c   : > { %1460 = vrot.lane.b32.xlu1 %v4285_v23, %s4762_s15 }
 0x14d   : > { %v1765_v31 = vpop.permute.xlu0 %1764 }
 0x14e   : > { %v1767_v48 = vpop.permute.xlu1 %1766  ;;  %1817 = vst.msk [vmem:[#allocation5 + $0x20] sm:$0xf] %vm1808_vm11, %v1765_v31 }
 0x14f   : > { %1818 = vst.msk [vmem:[#allocation5 + $0x24] sm:$0xf] %vm1808_vm11, %v1767_v48  ;;  %1462 = vrot.lane.b32.xlu0 %v4344_v47, %s4762_s15 }
 0x150   : > { %1464 = vrot.lane.b32.xlu1 %v4345_v44, %s4762_s15 }
 0x151   : > { %v645_v52 = vpop.permute.xlu0 %644 }
 0x152   : > { %v647_v51 = vpop.permute.xlu1 %646  ;;  %693 = vst.msk [vmem:[#allocation5 + $0x30] sm:$0xf] %vm680_vm4, %v645_v52 }
 0x153   : > { %694 = vst.msk [vmem:[#allocation5 + $0x34] sm:$0xf] %vm680_vm4, %v647_v51  ;;  %1619 = vrot.lane.b32.xlu0 %v4304_v63, %s4763_s9 }
 0x154   : > { %1621 = vrot.lane.b32.xlu1 %v4305_v59, %s4763_s9 }
 0x155   : > { %v1769_v56 = vpop.permute.xlu0 %1768 }
 0x156   : > { %v1771_v55 = vpop.permute.xlu1 %1770  ;;  %v4694_v57 = vld [vmem:[#allocation5 + $0x20] sm:$0xff]   ;;  %1819 = vst.msk [vmem:[#allocation5 + $0x28] sm:$0xf] %vm1808_vm11, %v1769_v56 }
 0x157   : > { %1820 = vst.msk [vmem:[#allocation5 + $0x2c] sm:$0xf] %vm1808_vm11, %v1771_v55  ;;  %1623 = vrot.lane.b32.xlu0 %v4364_v54, %s4763_s9  ;;  %4589 = vmatprep.mubr.bf16.mxu0 %v4694_v57 }
 0x158   : > { %1625 = vrot.lane.b32.xlu1 %v4365_v53, %s4763_s9 }
 0x159   : > { %v649_v61 = vpop.permute.xlu0 %648 }
 0x15a   : > { %v651_v46 = vpop.permute.xlu1 %650  ;;  %695 = vst.msk [vmem:[#allocation5 + $0x38] sm:$0xf] %vm680_vm4, %v649_v61 }
 0x15b   : > { %696 = vst.msk [vmem:[#allocation5 + $0x3c] sm:$0xf] %vm680_vm4, %v651_v46  ;;  %1780 = vrot.lane.b32.xlu0 %v4324_v39, %s6207_s21 }
 0x15c   : > { %1782 = vrot.lane.b32.xlu1 %v4325_v38, %s6207_s21  ;;  %v5475_v38 = vld [vmem:[%s6202_s2] ss:$0 sm:$0xff] }
 0x15d   : > { %v806_v60 = vpop.permute.xlu0 %805 }
 0x15e   : > { %v808_v37 = vpop.permute.xlu1 %807  ;;  %v4695_v2 = vld [vmem:[#allocation5 + $0x28] sm:$0xff]   ;;  %854 = vst.msk [vmem:[#allocation5 + $0x30] sm:$0xf] %vm841_vm5, %v806_v60 }
 0x15f   : > { %855 = vst.msk [vmem:[#allocation5 + $0x34] sm:$0xf] %vm841_vm5, %v808_v37  ;;  %1784 = vrot.lane.b32.xlu0 %v4384_v1, %s6207_s21  ;;  %4590 = vmatmul.mubr.bf16.gmra.mxu0 %v4695_v2 }
 0x160   : > { %1786 = vrot.lane.b32.xlu1 %v4385_v0, %s6207_s21  ;;  %s4038_s21 = sshll.u32 %s6233_s8, 4 }
 0x161   : > { %v810_v4 = vpop.permute.xlu0 %809  ;;  %s2245_s12 = scalar_lea.vmem [#allocation3], %s4038_s21  ;;  %s6209_s21 = smov 32  }
 0x162   : > { %v812_v3 = vpop.permute.xlu1 %811  ;;  %856 = vst.msk [vmem:[#allocation5 + $0x38] sm:$0xf] %vm841_vm5, %v810_v4 }
 0x163   : > { %857 = vst.msk [vmem:[#allocation5 + $0x3c] sm:$0xf] %vm841_vm5, %v812_v3 }
 0x165   : > { %v967_v6 = vpop.permute.xlu0 %966 }
 0x166   : > { %v969_v5 = vpop.permute.xlu1 %968  ;;  %1015 = vst.msk [vmem:[#allocation5 + $0x30] sm:$0xf] %vm1002_vm6, %v967_v6 }
 0x167   : > { %1016 = vst.msk [vmem:[#allocation5 + $0x34] sm:$0xf] %vm1002_vm6, %v969_v5 }
 0x169   : > { %v971_v8 = vpop.permute.xlu0 %970 }
 0x16a   : > { %v973_v7 = vpop.permute.xlu1 %972  ;;  %1017 = vst.msk [vmem:[#allocation5 + $0x38] sm:$0xf] %vm1002_vm6, %v971_v8 }
 0x16b   : > { %1018 = vst.msk [vmem:[#allocation5 + $0x3c] sm:$0xf] %vm1002_vm6, %v973_v7 }
 0x16d   : > { %v1128_v10 = vpop.permute.xlu0 %1127 }
 0x16e   : > { %v1130_v9 = vpop.permute.xlu1 %1129  ;;  %1176 = vst.msk [vmem:[#allocation5 + $0x30] sm:$0xf] %vm1163_vm7, %v1128_v10 }
 0x16f   : > { %1177 = vst.msk [vmem:[#allocation5 + $0x34] sm:$0xf] %vm1163_vm7, %v1130_v9 }
 0x171   : > { %v1132_v12 = vpop.permute.xlu0 %1131 }
 0x172   : > { %v1134_v11 = vpop.permute.xlu1 %1133  ;;  %1178 = vst.msk [vmem:[#allocation5 + $0x38] sm:$0xf] %vm1163_vm7, %v1132_v12 }
 0x173   : > { %1179 = vst.msk [vmem:[#allocation5 + $0x3c] sm:$0xf] %vm1163_vm7, %v1134_v11 }
 0x175   : > { %v1289_v14 = vpop.permute.xlu0 %1288 }
 0x176   : > { %v1291_v13 = vpop.permute.xlu1 %1290  ;;  %1337 = vst.msk [vmem:[#allocation5 + $0x30] sm:$0xf] %vm1324_vm8, %v1289_v14 }
 0x177   : > { %1338 = vst.msk [vmem:[#allocation5 + $0x34] sm:$0xf] %vm1324_vm8, %v1291_v13 }
 0x179   : > { %v1293_v17 = vpop.permute.xlu0 %1292 }
 0x17a   : > { %v1295_v15 = vpop.permute.xlu1 %1294  ;;  %1339 = vst.msk [vmem:[#allocation5 + $0x38] sm:$0xf] %vm1324_vm8, %v1293_v17 }
 0x17b   : > { %1340 = vst.msk [vmem:[#allocation5 + $0x3c] sm:$0xf] %vm1324_vm8, %v1295_v15 }
 0x17d   : > { %v1451_v19 = vpop.permute.xlu0 %1450 }
 0x17e   : > { %v1453_v18 = vpop.permute.xlu1 %1452  ;;  %1499 = vst.msk [vmem:[#allocation5 + $0x30] sm:$0xf] %vm1486_vm9, %v1451_v19 }
 0x17f   : > { %1500 = vst.msk [vmem:[#allocation5 + $0x34] sm:$0xf] %vm1486_vm9, %v1453_v18 }
 0x181   : > { %v1455_v20 = vpop.permute.xlu0 %1454 }
 0x182   : > { %v1457_v16 = vpop.permute.xlu1 %1456  ;;  %1501 = vst.msk [vmem:[#allocation5 + $0x38] sm:$0xf] %vm1486_vm9, %v1455_v20 }
 0x183   : > { %1502 = vst.msk [vmem:[#allocation5 + $0x3c] sm:$0xf] %vm1486_vm9, %v1457_v16 }
 0x185   : > { %v1612_v24 = vpop.permute.xlu0 %1611 }
 0x186   : > { %v1614_v23 = vpop.permute.xlu1 %1613  ;;  %1660 = vst.msk [vmem:[#allocation5 + $0x30] sm:$0xf] %vm1647_vm10, %v1612_v24 }
 0x187   : > { %1661 = vst.msk [vmem:[#allocation5 + $0x34] sm:$0xf] %vm1647_vm10, %v1614_v23 }
 0x189   : > { %v1616_v26 = vpop.permute.xlu0 %1615 }
 0x18a   : > { %v1618_v21 = vpop.permute.xlu1 %1617  ;;  %1662 = vst.msk [vmem:[#allocation5 + $0x38] sm:$0xf] %vm1647_vm10, %v1616_v26 }
 0x18b   : > { %1663 = vst.msk [vmem:[#allocation5 + $0x3c] sm:$0xf] %vm1647_vm10, %v1618_v21 }
 0x18d   : > { %v1773_v28 = vpop.permute.xlu0 %1772 }
 0x18e   : > { %v1775_v27 = vpop.permute.xlu1 %1774  ;;  %1821 = vst.msk [vmem:[#allocation5 + $0x30] sm:$0xf] %vm1808_vm11, %v1773_v28 }
 0x18f   : > { %1822 = vst.msk [vmem:[#allocation5 + $0x34] sm:$0xf] %vm1808_vm11, %v1775_v27 }
 0x191   : > { %v653_v30 = vpop.permute.xlu0 %652 }
 0x192   : > { %v655_v29 = vpop.permute.xlu1 %654  ;;  %697 = vst.msk [vmem:[#allocation5 + $0x40] sm:$0xf] %vm680_vm4, %v653_v30 }
 0x193   : > { %698 = vst.msk [vmem:[#allocation5 + $0x44] sm:$0xf] %vm680_vm4, %v655_v29 }
 0x195   : > { %v1777_v63 = vpop.permute.xlu0 %1776 }
 0x196   : > { %v1779_v59 = vpop.permute.xlu1 %1778  ;;  %v4696_v32 = vld [vmem:[#allocation5 + $0x30] sm:$0xff]   ;;  %1823 = vst.msk [vmem:[#allocation5 + $0x38] sm:$0xf] %vm1808_vm11, %v1777_v63 }
 0x197   : > { %1824 = vst.msk [vmem:[#allocation5 + $0x3c] sm:$0xf] %vm1808_vm11, %v1779_v59  ;;  %4593 = vmatprep.mubr.bf16.mxu0 %v4696_v32 }
 0x199   : > { %v657_v35 = vpop.permute.xlu0 %656 }
 0x19a   : > { %v659_v34 = vpop.permute.xlu1 %658  ;;  %699 = vst.msk [vmem:[#allocation5 + $0x48] sm:$0xf] %vm680_vm4, %v657_v35 }
 0x19b   : > { %700 = vst.msk [vmem:[#allocation5 + $0x4c] sm:$0xf] %vm680_vm4, %v659_v34 }
 0x19d   : > { %v814_v62 = vpop.permute.xlu0 %813 }
 0x19e   : > { %v816_v42 = vpop.permute.xlu1 %815  ;;  %v4697_v36 = vld [vmem:[#allocation5 + $0x38] sm:$0xff]   ;;  %858 = vst.msk [vmem:[#allocation5 + $0x40] sm:$0xf] %vm841_vm5, %v814_v62 }
 0x19f   : > { %859 = vst.msk [vmem:[#allocation5 + $0x44] sm:$0xf] %vm841_vm5, %v816_v42  ;;  %4594 = vmatmul.mubr.bf16.gmra.mxu0 %v4697_v36  ;;  %v4583_v39 = vpop.f32.mrf.mxu0 }
 0x1a0   : > { %v2023_v22 = vadd.f32 %v4583_v39, %v5475_v38 }
 0x1a1   : > { %v818_v40 = vpop.permute.xlu0 %817  ;;  %v2014_v41 = vpop.f32.mrf.mxu0 }
 0x1a2   : > { %v820_v25 = vpop.permute.xlu1 %819  ;;  %860 = vst.msk [vmem:[#allocation5 + $0x48] sm:$0xf] %vm841_vm5, %v818_v40  ;;  %v2116_v43 = vmin.f32 %v2023_v22, 0.0  ;;  %v2015_v44 = vadd.f32 %v5475_v38, %v2014_v41  ;;  %v2096_v48 = vmax.f32 %v2023_v22, 0.0 }
 0x1a3   : > { %861 = vst.msk [vmem:[#allocation5 + $0x4c] sm:$0xf] %vm841_vm5, %v820_v25  ;;  %v4584_v47 = vpop.f32.mrf.mxu0 }
 0x1a4   : > { %v2137_v31 = vmul.f32 %v5478_v33, %v2116_v43  ;;  %v2114_v49 = vmin.f32 %v2015_v44, 0.0  ;;  %v2026_v50 = vadd.f32 %v4584_v47, %v5475_v38  ;;  %v2094_v55 = vmax.f32 %v2015_v44, 0.0 }
 0x1a5   : > { %v975_v52 = vpop.permute.xlu0 %974  ;;  %v2017_v53 = vpop.f32.mrf.mxu0 }
 0x1a6   : > { %v977_v51 = vpop.permute.xlu1 %976  ;;  %1019 = vst.msk [vmem:[#allocation5 + $0x40] sm:$0xf] %vm1002_vm6, %v975_v52  ;;  %v2157_v54 = vadd.f32 %v2137_v31, %v2096_v48  ;;  %v2135_v56 = vmul.f32 %v5478_v33, %v2114_v49  ;;  %v2117_v57 = vmin.f32 %v2026_v50, 0.0  ;;  %v2018_v58 = vadd.f32 %v5475_v38, %v2017_v53 }
 0x1a7   : > { %1020 = vst.msk [vmem:[#allocation5 + $0x44] sm:$0xf] %vm1002_vm6, %v977_v51  ;;  %v2097_v46 = vmax.f32 %v2026_v50, 0.0 }
 0x1a8   : > { %2177 = vst.msk [vmem:[#allocation3 + $0x10] sm:$0xff] %vm330_vm1, %v2157_v54  ;;  %v2155_v45 = vadd.f32 %v2135_v56, %v2094_v55  ;;  %v2138_v61 = vmul.f32 %v5478_v33, %v2117_v57  ;;  %v2115_v37 = vmin.f32 %v2018_v58, 0.0  ;;  %v2095_v2 = vmax.f32 %v2018_v58, 0.0 }
 0x1a9   : > { %v979_v1 = vpop.permute.xlu0 %978 }
 0x1aa   : > { %v981_v0 = vpop.permute.xlu1 %980  ;;  %1021 = vst.msk [vmem:[#allocation5 + $0x48] sm:$0xf] %vm1002_vm6, %v979_v1  ;;  %v2158_v60 = vadd.f32 %v2138_v61, %v2097_v46  ;;  %v2136_v3 = vmul.f32 %v5478_v33, %v2115_v37 }
 0x1ab   : > { %1022 = vst.msk [vmem:[#allocation5 + $0x4c] sm:$0xf] %vm1002_vm6, %v981_v0 }
 0x1ac   : > { %2175 = vst.msk [vmem:[#allocation3] sm:$0xff] %vm330_vm1, %v2155_v45  ;;  %2178 = vst.msk [vmem:[#allocation3 + $0x18] sm:$0xff] %vm330_vm1, %v2158_v60  ;;  %v2156_v6 = vadd.f32 %v2136_v3, %v2095_v2 }
 0x1ad   : > { %v1136_v5 = vpop.permute.xlu0 %1135 }
 0x1ae   : > { %v1138_v4 = vpop.permute.xlu1 %1137  ;;  %1180 = vst.msk [vmem:[#allocation5 + $0x40] sm:$0xf] %vm1163_vm7, %v1136_v5 }
 0x1af   : > { %1181 = vst.msk [vmem:[#allocation5 + $0x44] sm:$0xf] %vm1163_vm7, %v1138_v4 }
 0x1b0   : > { %2176 = vst.msk [vmem:[#allocation3 + $0x8] sm:$0xff] %vm330_vm1, %v2156_v6 }
 0x1b1   : > { %v1140_v8 = vpop.permute.xlu0 %1139 }
 0x1b2   : > { %v1142_v7 = vpop.permute.xlu1 %1141  ;;  %1182 = vst.msk [vmem:[#allocation5 + $0x48] sm:$0xf] %vm1163_vm7, %v1140_v8 }
 0x1b3   : > { %1183 = vst.msk [vmem:[#allocation5 + $0x4c] sm:$0xf] %vm1163_vm7, %v1142_v7 }
 0x1b5   : > { %v1297_v10 = vpop.permute.xlu0 %1296 }
 0x1b6   : > { %v1299_v9 = vpop.permute.xlu1 %1298  ;;  %1341 = vst.msk [vmem:[#allocation5 + $0x40] sm:$0xf] %vm1324_vm8, %v1297_v10 }
 0x1b7   : > { %1342 = vst.msk [vmem:[#allocation5 + $0x44] sm:$0xf] %vm1324_vm8, %v1299_v9 }
 0x1b9   : > { %v1301_v12 = vpop.permute.xlu0 %1300 }
 0x1ba   : > { %v1303_v11 = vpop.permute.xlu1 %1302  ;;  %1343 = vst.msk [vmem:[#allocation5 + $0x48] sm:$0xf] %vm1324_vm8, %v1301_v12 }
 0x1bb   : > { %1344 = vst.msk [vmem:[#allocation5 + $0x4c] sm:$0xf] %vm1324_vm8, %v1303_v11 }
 0x1bd   : > { %v1459_v14 = vpop.permute.xlu0 %1458 }
 0x1be   : > { %v1461_v13 = vpop.permute.xlu1 %1460  ;;  %1503 = vst.msk [vmem:[#allocation5 + $0x40] sm:$0xf] %vm1486_vm9, %v1459_v14 }
 0x1bf   : > { %1504 = vst.msk [vmem:[#allocation5 + $0x44] sm:$0xf] %vm1486_vm9, %v1461_v13 }
 0x1c1   : > { %v1463_v17 = vpop.permute.xlu0 %1462 }
 0x1c2   : > { %v1465_v15 = vpop.permute.xlu1 %1464  ;;  %1505 = vst.msk [vmem:[#allocation5 + $0x48] sm:$0xf] %vm1486_vm9, %v1463_v17 }
 0x1c3   : > { %1506 = vst.msk [vmem:[#allocation5 + $0x4c] sm:$0xf] %vm1486_vm9, %v1465_v15 }
 0x1c5   : > { %v1620_v19 = vpop.permute.xlu0 %1619 }
 0x1c6   : > { %v1622_v18 = vpop.permute.xlu1 %1621  ;;  %1664 = vst.msk [vmem:[#allocation5 + $0x40] sm:$0xf] %vm1647_vm10, %v1620_v19 }
 0x1c7   : > { %1665 = vst.msk [vmem:[#allocation5 + $0x44] sm:$0xf] %vm1647_vm10, %v1622_v18 }
 0x1c9   : > { %v1624_v20 = vpop.permute.xlu0 %1623 }
 0x1ca   : > { %v1626_v16 = vpop.permute.xlu1 %1625  ;;  %1666 = vst.msk [vmem:[#allocation5 + $0x48] sm:$0xf] %vm1647_vm10, %v1624_v20 }
 0x1cb   : > { %1667 = vst.msk [vmem:[#allocation5 + $0x4c] sm:$0xf] %vm1647_vm10, %v1626_v16 }
 0x1cd   : > { %v1781_v24 = vpop.permute.xlu0 %1780 }
 0x1ce   : > { %v1783_v23 = vpop.permute.xlu1 %1782  ;;  %1825 = vst.msk [vmem:[#allocation5 + $0x40] sm:$0xf] %vm1808_vm11, %v1781_v24 }
 0x1cf   : > { %1826 = vst.msk [vmem:[#allocation5 + $0x44] sm:$0xf] %vm1808_vm11, %v1783_v23 }
 0x1d1   : > { %v1785_v26 = vpop.permute.xlu0 %1784 }
 0x1d2   : > { %v1787_v21 = vpop.permute.xlu1 %1786  ;;  %1827 = vst.msk [vmem:[#allocation5 + $0x48] sm:$0xf] %vm1808_vm11, %v1785_v26 }
 0x1d3   : > { %1828 = vst.msk [vmem:[#allocation5 + $0x4c] sm:$0xf] %vm1808_vm11, %v1787_v21 }
 0x1d6   : > { %v4698_v27 = vld [vmem:[#allocation5 + $0x40] sm:$0xff]  }
 0x1d7   : > { %4597 = vmatprep.mubr.bf16.mxu0 %v4698_v27 }
 0x1da   : > { %v4699_v28 = vld [vmem:[#allocation5 + $0x48] sm:$0xff]  }
 0x1db   : > { %4598 = vmatmul.mubr.bf16.gmra.mxu0 %v4699_v28 }
 0x1df   : > { %v4587_v29 = vpop.f32.mrf.mxu0 }
 0x1e0   : > { %v2039_v30 = vadd.f32 %v4587_v29, %v5475_v38 }
 0x1e1   : > { %v2030_v59 = vpop.f32.mrf.mxu0 }
 0x1e2   : > { %v2120_v63 = vmin.f32 %v2039_v30, 0.0  ;;  %v2031_v32 = vadd.f32 %v5475_v38, %v2030_v59  ;;  %v2100_v35 = vmax.f32 %v2039_v30, 0.0 }
 0x1e3   : > { %v4588_v34 = vpop.f32.mrf.mxu0 }
 0x1e4   : > { %v2141_v42 = vmul.f32 %v5478_v33, %v2120_v63  ;;  %v2118_v62 = vmin.f32 %v2031_v32, 0.0  ;;  %v2042_v36 = vadd.f32 %v4588_v34, %v5475_v38  ;;  %v2098_v25 = vmax.f32 %v2031_v32, 0.0 }
 0x1e5   : > { %v2033_v39 = vpop.f32.mrf.mxu0 }
 0x1e6   : > { %v2161_v22 = vadd.f32 %v2141_v42, %v2100_v35  ;;  %v2139_v40 = vmul.f32 %v5478_v33, %v2118_v62  ;;  %v2121_v41 = vmin.f32 %v2042_v36, 0.0  ;;  %v2034_v43 = vadd.f32 %v5475_v38, %v2033_v39 }
 0x1e7   : > { %v2101_v47 = vmax.f32 %v2042_v36, 0.0 }
 0x1e8   : > { %2181 = vst.msk [vmem:[#allocation3 + $0x30] sm:$0xff] %vm330_vm1, %v2161_v22  ;;  %v2159_v44 = vadd.f32 %v2139_v40, %v2098_v25  ;;  %v2142_v48 = vmul.f32 %v5478_v33, %v2121_v41  ;;  %v2119_v31 = vmin.f32 %v2034_v43, 0.0  ;;  %v2099_v50 = vmax.f32 %v2034_v43, 0.0 }
 0x1ea   : > { %2179 = vst.msk [vmem:[#allocation3 + $0x20] sm:$0xff] %vm330_vm1, %v2159_v44  ;;  %v2162_v49 = vadd.f32 %v2142_v48, %v2101_v47  ;;  %v2140_v51 = vmul.f32 %v5478_v33, %v2119_v31 }
 0x1ec   : > { %2182 = vst.msk [vmem:[#allocation3 + $0x38] sm:$0xff] %vm330_vm1, %v2162_v49  ;;  %v2160_v52 = vadd.f32 %v2140_v51, %v2099_v50 }
 0x1ee   : > { %2180 = vst.msk [vmem:[#allocation3 + $0x28] sm:$0xff] %vm330_vm1, %v2160_v52 }
 0x21f   : > { %v4591_v53 = vpop.f32.mrf.mxu0 }
 0x220   : > { %v2055_v54 = vadd.f32 %v4591_v53, %v5475_v38 }
 0x221   : > { %v2046_v55 = vpop.f32.mrf.mxu0 }
 0x222   : > { %v2124_v56 = vmin.f32 %v2055_v54, 0.0  ;;  %v2047_v57 = vadd.f32 %v5475_v38, %v2046_v55  ;;  %v2104_v45 = vmax.f32 %v2055_v54, 0.0 }
 0x223   : > { %v4592_v58 = vpop.f32.mrf.mxu0 }
 0x224   : > { %v2145_v46 = vmul.f32 %v5478_v33, %v2124_v56  ;;  %v2122_v61 = vmin.f32 %v2047_v57, 0.0  ;;  %v2058_v0 = vadd.f32 %v4592_v58, %v5475_v38  ;;  %v2102_v60 = vmax.f32 %v2047_v57, 0.0 }
 0x225   : > { %v2049_v1 = vpop.f32.mrf.mxu0 }
 0x226   : > { %v2165_v37 = vadd.f32 %v2145_v46, %v2104_v45  ;;  %v2143_v2 = vmul.f32 %v5478_v33, %v2122_v61  ;;  %v2125_v3 = vmin.f32 %v2058_v0, 0.0  ;;  %v2050_v4 = vadd.f32 %v5475_v38, %v2049_v1 }
 0x227   : > { %v2105_v6 = vmax.f32 %v2058_v0, 0.0 }
 0x228   : > { %2185 = vst.msk [vmem:[#allocation3 + $0x50] sm:$0xff] %vm330_vm1, %v2165_v37  ;;  %v2163_v5 = vadd.f32 %v2143_v2, %v2102_v60  ;;  %v2146_v7 = vmul.f32 %v5478_v33, %v2125_v3  ;;  %v2123_v8 = vmin.f32 %v2050_v4, 0.0  ;;  %v2103_v10 = vmax.f32 %v2050_v4, 0.0 }
 0x22a   : > { %2183 = vst.msk [vmem:[#allocation3 + $0x40] sm:$0xff] %vm330_vm1, %v2163_v5  ;;  %v2166_v9 = vadd.f32 %v2146_v7, %v2105_v6  ;;  %v2144_v11 = vmul.f32 %v5478_v33, %v2123_v8 }
 0x22c   : > { %2186 = vst.msk [vmem:[#allocation3 + $0x58] sm:$0xff] %vm330_vm1, %v2166_v9  ;;  %v2164_v12 = vadd.f32 %v2144_v11, %v2103_v10 }
 0x22e   : > { %2184 = vst.msk [vmem:[#allocation3 + $0x48] sm:$0xff] %vm330_vm1, %v2164_v12 }
 0x25f   : > { %v4595_v13 = vpop.f32.mrf.mxu0 }
 0x260   : > { %v2071_v14 = vadd.f32 %v4595_v13, %v5475_v38 }
 0x261   : > { %v2062_v15 = vpop.f32.mrf.mxu0 }
 0x262   : > { %v2128_v17 = vmin.f32 %v2071_v14, 0.0  ;;  %v2063_v18 = vadd.f32 %v5475_v38, %v2062_v15  ;;  %v2108_v16 = vmax.f32 %v2071_v14, 0.0 }
 0x263   : > { %v4596_v19 = vpop.f32.mrf.mxu0 }
 0x264   : > { %v2149_v20 = vmul.f32 %v5478_v33, %v2128_v17  ;;  %v2126_v23 = vmin.f32 %v2063_v18, 0.0  ;;  %v2074_v24 = vadd.f32 %v4596_v19, %v5475_v38  ;;  %v2106_v27 = vmax.f32 %v2063_v18, 0.0 }
 0x265   : > { %v2065_v21 = vpop.f32.mrf.mxu0 }
 0x266   : > { %v2169_v26 = vadd.f32 %v2149_v20, %v2108_v16  ;;  %v2147_v28 = vmul.f32 %v5478_v33, %v2126_v23  ;;  %v2129_v29 = vmin.f32 %v2074_v24, 0.0  ;;  %v2066_v30 = vadd.f32 %v5475_v38, %v2065_v21 }
 0x267   : > { %v2109_v63 = vmax.f32 %v2074_v24, 0.0 }
 0x268   : > { %2189 = vst.msk [vmem:[#allocation3 + $0x70] sm:$0xff] %vm330_vm1, %v2169_v26  ;;  %v2167_v59 = vadd.f32 %v2147_v28, %v2106_v27  ;;  %v2150_v32 = vmul.f32 %v5478_v33, %v2129_v29  ;;  %v2127_v34 = vmin.f32 %v2066_v30, 0.0  ;;  %v2107_v42 = vmax.f32 %v2066_v30, 0.0 }
 0x26a   : > { %2187 = vst.msk [vmem:[#allocation3 + $0x60] sm:$0xff] %vm330_vm1, %v2167_v59  ;;  %v2170_v35 = vadd.f32 %v2150_v32, %v2109_v63  ;;  %v2148_v62 = vmul.f32 %v5478_v33, %v2127_v34 }
 0x26c   : > { %2190 = vst.msk [vmem:[#allocation3 + $0x78] sm:$0xff] %vm330_vm1, %v2170_v35  ;;  %v2168_v36 = vadd.f32 %v2148_v62, %v2107_v42 }
 0x26e   : > { %2188 = vst.msk [vmem:[#allocation3 + $0x68] sm:$0xff] %vm330_vm1, %v2168_v36 }
 0x29b   : > { %v4599_v39 = vpop.f32.mrf.mxu0 }
 0x29c   : > { %v2087_v22 = vadd.f32 %v4599_v39, %v5475_v38 }
 0x29d   : > { %v2078_v25 = vpop.f32.mrf.mxu0 }
 0x29e   : > { %v2132_v40 = vmin.f32 %v2087_v22, 0.0  ;;  %v2079_v41 = vadd.f32 %v5475_v38, %v2078_v25  ;;  %v2112_v44 = vmax.f32 %v2087_v22, 0.0 }
 0x29f   : > { %v4600_v43 = vpop.f32.mrf.mxu0 }
 0x2a0   : > { %v2153_v47 = vmul.f32 %v5478_v33, %v2132_v40  ;;  %v2130_v48 = vmin.f32 %v2079_v41, 0.0  ;;  %v2090_v31 = vadd.f32 %v4600_v43, %v5475_v38  ;;  %v2110_v51 = vmax.f32 %v2079_v41, 0.0 }
 0x2a1   : > { %v2081_v49 = vpop.f32.mrf.mxu0 }
 0x2a2   : > { %v2173_v50 = vadd.f32 %v2153_v47, %v2112_v44  ;;  %v2151_v52 = vmul.f32 %v5478_v33, %v2130_v48  ;;  %v2133_v53 = vmin.f32 %v2090_v31, 0.0  ;;  %v2082_v54 = vadd.f32 %v5475_v38, %v2081_v49 }
 0x2a3   : > { %v2113_v56 = vmax.f32 %v2090_v31, 0.0 }
 0x2a4   : > { %2193 = vst.msk [vmem:[#allocation3 + $0x90] sm:$0xff] %vm330_vm1, %v2173_v50  ;;  %v2171_v55 = vadd.f32 %v2151_v52, %v2110_v51  ;;  %v2154_v57 = vmul.f32 %v5478_v33, %v2133_v53  ;;  %v2131_v58 = vmin.f32 %v2082_v54, 0.0  ;;  %v2111_v46 = vmax.f32 %v2082_v54, 0.0 }
 0x2a6   : > { %2191 = vst.msk [vmem:[#allocation3 + $0x80] sm:$0xff] %vm330_vm1, %v2171_v55  ;;  %v2174_v45 = vadd.f32 %v2154_v57, %v2113_v56  ;;  %v2152_v61 = vmul.f32 %v5478_v33, %v2131_v58 }
 0x2a8   : > { %2194 = vst.msk [vmem:[#allocation3 + $0x98] sm:$0xff] %vm330_vm1, %v2174_v45  ;;  %v2172_v0 = vadd.f32 %v2152_v61, %v2111_v46 }
 0x2aa   : > { %2192 = vst.msk [vmem:[#allocation3 + $0x88] sm:$0xff] %vm330_vm1, %v2172_v0 }
 0x2b1   : > { %v2197_v38 = vld [vmem:[%s2196_s14] sm:$0xff]  ;;  %v2198_v33 = vld [vmem:[%s2196_s14 + $0x8] sm:$0xff]  ;;  %v2199_v1 = vld [vmem:[%s2196_s14 + $0x10] sm:$0xff] }
 0x2b2   : > { %v2200_v37 = vld [vmem:[%s2196_s14 + $0x18] sm:$0xff]  ;;  %v2201_v60 = vld [vmem:[%s2196_s14 + $0x20] sm:$0xff]  ;;  %v2202_v2 = vld [vmem:[%s2196_s14 + $0x28] sm:$0xff]  ;;  %2214 = vst.msk [vmem:[#allocation4 + $0x19] sm:$0xff] %vm330_vm1, %v2197_v38 }
 0x2b3   : > { %2215 = vst.msk [vmem:[#allocation4 + $0x21] sm:$0xff] %vm330_vm1, %v2198_v33  ;;  %2216 = vst.msk [vmem:[#allocation4 + $0x31] sm:$0xff] %vm330_vm1, %v2199_v1  ;;  %v2203_v3 = vld [vmem:[%s2196_s14 + $0x30] sm:$0xff]  ;;  %v2204_v4 = vld [vmem:[%s2196_s14 + $0x38] sm:$0xff] }
 0x2b4   : > { %v2205_v5 = vld [vmem:[%s2196_s14 + $0x40] sm:$0xff]  ;;  %2217 = vst.msk [vmem:[#allocation4 + $0x39] sm:$0xff] %vm330_vm1, %v2200_v37  ;;  %2218 = vst.msk [vmem:[#allocation4 + $0x49] sm:$0xff] %vm330_vm1, %v2201_v60  ;;  %v2206_v6 = vld [vmem:[%s2196_s14 + $0x48] sm:$0xff] }
 0x2b5   : > { %2219 = vst.msk [vmem:[#allocation4 + $0x51] sm:$0xff] %vm330_vm1, %v2202_v2  ;;  %v2207_v7 = vld [vmem:[%s2196_s14 + $0x50] sm:$0xff]  ;;  %v2208_v8 = vld [vmem:[%s2196_s14 + $0x58] sm:$0xff]  ;;  %2220 = vst.msk [vmem:[#allocation4 + $0x61] sm:$0xff] %vm330_vm1, %v2203_v3 }
 0x2b6   : > { %2221 = vst.msk [vmem:[#allocation4 + $0x69] sm:$0xff] %vm330_vm1, %v2204_v4  ;;  %2222 = vst.msk [vmem:[#allocation4 + $0x79] sm:$0xff] %vm330_vm1, %v2205_v5  ;;  %v2209_v9 = vld [vmem:[%s2196_s14 + $0x60] sm:$0xff]  ;;  %v2210_v10 = vld [vmem:[%s2196_s14 + $0x68] sm:$0xff] }
 0x2b7   : > { %v2211_v11 = vld [vmem:[%s2196_s14 + $0x70] sm:$0xff]  ;;  %2223 = vst.msk [vmem:[#allocation4 + $0x81] sm:$0xff] %vm330_vm1, %v2206_v6  ;;  %2224 = vst.msk [vmem:[#allocation4 + $0x91] sm:$0xff] %vm330_vm1, %v2207_v7  ;;  %v2212_v12 = vld [vmem:[%s2196_s14 + $0x78] sm:$0xff] }
 0x2b8   : > { %2225 = vst.msk [vmem:[#allocation4 + $0x99] sm:$0xff] %vm330_vm1, %v2208_v8  ;;  %2226 = vst.msk [vmem:[#allocation4 + $0xa9] sm:$0xff] %vm330_vm1, %v2209_v9  ;;  %v2240_v13 = vld [vmem:[%s2239_s20] sm:$0xff]  ;;  %v2241_v14 = vld [vmem:[%s2239_s20 + $0x8] sm:$0xff] }
 0x2b9   : > { %2227 = vst.msk [vmem:[#allocation4 + $0xb1] sm:$0xff] %vm330_vm1, %v2210_v10  ;;  %2228 = vst.msk [vmem:[#allocation4 + $0xc1] sm:$0xff] %vm330_vm1, %v2211_v11  ;;  %v2246_v15 = vld [vmem:[%s2245_s12] sm:$0xff]  ;;  %v2247_v17 = vld [vmem:[%s2245_s12 + $0x8] sm:$0xff] }
 0x2ba   : > { %2229 = vst.msk [vmem:[#allocation4 + $0xc9] sm:$0xff] %vm330_vm1, %v2212_v12  ;;  %2242 = vst.msk [vmem:[#allocation4 + $0x1] sm:$0xff] %vm330_vm1, %v2240_v13  ;;  %v2644_v18 = vld [vmem:[#allocation4 + $0x20] sm:$0xff]  ;;  %v2252_v32 = vld [vmem:[#allocation4 + $0x1a] sm:$0x1] }
 0x2bb   : > { %2243 = vst.msk [vmem:[#allocation4 + $0x9] sm:$0xff] %vm330_vm1, %v2241_v14  ;;  %2249 = vst.msk [vmem:[#allocation4 + $0xd9] sm:$0xff] %vm330_vm1, %v2246_v15  ;;  %v4435_v19 = vpack.c.bf16 %v2644_v18, %v2644_v18  ;;  %v2646_v16 = vld [vmem:[#allocation4 + $0x38] sm:$0xff]  ;;  %v2390_v29 = vld [vmem:[#allocation4 + $0x21] sm:$0xff] }
 0x2bc   : > { %2250 = vst.msk [vmem:[#allocation4 + $0xe1] sm:$0xff] %vm330_vm1, %v2247_v17  ;;  %v5599_v20 = vpack.c.bf16 %v2646_v16, %v2646_v16  ;;  %v3031_v23 = vld [vmem:[#allocation4 + $0x50] sm:$0xff]  ;;  %v2272_v59 = vld [vmem:[#allocation4 + $0x27] sm:$0x1]  ;;  %v2389_v63 = vld [vmem:[#allocation4 + $0x19] sm:$0xff]  ;;  %v5617_v25 = vpack.c.bf16 %v2390_v29, %v2390_v29 }
 0x2bd   : > { %v5601_v24 = vpack.c.bf16 %v3031_v23, %v3031_v23  ;;  %2374 = vst.msk [vmem:[#allocation5 + $0xc] sm:$0xf] %vm519_vm3, %v4435_v19  ;;  %v2273_v34 = vld [vmem:[#allocation4 + $0x3f] sm:$0x1]  ;;  %v2253_v35 = vld [vmem:[#allocation4 + $0x32] sm:$0x1]  ;;  %v5619_v40 = vpack.c.bf16 %v2389_v63, %v2389_v63 }
 0x2be   : > { %2376 = vst.msk [vmem:[#allocation5 + $0x14] sm:$0xf] %vm519_vm3, %v5599_v20  ;;  %v2274_v42 = vld [vmem:[#allocation4 + $0x57] sm:$0x1]  ;;  %v2254_v62 = vld [vmem:[#allocation4 + $0x4a] sm:$0x1] }
 0x2bf   : > { %2378 = vst.msk [vmem:[#allocation5 + $0x1c] sm:$0xf] %vm519_vm3, %v5601_v24  ;;  %v2255_v36 = vld [vmem:[#allocation4 + $0x62] sm:$0x1]  ;;  %v2275_v39 = vld [vmem:[#allocation4 + $0x6f] sm:$0x1] }
 0x2c0   : > { %2282 = vst.msk [vmem:[#allocation4 + $0x29] sm:$0x1] %vm382_vm2, %v2272_v59  ;;  %2262 = vst.msk [vmem:[#allocation4 + $0x18] sm:$0x1] %vm382_vm2, %v2252_v32  ;;  %v2256_v22 = vld [vmem:[#allocation4 + $0x7a] sm:$0x1] }
 0x2c1   : > { %v2387_v26 = vld [vmem:[#allocation4 + $0x1] sm:$0xff]  ;;  %2283 = vst.msk [vmem:[#allocation4 + $0x41] sm:$0x1] %vm382_vm2, %v2273_v34  ;;  %2263 = vst.msk [vmem:[#allocation4 + $0x30] sm:$0x1] %vm382_vm2, %v2253_v35  ;;  %v2654_v31 = vld [vmem:[#allocation4 + $0x98] sm:$0xff] }
 0x2c2   : > { %v2388_v21 = vld [vmem:[#allocation4 + $0x9] sm:$0xff]  ;;  %v4402_v28 = vpack.c.bf16 %v2387_v26, %v2387_v26  ;;  %2284 = vst.msk [vmem:[#allocation4 + $0x59] sm:$0x1] %vm382_vm2, %v2274_v42  ;;  %2264 = vst.msk [vmem:[#allocation4 + $0x48] sm:$0x1] %vm382_vm2, %v2254_v62  ;;  %v5631_v50 = vpack.c.bf16 %v2654_v31, %v2654_v31  ;;  %v2517_v54 = vld [vmem:[#allocation4 + $0x1a] sm:$0xff] }
 0x2c3   : > { %v4403_v27 = vpack.c.bf16 %v2388_v21, %v2388_v21  ;;  %v2271_v30 = vld [vmem:[#allocation4 + $0xf] sm:$0x1]  ;;  %2265 = vst.msk [vmem:[#allocation4 + $0x60] sm:$0x1] %vm382_vm2, %v2255_v36  ;;  %2285 = vst.msk [vmem:[#allocation4 + $0x71] sm:$0x1] %vm382_vm2, %v2275_v39  ;;  %v4420_v1 = vpack.c.bf16 %v2517_v54, %v2517_v54 }
 0x2c4   : > { %2281 = vst.msk [vmem:[#allocation4 + $0x11] sm:$0x1] %vm382_vm2, %v2271_v30  ;;  %2451 = vrot.lane.b32.xlu0 %v4402_v28, %s4758_s17  ;;  %2266 = vst.msk [vmem:[#allocation4 + $0x78] sm:$0x1] %vm382_vm2, %v2256_v22  ;;  %v2292_v41 = vld [vmem:[#allocation4 + $0x8] sm:$0xff]  ;;  %v3039_v53 = vld [vmem:[#allocation4 + $0xb0] sm:$0xff] }
 0x2c5   : > { %2453 = vrot.lane.b32.xlu1 %v4403_v27, %s4758_s17  ;;  %v2251_v43 = vld [vmem:[#allocation4 + $0x2] sm:$0x1]  ;;  %v4387_v47 = vpack.c.bf16 %v2292_v41, %v2292_v41  ;;  %v2276_v48 = vld [vmem:[#allocation4 + $0x87] sm:$0x1]  ;;  %v2257_v49 = vld [vmem:[#allocation4 + $0x92] sm:$0x1]  ;;  %v5635_v56 = vpack.c.bf16 %v3039_v53, %v3039_v53 }
 0x2c6   : > { %v2515_v44 = vld [vmem:[#allocation4 + $0x2] sm:$0xff]  ;;  %2261 = vst.msk [vmem:[#allocation4] sm:$0x1] %vm382_vm2, %v2251_v43  ;;  %2286 = vst.msk [vmem:[#allocation4 + $0x89] sm:$0x1] %vm382_vm2, %v2276_v48  ;;  %v2774_v8 = vld [vmem:[#allocation4 + $0x39] sm:$0xff] }
 0x2c7   : > { %2372 = vst.msk [vmem:[#allocation5 + $0x4] sm:$0xf] %vm519_vm3, %v4387_v47  ;;  %v2277_v51 = vld [vmem:[#allocation4 + $0x9f] sm:$0x1]  ;;  %v4418_v52 = vpack.c.bf16 %v2515_v44, %v2515_v44  ;;  %v2258_v57 = vld [vmem:[#allocation4 + $0xaa] sm:$0x1]  ;;  %v4453_v16 = vpack.c.bf16 %v2774_v8, %v2774_v8 }
 0x2c8   : > { %2455 = vrot.lane.b32.xlu0 %v5619_v40, %s4758_s17  ;;  %2267 = vst.msk [vmem:[#allocation4 + $0x90] sm:$0x1] %vm382_vm2, %v2257_v49  ;;  %2287 = vst.msk [vmem:[#allocation4 + $0xa1] sm:$0x1] %vm382_vm2, %v2277_v51  ;;  %v2643_v55 = vld [vmem:[#allocation4 + $0x18] sm:$0xff]  ;;  %v2645_v45 = vld [vmem:[#allocation4 + $0x30] sm:$0xff] }
 0x2c9   : > { %2457 = vrot.lane.b32.xlu1 %v5617_v25, %s4758_s17  ;;  %2384 = vst.msk [vmem:[#allocation5 + $0x34] sm:$0xf] %vm519_vm3, %v5631_v50  ;;  %v5641_v58 = vpack.c.bf16 %v2643_v55, %v2643_v55  ;;  %v3030_v46 = vld [vmem:[#allocation4 + $0x48] sm:$0xff]  ;;  %v5644_v61 = vpack.c.bf16 %v2645_v45, %v2645_v45  ;;  %2386 = vst.msk [vmem:[#allocation5 + $0x3c] sm:$0xf] %vm519_vm3, %v5635_v56  ;;  %v2773_v9 = vld [vmem:[#allocation4 + $0x31] sm:$0xff] }
 0x2ca   : > { %2268 = vst.msk [vmem:[#allocation4 + $0xa8] sm:$0x1] %vm382_vm2, %v2258_v57  ;;  %v5646_v0 = vpack.c.bf16 %v3030_v46, %v3030_v46  ;;  %v2649_v38 = vld [vmem:[#allocation4 + $0x60] sm:$0xff]  ;;  %v2278_v4 = vld [vmem:[#allocation4 + $0xb7] sm:$0x1]  ;;  %v2300_v13 = vld [vmem:[#allocation4 + $0x68] sm:$0xff]  ;;  %v4452_v23 = vpack.c.bf16 %v2773_v9, %v2773_v9 }
 0x2cb   : > { %v3034_v33 = vld [vmem:[#allocation4 + $0x78] sm:$0xff]  ;;  %v5650_v37 = vpack.c.bf16 %v2649_v38, %v2649_v38  ;;  %2373 = vst.msk [vmem:[#allocation5 + $0x8] sm:$0xf] %vm519_vm3, %v5641_v58  ;;  %2375 = vst.msk [vmem:[#allocation5 + $0x10] sm:$0xf] %vm519_vm3, %v5644_v61  ;;  %v4395_v15 = vpack.c.bf16 %v2300_v13, %v2300_v13  ;;  %v2302_v17 = vld [vmem:[#allocation4 + $0x80] sm:$0xff] }
 0x2cc   : > { %2579 = vrot.lane.b32.xlu0 %v4418_v52, %s4757_s16  ;;  %v5652_v60 = vpack.c.bf16 %v3034_v33, %v3034_v33  ;;  %2377 = vst.msk [vmem:[#allocation5 + $0x18] sm:$0xf] %vm519_vm3, %v5646_v0  ;;  %v2259_v6 = vld [vmem:[#allocation4 + $0xc2] sm:$0x1]  ;;  %v2279_v10 = vld [vmem:[#allocation4 + $0xcf] sm:$0x1]  ;;  %v4397_v18 = vpack.c.bf16 %v2302_v17, %v2302_v17 }
 0x2cd   : > { %2709 = vrot.lane.b32.xlu1 %v4435_v19, %s4760_s19  ;;  %v2291_v2 = vld [vmem:[#allocation4] sm:$0xff]  ;;  %2288 = vst.msk [vmem:[#allocation4 + $0xb9] sm:$0x1] %vm382_vm2, %v2278_v4  ;;  %2269 = vst.msk [vmem:[#allocation4 + $0xc0] sm:$0x1] %vm382_vm2, %v2259_v6  ;;  %v2901_v21 = vld [vmem:[#allocation4 + $0x32] sm:$0xff] }
 0x2ce   : > { %v4386_v3 = vpack.c.bf16 %v2291_v2, %v2291_v2  ;;  %2379 = vst.msk [vmem:[#allocation5 + $0x20] sm:$0xf] %vm519_vm3, %v5650_v37  ;;  %2381 = vst.msk [vmem:[#allocation5 + $0x28] sm:$0xf] %vm519_vm3, %v5652_v60  ;;  %v2260_v12 = vld [vmem:[#allocation4 + $0xda] sm:$0x1]  ;;  %v4468_v26 = vpack.c.bf16 %v2901_v21, %v2901_v21 }
 0x2cf   : > { %v2653_v5 = vld [vmem:[#allocation4 + $0x90] sm:$0xff]  ;;  %2289 = vst.msk [vmem:[#allocation4 + $0xd1] sm:$0x1] %vm382_vm2, %v2279_v10  ;;  %2270 = vst.msk [vmem:[#allocation4 + $0xd8] sm:$0x1] %vm382_vm2, %v2260_v12  ;;  %v2650_v63 = vld [vmem:[#allocation4 + $0x68] sm:$0xff] }
 0x2d0   : > { %2583 = vrot.lane.b32.xlu0 %v4420_v1, %s4757_s16  ;;  %2371 = vst.msk [vmem:[#allocation5] sm:$0xf] %vm519_vm3, %v4386_v3  ;;  %v5669_v7 = vpack.c.bf16 %v2653_v5, %v2653_v5  ;;  %v2280_v19 = vld [vmem:[#allocation4 + $0xe7] sm:$0x1]  ;;  %2380 = vst.msk [vmem:[#allocation5 + $0x24] sm:$0xf] %vm519_vm3, %v4395_v15  ;;  %v4441_v32 = vpack.c.bf16 %v2650_v63, %v2650_v63 }
 0x2d1   : > { %2713 = vrot.lane.b32.xlu1 %v5599_v20, %s4760_s19  ;;  %v3038_v11 = vld [vmem:[#allocation4 + $0xa8] sm:$0xff]  ;;  %2290 = vst.msk [vmem:[#allocation4 + $0xe9] sm:$0x1] %vm382_vm2, %v2280_v19  ;;  %v3159_v27 = vld [vmem:[#allocation4 + $0x51] sm:$0xff]  ;;  %v3035_v42 = vld [vmem:[#allocation4 + $0x80] sm:$0xff] }
 0x2d2   : > { %2383 = vst.msk [vmem:[#allocation5 + $0x30] sm:$0xf] %vm519_vm3, %v5669_v7  ;;  %v5679_v14 = vpack.c.bf16 %v3038_v11, %v3038_v11  ;;  %2382 = vst.msk [vmem:[#allocation5 + $0x2c] sm:$0xf] %vm519_vm3, %v4397_v18  ;;  %v3158_v28 = vld [vmem:[#allocation4 + $0x49] sm:$0xff]  ;;  %v4501_v29 = vpack.c.bf16 %v3159_v27, %v3159_v27  ;;  %v2777_v62 = vld [vmem:[#allocation4 + $0x61] sm:$0xff]  ;;  %v5723_v39 = vpack.c.bf16 %v3035_v42, %v3035_v42 }
 0x2d3   : > { %v4500_v30 = vpack.c.bf16 %v3158_v28, %v3158_v28  ;;  %v2778_v34 = vld [vmem:[#allocation4 + $0x69] sm:$0xff]  ;;  %v5725_v22 = vpack.c.bf16 %v2777_v62, %v2777_v62  ;;  %v4703_v47 = vld [vmem:[%s6203_s3 + $0x20] sm:$0xff]   ;;  %v4704_v49 = vld [vmem:[%s6203_s3 + $0x18] sm:$0xff]  }
 0x2d4   : > { %2835 = vrot.lane.b32.xlu0 %v5619_v40, %s4759_s18  ;;  %2385 = vst.msk [vmem:[#allocation5 + $0x38] sm:$0xf] %vm519_vm3, %v5679_v14  ;;  %v5710_v35 = vpack.c.bf16 %v2778_v34, %v2778_v34  ;;  %v4701_v36 = vld [vmem:[%s6203_s3 + $0x30] sm:$0xff]   ;;  %v4702_v40 = vld [vmem:[%s6203_s3 + $0x28] sm:$0xff]   ;;  %v2902_v51 = vld [vmem:[#allocation4 + $0x3a] sm:$0xff] }
 0x2d5   : > { %2837 = vrot.lane.b32.xlu1 %v5617_v25, %s4759_s18  ;;  %v2516_v25 = vld [vmem:[#allocation4 + $0xa] sm:$0xff]  ;;  %v2518_v43 = vld [vmem:[#allocation4 + $0x22] sm:$0xff]  ;;  %v4469_v53 = vpack.c.bf16 %v2902_v51, %v2902_v51  ;;  %v3287_v55 = vld [vmem:[#allocation4 + $0x52] sm:$0xff] }
 0x2d6   : > { %v4419_v41 = vpack.c.bf16 %v2516_v25, %v2516_v25  ;;  %v2905_v44 = vld [vmem:[#allocation4 + $0x62] sm:$0xff]  ;;  %v4421_v48 = vpack.c.bf16 %v2518_v43, %v2518_v43  ;;  %v4705_v52 = vld [vmem:[%s6203_s3 + $0x10] sm:$0xff]   ;;  %v3162_v38 = vld [vmem:[#allocation4 + $0x79] sm:$0xff] }
 0x2d7   : > { %v5739_v31 = vpack.c.bf16 %v2905_v44, %v2905_v44  ;;  %v4706_v54 = vld [vmem:[%s6203_s3 + $0x8] sm:$0xff]   ;;  %v4707_v57 = vld [vmem:[%s6203_s3] sm:$0xff]   ;;  %v4504_v2 = vpack.c.bf16 %v3162_v38, %v3162_v38  ;;  %v2909_v42 = vld [vmem:[#allocation4 + $0x92] sm:$0xff] }
 0x2d8   : > { %2839 = vrot.lane.b32.xlu0 %v4452_v23, %s4759_s18  ;;  %v2906_v45 = vld [vmem:[#allocation4 + $0x6a] sm:$0xff]  ;;  %v3291_v6 = vld [vmem:[#allocation4 + $0x82] sm:$0xff]  ;;  %v3290_v8 = vld [vmem:[#allocation4 + $0x7a] sm:$0xff] }
 0x2d9   : > { %2841 = vrot.lane.b32.xlu1 %v4453_v16, %s4759_s18  ;;  %v4473_v46 = vpack.c.bf16 %v2906_v45, %v2906_v45  ;;  %v4521_v11 = vpack.c.bf16 %v3291_v6, %v3291_v6  ;;  %v4520_v12 = vpack.c.bf16 %v3290_v8, %v3290_v8  ;;  %v2658_v6 = vld [vmem:[#allocation4 + $0xc8] sm:$0xff]  ;;  %v2657_v8 = vld [vmem:[#allocation4 + $0xc0] sm:$0xff] }
 0x2dc   : > { %2963 = vrot.lane.b32.xlu0 %v4420_v1, %s4761_s22 }
 0x2dd   : > { %3094 = vrot.lane.b32.xlu1 %v5599_v20, %s4762_s15  ;;  %v3286_v20 = vld [vmem:[#allocation4 + $0x4a] sm:$0xff] }
 0x2de   : > { %v4516_v59 = vpack.c.bf16 %v3286_v20, %v3286_v20  ;;  %v2781_v20 = vld [vmem:[#allocation4 + $0x91] sm:$0xff] }
 0x2e0   : > { %2967 = vrot.lane.b32.xlu0 %v4468_v26, %s4761_s22 }
 0x2e1   : > { %3098 = vrot.lane.b32.xlu1 %v5601_v24, %s4762_s15 }
 0x2e4   : > { %3220 = vrot.lane.b32.xlu0 %v4452_v23, %s4763_s9 }
 0x2e5   : > { %3222 = vrot.lane.b32.xlu1 %v4453_v16, %s4763_s9 }
 0x2e8   : > { %3224 = vrot.lane.b32.xlu0 %v4500_v30, %s4763_s9 }
 0x2e9   : > { %3226 = vrot.lane.b32.xlu1 %v4501_v29, %s4763_s9 }
 0x2ec   : > { %3348 = vrot.lane.b32.xlu0 %v4468_v26, %s6209_s21 }
 0x2ed   : > { %2461 = vrot.lane.b32.xlu1 %v4453_v16, %s4758_s17 }
 0x2f0   : > { %2459 = vrot.lane.b32.xlu0 %v4452_v23, %s4758_s17 }
 0x2f1   : > { %2465 = vrot.lane.b32.xlu1 %v4501_v29, %s4758_s17 }
 0x2f4   : > { %3352 = vrot.lane.b32.xlu0 %v4516_v59, %s6209_s21 }
 0x2f5   : > { %2717 = vrot.lane.b32.xlu1 %v5601_v24, %s4760_s19  ;;  %v4700_v24 = vld [vmem:[%s6203_s3 + $0x38] sm:$0xff]  }
 0x2f6   : > { %4601 = vmatprep.subr.bf16.mxu1 %v4700_v24 }
 0x2f7   : > { %4602 = vmatpush3.bf16.msra.mxu1 %v4700_v24  ;;  %v2910_v24 = vld [vmem:[#allocation4 + $0x9a] sm:$0xff] }
 0x2f8   : > { %2463 = vrot.lane.b32.xlu0 %v4500_v30, %s4758_s17  ;;  %4603 = vmatprep.subr.bf16.mxu1 %v4701_v36 }
 0x2f9   : > { %2721 = vrot.lane.b32.xlu1 %v4441_v32, %s4760_s19 }
 0x2fb   : > { %4604 = vmatpush3.bf16.msra.mxu1 %v4701_v36 }
 0x2fc   : > { %2587 = vrot.lane.b32.xlu0 %v4468_v26, %s4757_s16  ;;  %4605 = vmatprep.subr.bf16.mxu1 %v4702_v40 }
 0x2fd   : > { %2845 = vrot.lane.b32.xlu1 %v4501_v29, %s4759_s18 }
 0x2ff   : > { %4606 = vmatpush3.bf16.msra.mxu1 %v4702_v40 }
 0x300   : > { %2591 = vrot.lane.b32.xlu0 %v4516_v59, %s4757_s16  ;;  %4607 = vmatprep.subr.bf16.mxu1 %v4703_v47 }
 0x301   : > { %2849 = vrot.lane.b32.xlu1 %v5710_v35, %s4759_s18 }
 0x303   : > { %4608 = vmatpush3.bf16.msra.mxu1 %v4703_v47 }
 0x304   : > { %2843 = vrot.lane.b32.xlu0 %v4500_v30, %s4759_s18  ;;  %4609 = vmatprep.subr.bf16.mxu1 %v4704_v49  ;;  %v2782_v30 = vld [vmem:[#allocation4 + $0x99] sm:$0xff] }
 0x305   : > { %3102 = vrot.lane.b32.xlu1 %v4441_v32, %s4762_s15  ;;  %v4461_v63 = vpack.c.bf16 %v2782_v30, %v2782_v30  ;;  %v4460_v32 = vpack.c.bf16 %v2781_v20, %v2781_v20 }
 0x307   : > { %4610 = vmatpush3.bf16.msra.mxu1 %v4704_v49 }
 0x308   : > { %2847 = vrot.lane.b32.xlu0 %v5725_v22, %s4759_s18  ;;  %4611 = vmatprep.subr.bf16.mxu1 %v4705_v52 }
 0x309   : > { %3106 = vrot.lane.b32.xlu1 %v5723_v39, %s4762_s15 }
 0x30b   : > { %4612 = vmatpush3.bf16.msra.mxu1 %v4705_v52 }
 0x30c   : > { %2971 = vrot.lane.b32.xlu0 %v4516_v59, %s4761_s22  ;;  %4613 = vmatprep.subr.bf16.mxu1 %v4706_v54 }
 0x30d   : > { %2581 = vrot.lane.b32.xlu1 %v4419_v41, %s4757_s16 }
 0x30f   : > { %4614 = vmatpush3.bf16.msra.mxu1 %v4706_v54 }
 0x310   : > { %2975 = vrot.lane.b32.xlu0 %v5739_v31, %s4761_s22  ;;  %4615 = vmatprep.subr.bf16.mxu1 %v4707_v57 }
 0x311   : > { %2585 = vrot.lane.b32.xlu1 %v4421_v48, %s4757_s16 }
 0x313   : > { %4616 = vmatpush3.bf16.msra.mxu1 %v4707_v57  ;;  %v3295_v57 = vld [vmem:[#allocation4 + $0xb2] sm:$0xff] }
 0x314   : > { %2707 = vrot.lane.b32.xlu0 %v5641_v58, %s4760_s19  ;;  %v4517_v58 = vpack.c.bf16 %v3287_v55, %v3287_v55 }
 0x315   : > { %2965 = vrot.lane.b32.xlu1 %v4421_v48, %s4761_s22  ;;  %v3166_v48 = vld [vmem:[#allocation4 + $0xa9] sm:$0xff] }
 0x316   : > { %v5892_v51 = vpack.c.bf16 %v3166_v48, %v3166_v48 }
 0x318   : > { %2711 = vrot.lane.b32.xlu0 %v5644_v61, %s4760_s19 }
 0x319   : > { %2969 = vrot.lane.b32.xlu1 %v4469_v53, %s4761_s22 }
 0x31c   : > { %3092 = vrot.lane.b32.xlu0 %v5644_v61, %s4762_s15  ;;  %v3163_v61 = vld [vmem:[#allocation4 + $0x81] sm:$0xff] }
 0x31d   : > { %3350 = vrot.lane.b32.xlu1 %v4469_v53, %s6209_s21  ;;  %v4505_v1 = vpack.c.bf16 %v3163_v61, %v3163_v61  ;;  %v5917_v61 = vpack.c.bf16 %v3295_v57, %v3295_v57 }
 0x320   : > { %3096 = vrot.lane.b32.xlu0 %v5646_v0, %s4762_s15 }
 0x321   : > { %3354 = vrot.lane.b32.xlu1 %v4517_v58, %s6209_s21 }
 0x324   : > { %2715 = vrot.lane.b32.xlu0 %v5646_v0, %s4760_s19 }
 0x325   : > { %2589 = vrot.lane.b32.xlu1 %v4469_v53, %s4757_s16 }
 0x328   : > { %2719 = vrot.lane.b32.xlu0 %v5650_v37, %s4760_s19 }
 0x329   : > { %2593 = vrot.lane.b32.xlu1 %v4517_v58, %s4757_s16 }
 0x32c   : > { %3100 = vrot.lane.b32.xlu0 %v5650_v37, %s4762_s15 }
 0x32d   : > { %2973 = vrot.lane.b32.xlu1 %v4517_v58, %s4761_s22  ;;  %v3294_v58 = vld [vmem:[#allocation4 + $0xaa] sm:$0xff] }
 0x32e   : > { %v5919_v38 = vpack.c.bf16 %v3294_v58, %v3294_v58 }
 0x330   : > { %3104 = vrot.lane.b32.xlu0 %v5652_v60, %s4762_s15 }
 0x331   : > { %2977 = vrot.lane.b32.xlu1 %v4473_v46, %s4761_s22 }
 0x334   : > { %3228 = vrot.lane.b32.xlu0 %v5725_v22, %s4763_s9 }
 0x335   : > { %3230 = vrot.lane.b32.xlu1 %v5710_v35, %s4763_s9 }
 0x336   : > { %v2452_v33 = vpop.permute.xlu0 %2451 }
 0x337   : > { %v2454_v0 = vpop.permute.xlu1 %2453  ;;  %2499 = vst.msk [vmem:[#allocation5] sm:$0xf] %vm680_vm4, %v2452_v33 }
 0x338   : > { %2500 = vst.msk [vmem:[#allocation5 + $0x4] sm:$0xf] %vm680_vm4, %v2454_v0  ;;  %3232 = vrot.lane.b32.xlu0 %v4504_v2, %s4763_s9 }
 0x339   : > { %3234 = vrot.lane.b32.xlu1 %v4505_v1, %s4763_s9 }
 0x33a   : > { %v2456_v3 = vpop.permute.xlu0 %2455 }
 0x33b   : > { %v2458_v37 = vpop.permute.xlu1 %2457  ;;  %2501 = vst.msk [vmem:[#allocation5 + $0x8] sm:$0xf] %vm680_vm4, %v2456_v3 }
 0x33c   : > { %2502 = vst.msk [vmem:[#allocation5 + $0xc] sm:$0xf] %vm680_vm4, %v2458_v37  ;;  %3356 = vrot.lane.b32.xlu0 %v5739_v31, %s6209_s21 }
 0x33d   : > { %3358 = vrot.lane.b32.xlu1 %v4473_v46, %s6209_s21 }
 0x33e   : > { %v2580_v5 = vpop.permute.xlu0 %2579 }
 0x33f   : > { %v5793_v4 = vpop.permute.xlu1 %2709  ;;  %2627 = vst.msk [vmem:[#allocation5] sm:$0xf] %vm841_vm5, %v2580_v5 }
 0x340   : > { %2467 = vrot.lane.b32.xlu0 %v5725_v22, %s4758_s17  ;;  %v5861_v22 = vpack.c.bf16 %v2909_v42, %v2909_v42 }
 0x341   : > { %2469 = vrot.lane.b32.xlu1 %v5710_v35, %s4758_s17 }
 0x342   : > { %v2584_v10 = vpop.permute.xlu0 %2583 }
 0x343   : > { %v5800_v9 = vpop.permute.xlu1 %2713  ;;  %2629 = vst.msk [vmem:[#allocation5 + $0x8] sm:$0xf] %vm841_vm5, %v2584_v10 }
 0x344   : > { %3360 = vrot.lane.b32.xlu0 %v4520_v12, %s6209_s21 }
 0x345   : > { %3362 = vrot.lane.b32.xlu1 %v4521_v11, %s6209_s21 }
 0x346   : > { %v5807_v15 = vpop.permute.xlu0 %2835 }
 0x347   : > { %v5805_v13 = vpop.permute.xlu1 %2837 }
 0x348   : > { %2471 = vrot.lane.b32.xlu0 %v4504_v2, %s4758_s17 }
 0x349   : > { %2473 = vrot.lane.b32.xlu1 %v4505_v1, %s4758_s17 }
 0x34a   : > { %v5813_v18 = vpop.permute.xlu0 %2839 }
 0x34b   : > { %v5811_v17 = vpop.permute.xlu1 %2841 }
 0x34c   : > { %2595 = vrot.lane.b32.xlu0 %v5739_v31, %s4757_s16 }
 0x34d   : > { %2597 = vrot.lane.b32.xlu1 %v4473_v46, %s4757_s16 }
 0x34e   : > { %v5820_v16 = vpop.permute.xlu0 %2963 }
 0x34f   : > { %v5818_v19 = vpop.permute.xlu1 %3094 }
 0x350   : > { %2599 = vrot.lane.b32.xlu0 %v4520_v12, %s4757_s16 }
 0x351   : > { %2601 = vrot.lane.b32.xlu1 %v4521_v11, %s4757_s16 }
 0x352   : > { %v5826_v21 = vpop.permute.xlu0 %2967 }
 0x353   : > { %v5824_v23 = vpop.permute.xlu1 %3098 }
 0x354   : > { %2723 = vrot.lane.b32.xlu0 %v5652_v60, %s4760_s19 }
 0x355   : > { %2725 = vrot.lane.b32.xlu1 %v5723_v39, %s4760_s19  ;;  %v5859_v39 = vpack.c.bf16 %v2910_v24, %v2910_v24 }
 0x356   : > { %v5834_v27 = vpop.permute.xlu0 %3220 }
 0x357   : > { %v5832_v26 = vpop.permute.xlu1 %3222 }
 0x358   : > { %2727 = vrot.lane.b32.xlu0 %v5669_v7, %s4760_s19 }
 0x359   : > { %2729 = vrot.lane.b32.xlu1 %v5631_v50, %s4760_s19 }
 0x35a   : > { %v5842_v29 = vpop.permute.xlu0 %3224 }
 0x35b   : > { %v5840_v28 = vpop.permute.xlu1 %3226 }
 0x35c   : > { %2851 = vrot.lane.b32.xlu0 %v4504_v2, %s4759_s18 }
 0x35d   : > { %2853 = vrot.lane.b32.xlu1 %v4505_v1, %s4759_s18 }
 0x35e   : > { %v5846_v59 = vpop.permute.xlu0 %3348 }
 0x35f   : > { %v2462_v60 = vpop.permute.xlu1 %2461 }
 0x360   : > { %2504 = vst.msk [vmem:[#allocation5 + $0x14] sm:$0xf] %vm680_vm4, %v2462_v60  ;;  %2855 = vrot.lane.b32.xlu0 %v4460_v32, %s4759_s18 }
 0x361   : > { %2857 = vrot.lane.b32.xlu1 %v4461_v63, %s4759_s18 }
 0x362   : > { %v2460_v35 = vpop.permute.xlu0 %2459 }
 0x363   : > { %v2466_v34 = vpop.permute.xlu1 %2465  ;;  %2503 = vst.msk [vmem:[#allocation5 + $0x10] sm:$0xf] %vm680_vm4, %v2460_v35  ;;  %v3042_v35 = vld [vmem:[#allocation4 + $0xd8] sm:$0xff] }
 0x364   : > { %2506 = vst.msk [vmem:[#allocation5 + $0x1c] sm:$0xf] %vm680_vm4, %v2466_v34  ;;  %2979 = vrot.lane.b32.xlu0 %v4520_v12, %s4761_s22  ;;  %v4448_v12 = vpack.c.bf16 %v2657_v8, %v2657_v8  ;;  %v3043_v34 = vld [vmem:[#allocation4 + $0xe0] sm:$0xff] }
 0x365   : > { %2981 = vrot.lane.b32.xlu1 %v4521_v11, %s4761_s22  ;;  %v4449_v11 = vpack.c.bf16 %v2658_v6, %v2658_v6 }
 0x366   : > { %v5857_v36 = vpop.permute.xlu0 %3352 }
 0x367   : > { %v5855_v62 = vpop.permute.xlu1 %2717 }
 0x368   : > { %2983 = vrot.lane.b32.xlu0 %v5861_v22, %s4761_s22 }
 0x369   : > { %2985 = vrot.lane.b32.xlu1 %v5859_v39, %s4761_s22 }
 0x36a   : > { %v2464_v40 = vpop.permute.xlu0 %2463 }
 0x36b   : > { %v5867_v25 = vpop.permute.xlu1 %2721  ;;  %2505 = vst.msk [vmem:[#allocation5 + $0x18] sm:$0xf] %vm680_vm4, %v2464_v40  ;;  %v3170_v40 = vld [vmem:[#allocation4 + $0xd9] sm:$0xff] }
 0x36c   : > { %3108 = vrot.lane.b32.xlu0 %v5669_v7, %s4762_s15 }
 0x36d   : > { %3110 = vrot.lane.b32.xlu1 %v5631_v50, %s4762_s15  ;;  %v3167_v50 = vld [vmem:[#allocation4 + $0xb1] sm:$0xff] }
 0x36e   : > { %v2588_v43 = vpop.permute.xlu0 %2587  ;;  %v5890_v49 = vpack.c.bf16 %v3167_v50, %v3167_v50 }
 0x36f   : > { %v5874_v41 = vpop.permute.xlu1 %2845  ;;  %2631 = vst.msk [vmem:[#allocation5 + $0x10] sm:$0xf] %vm841_vm5, %v2588_v43 }
 0x370   : > { %3112 = vrot.lane.b32.xlu0 %v5679_v14, %s4762_s15 }
 0x371   : > { %3114 = vrot.lane.b32.xlu1 %v5635_v56, %s4762_s15 }
 0x372   : > { %v2592_v47 = vpop.permute.xlu0 %2591 }
 0x373   : > { %v5881_v44 = vpop.permute.xlu1 %2849  ;;  %2633 = vst.msk [vmem:[#allocation5 + $0x18] sm:$0xf] %vm841_vm5, %v2592_v47  ;;  %v4512_v47 = vpack.c.bf16 %v3170_v40, %v3170_v40 }
 0x374   : > { %3236 = vrot.lane.b32.xlu0 %v4460_v32, %s4763_s9 }
 0x375   : > { %3238 = vrot.lane.b32.xlu1 %v4461_v63, %s4763_s9 }
 0x376   : > { %v5888_v31 = vpop.permute.xlu0 %2843 }
 0x377   : > { %v5886_v7 = vpop.permute.xlu1 %3102 }
 0x378   : > { %3240 = vrot.lane.b32.xlu0 %v5892_v51, %s4763_s9 }
 0x379   : > { %3242 = vrot.lane.b32.xlu1 %v5890_v49, %s4763_s9 }
 0x37a   : > { %v5900_v53 = vpop.permute.xlu0 %2847 }
 0x37b   : > { %v5898_v52 = vpop.permute.xlu1 %3106 }
 0x37c   : > { %3364 = vrot.lane.b32.xlu0 %v5861_v22, %s6209_s21 }
 0x37d   : > { %3366 = vrot.lane.b32.xlu1 %v5859_v39, %s6209_s21 }
 0x37e   : > { %v5906_v55 = vpop.permute.xlu0 %2971 }
 0x37f   : > { %v2582_v54 = vpop.permute.xlu1 %2581 }
 0x380   : > { %2628 = vst.msk [vmem:[#allocation5 + $0x4] sm:$0xf] %vm841_vm5, %v2582_v54  ;;  %2475 = vrot.lane.b32.xlu0 %v4460_v32, %s4758_s17 }
 0x381   : > { %2756 = vst.msk [vmem:[#allocation5 + $0x4] sm:$0xf] %vm1002_vm6, %v5793_v4  ;;  %2477 = vrot.lane.b32.xlu1 %v4461_v63, %s4758_s17 }
 0x382   : > { %2884 = vst.msk [vmem:[#allocation5 + $0x4] sm:$0xf] %vm1163_vm7, %v5805_v13  ;;  %v5915_v46 = vpop.permute.xlu0 %2975 }
 0x383   : > { %v2586_v45 = vpop.permute.xlu1 %2585 }
 0x384   : > { %2630 = vst.msk [vmem:[#allocation5 + $0xc] sm:$0xf] %vm841_vm5, %v2586_v45  ;;  %3368 = vrot.lane.b32.xlu0 %v5919_v38, %s6209_s21 }
 0x385   : > { %2758 = vst.msk [vmem:[#allocation5 + $0xc] sm:$0xf] %vm1002_vm6, %v5800_v9  ;;  %3370 = vrot.lane.b32.xlu1 %v5917_v61, %s6209_s21 }
 0x386   : > { %2886 = vst.msk [vmem:[#allocation5 + $0xc] sm:$0xf] %vm1163_vm7, %v5811_v17  ;;  %v2708_v33 = vpop.permute.xlu0 %2707  ;;  %v2785_v17 = vld [vmem:[#allocation4 + $0xc1] sm:$0xff] }
 0x387   : > { %v2966_v0 = vpop.permute.xlu1 %2965  ;;  %2755 = vst.msk [vmem:[#allocation5] sm:$0xf] %vm1002_vm6, %v2708_v33 }
 0x388   : > { %3012 = vst.msk [vmem:[#allocation5 + $0x4] sm:$0xf] %vm1324_vm8, %v2966_v0  ;;  %2479 = vrot.lane.b32.xlu0 %v5892_v51, %s4758_s17 }
 0x389   : > { %3141 = vst.msk [vmem:[#allocation5 + $0x4] sm:$0xf] %vm1486_vm9, %v5818_v19  ;;  %2481 = vrot.lane.b32.xlu1 %v5890_v49, %s4758_s17  ;;  %s3823_s17 = sshll.u32 %s6221_s24, 5 }
 0x38a   : > { %2883 = vst.msk [vmem:[#allocation5] sm:$0xf] %vm1163_vm7, %v5807_v15  ;;  %v2712_v2 = vpop.permute.xlu0 %2711  ;;  %v2786_v15 = vld [vmem:[#allocation4 + $0xc9] sm:$0xff] }
 0x38b   : > { %3269 = vst.msk [vmem:[#allocation5 + $0x4] sm:$0xf] %vm1647_vm10, %v5832_v26  ;;  %v2970_v1 = vpop.permute.xlu1 %2969 }
 0x38c   : > { %3011 = vst.msk [vmem:[#allocation5] sm:$0xf] %vm1324_vm8, %v5820_v16  ;;  %3014 = vst.msk [vmem:[#allocation5 + $0xc] sm:$0xf] %vm1324_vm8, %v2970_v1  ;;  %2603 = vrot.lane.b32.xlu0 %v5861_v22, %s4757_s16 }
 0x38d   : > { %2757 = vst.msk [vmem:[#allocation5 + $0x8] sm:$0xf] %vm1002_vm6, %v2712_v2  ;;  %2605 = vrot.lane.b32.xlu1 %v5859_v39, %s4757_s16 }
 0x38e   : > { %3143 = vst.msk [vmem:[#allocation5 + $0xc] sm:$0xf] %vm1486_vm9, %v5824_v23  ;;  %v3093_v3 = vpop.permute.xlu0 %3092  ;;  %v4465_v23 = vpack.c.bf16 %v2786_v15, %v2786_v15 }
 0x38f   : > { %2885 = vst.msk [vmem:[#allocation5 + $0x8] sm:$0xf] %vm1163_vm7, %v5813_v18  ;;  %v3351_v37 = vpop.permute.xlu1 %3350 }
 0x390   : > { %3271 = vst.msk [vmem:[#allocation5 + $0xc] sm:$0xf] %vm1647_vm10, %v5840_v28  ;;  %2607 = vrot.lane.b32.xlu0 %v5919_v38, %s4757_s16  ;;  %v2914_v28 = vld [vmem:[#allocation4 + $0xca] sm:$0xff] }
 0x391   : > { %3013 = vst.msk [vmem:[#allocation5 + $0x8] sm:$0xf] %vm1324_vm8, %v5826_v21  ;;  %2609 = vrot.lane.b32.xlu1 %v5917_v61, %s4757_s16  ;;  %v4464_v21 = vpack.c.bf16 %v2785_v17, %v2785_v17  ;;  %v4481_v60 = vpack.c.bf16 %v2914_v28, %v2914_v28  ;;  %s3822_s16 = sshll.u32 %s6235_s29, 1 }
 0x392   : > { %3397 = vst.msk [vmem:[#allocation5 + $0x4] sm:$0xf] %vm1808_vm11, %v3351_v37  ;;  %v3097_v5 = vpop.permute.xlu0 %3096 }
 0x393   : > { %3140 = vst.msk [vmem:[#allocation5] sm:$0xf] %vm1486_vm9, %v3093_v3  ;;  %v3355_v4 = vpop.permute.xlu1 %3354  ;;  %3142 = vst.msk [vmem:[#allocation5 + $0x8] sm:$0xf] %vm1486_vm9, %v3097_v5 }
 0x394   : > { %3268 = vst.msk [vmem:[#allocation5] sm:$0xf] %vm1647_vm10, %v5834_v27  ;;  %3270 = vst.msk [vmem:[#allocation5 + $0x8] sm:$0xf] %vm1647_vm10, %v5842_v29  ;;  %2731 = vrot.lane.b32.xlu0 %v5679_v14, %s4760_s19  ;;  %v2913_v29 = vld [vmem:[#allocation4 + $0xc2] sm:$0xff] }
 0x395   : > { %3396 = vst.msk [vmem:[#allocation5] sm:$0xf] %vm1808_vm11, %v5846_v59  ;;  %3399 = vst.msk [vmem:[#allocation5 + $0xc] sm:$0xf] %vm1808_vm11, %v3355_v4  ;;  %2733 = vrot.lane.b32.xlu1 %v5635_v56, %s4760_s19  ;;  %v4480_v59 = vpack.c.bf16 %v2913_v29, %v2913_v29 }
 0x396   : > { %3398 = vst.msk [vmem:[#allocation5 + $0x8] sm:$0xf] %vm1808_vm11, %v5857_v36  ;;  %v2716_v10 = vpop.permute.xlu0 %2715  ;;  %v4496_v36 = vpack.c.bf16 %v3042_v35, %v3042_v35 }
 0x397   : > { %v2590_v9 = vpop.permute.xlu1 %2589  ;;  %2759 = vst.msk [vmem:[#allocation5 + $0x10] sm:$0xf] %vm1002_vm6, %v2716_v10 }
 0x398   : > { %2632 = vst.msk [vmem:[#allocation5 + $0x14] sm:$0xf] %vm841_vm5, %v2590_v9  ;;  %2735 = vrot.lane.b32.xlu0 %v4448_v12, %s4760_s19 }
 0x399   : > { %2760 = vst.msk [vmem:[#allocation5 + $0x14] sm:$0xf] %vm1002_vm6, %v5855_v62  ;;  %2737 = vrot.lane.b32.xlu1 %v4449_v11, %s4760_s19  ;;  %v4497_v62 = vpack.c.bf16 %v3043_v34, %v3043_v34  ;;  %s274_s19 = sadd.s32 %s3823_s17, %s3822_s16 }
 0x39a   : > { %2887 = vst.msk [vmem:[#allocation5 + $0x10] sm:$0xf] %vm1163_vm7, %v5888_v31  ;;  %2888 = vst.msk [vmem:[#allocation5 + $0x14] sm:$0xf] %vm1163_vm7, %v5874_v41  ;;  %v2720_v13 = vpop.permute.xlu0 %2719  ;;  %v3299_v31 = vld [vmem:[#allocation4 + $0xe2] sm:$0xff] }
 0x39b   : > { %3015 = vst.msk [vmem:[#allocation5 + $0x10] sm:$0xf] %vm1324_vm8, %v5906_v55  ;;  %v2594_v14 = vpop.permute.xlu1 %2593 }
 0x39c   : > { %v4708_v56 = vld [vmem:[#allocation5] sm:$0xff]   ;;  %2634 = vst.msk [vmem:[#allocation5 + $0x1c] sm:$0xf] %vm841_vm5, %v2594_v14  ;;  %2859 = vrot.lane.b32.xlu0 %v5892_v51, %s4759_s18 }
 0x39d   : > { %4617 = vmatprep.mubr.bf16.mxu1 %v4708_v56  ;;  %2761 = vst.msk [vmem:[#allocation5 + $0x18] sm:$0xf] %vm1002_vm6, %v2720_v13  ;;  %2762 = vst.msk [vmem:[#allocation5 + $0x1c] sm:$0xf] %vm1002_vm6, %v5867_v25  ;;  %2861 = vrot.lane.b32.xlu1 %v5890_v49, %s4759_s18  ;;  %v4709_v18 = vld [vmem:[#allocation5 + $0x8] sm:$0xff]   ;;  %v3171_v25 = vld [vmem:[#allocation4 + $0xe1] sm:$0xff] }
 0x39e   : > { %2889 = vst.msk [vmem:[#allocation5 + $0x18] sm:$0xf] %vm1163_vm7, %v5900_v53  ;;  %2890 = vst.msk [vmem:[#allocation5 + $0x1c] sm:$0xf] %vm1163_vm7, %v5881_v44  ;;  %v3101_v16 = vpop.permute.xlu0 %3100  ;;  %4618 = vmatmul.mubr.bf16.vlgmr.msra.gmra.mxu1 %v4709_v18  ;;  %v4513_v44 = vpack.c.bf16 %v3171_v25, %v3171_v25  ;;  %v3298_v49 = vld [vmem:[#allocation4 + $0xda] sm:$0xff]  ;;  %v4529_v53 = vpack.c.bf16 %v3299_v31, %v3299_v31 }
 0x39f   : > { %3017 = vst.msk [vmem:[#allocation5 + $0x18] sm:$0xf] %vm1324_vm8, %v5915_v46  ;;  %v2974_v19 = vpop.permute.xlu1 %2973  ;;  %v4528_v54 = vpack.c.bf16 %v3298_v49, %v3298_v49 }
 0x3a0   : > { %3016 = vst.msk [vmem:[#allocation5 + $0x14] sm:$0xf] %vm1324_vm8, %v2974_v19  ;;  %2863 = vrot.lane.b32.xlu0 %v4464_v21, %s4759_s18 }
 0x3a1   : > { %3144 = vst.msk [vmem:[#allocation5 + $0x10] sm:$0xf] %vm1486_vm9, %v3101_v16  ;;  %3145 = vst.msk [vmem:[#allocation5 + $0x14] sm:$0xf] %vm1486_vm9, %v5886_v7  ;;  %2865 = vrot.lane.b32.xlu1 %v4465_v23, %s4759_s18  ;;  %s4530_s18 = sshll.u32 %s4738_s23, 7 }
 0x3a2   : > { %v3105_v27 = vpop.permute.xlu0 %3104 }
 0x3a3   : > { %v2978_v26 = vpop.permute.xlu1 %2977  ;;  %3146 = vst.msk [vmem:[#allocation5 + $0x18] sm:$0xf] %vm1486_vm9, %v3105_v27 }
 0x3a4   : > { %3018 = vst.msk [vmem:[#allocation5 + $0x1c] sm:$0xf] %vm1324_vm8, %v2978_v26  ;;  %2987 = vrot.lane.b32.xlu0 %v5919_v38, %s4761_s22 }
 0x3a5   : > { %3147 = vst.msk [vmem:[#allocation5 + $0x1c] sm:$0xf] %vm1486_vm9, %v5898_v52  ;;  %2989 = vrot.lane.b32.xlu1 %v5917_v61, %s4761_s22 }
 0x3a6   : > { %v3229_v20 = vpop.permute.xlu0 %3228 }
 0x3a7   : > { %v3231_v30 = vpop.permute.xlu1 %3230  ;;  %3272 = vst.msk [vmem:[#allocation5 + $0x10] sm:$0xf] %vm1647_vm10, %v3229_v20 }
 0x3a8   : > { %3273 = vst.msk [vmem:[#allocation5 + $0x14] sm:$0xf] %vm1647_vm10, %v3231_v30  ;;  %2991 = vrot.lane.b32.xlu0 %v4480_v59, %s4761_s22 }
 0x3a9   : > { %2993 = vrot.lane.b32.xlu1 %v4481_v60, %s4761_s22 }
 0x3aa   : > { %v3233_v32 = vpop.permute.xlu0 %3232 }
 0x3ab   : > { %v3235_v63 = vpop.permute.xlu1 %3234  ;;  %3274 = vst.msk [vmem:[#allocation5 + $0x18] sm:$0xf] %vm1647_vm10, %v3233_v32 }
 0x3ac   : > { %3275 = vst.msk [vmem:[#allocation5 + $0x1c] sm:$0xf] %vm1647_vm10, %v3235_v63  ;;  %3116 = vrot.lane.b32.xlu0 %v4448_v12, %s4762_s15 }
 0x3ad   : > { %3118 = vrot.lane.b32.xlu1 %v4449_v11, %s4762_s15 }
 0x3ae   : > { %v3357_v42 = vpop.permute.xlu0 %3356 }
 0x3af   : > { %v3359_v24 = vpop.permute.xlu1 %3358  ;;  %3400 = vst.msk [vmem:[#allocation5 + $0x10] sm:$0xf] %vm1808_vm11, %v3357_v42 }
 0x3b0   : > { %3401 = vst.msk [vmem:[#allocation5 + $0x14] sm:$0xf] %vm1808_vm11, %v3359_v24  ;;  %3120 = vrot.lane.b32.xlu0 %v4496_v36, %s4762_s15 }
 0x3b1   : > { %3122 = vrot.lane.b32.xlu1 %v4497_v62, %s4762_s15 }
 0x3b2   : > { %v2468_v22 = vpop.permute.xlu0 %2467 }
 0x3b3   : > { %v2470_v39 = vpop.permute.xlu1 %2469  ;;  %2507 = vst.msk [vmem:[#allocation5 + $0x20] sm:$0xf] %vm680_vm4, %v2468_v22 }
 0x3b4   : > { %2508 = vst.msk [vmem:[#allocation5 + $0x24] sm:$0xf] %vm680_vm4, %v2470_v39  ;;  %3244 = vrot.lane.b32.xlu0 %v4464_v21, %s4763_s9 }
 0x3b5   : > { %3246 = vrot.lane.b32.xlu1 %v4465_v23, %s4763_s9 }
 0x3b6   : > { %v3361_v43 = vpop.permute.xlu0 %3360 }
 0x3b7   : > { %v3363_v41 = vpop.permute.xlu1 %3362  ;;  %v4710_v50 = vld [vmem:[#allocation5 + $0x10] sm:$0xff]   ;;  %3402 = vst.msk [vmem:[#allocation5 + $0x18] sm:$0xf] %vm1808_vm11, %v3361_v43 }
 0x3b8   : > { %3403 = vst.msk [vmem:[#allocation5 + $0x1c] sm:$0xf] %vm1808_vm11, %v3363_v41  ;;  %3248 = vrot.lane.b32.xlu0 %v4512_v47, %s4763_s9  ;;  %4621 = vmatprep.mubr.bf16.mxu1 %v4710_v50 }
 0x3b9   : > { %3250 = vrot.lane.b32.xlu1 %v4513_v44, %s4763_s9  ;;  %s6114_s9 = scalar_lea.vmem %s4845_s10, %s4530_s18 }
 0x3ba   : > { %v2472_v7 = vpop.permute.xlu0 %2471 }
 0x3bb   : > { %v2474_v48 = vpop.permute.xlu1 %2473  ;;  %2509 = vst.msk [vmem:[#allocation5 + $0x28] sm:$0xf] %vm680_vm4, %v2472_v7 }
 0x3bc   : > { %2510 = vst.msk [vmem:[#allocation5 + $0x2c] sm:$0xf] %vm680_vm4, %v2474_v48  ;;  %3372 = vrot.lane.b32.xlu0 %v4480_v59, %s6209_s21 }
 0x3bd   : > { %3374 = vrot.lane.b32.xlu1 %v4481_v60, %s6209_s21 }
 0x3be   : > { %v2596_v52 = vpop.permute.xlu0 %2595 }
 0x3bf   : > { %v2598_v51 = vpop.permute.xlu1 %2597  ;;  %v4711_v55 = vld [vmem:[#allocation5 + $0x18] sm:$0xff]   ;;  %2635 = vst.msk [vmem:[#allocation5 + $0x20] sm:$0xf] %vm841_vm5, %v2596_v52 }
 0x3c0   : > { %2636 = vst.msk [vmem:[#allocation5 + $0x24] sm:$0xf] %vm841_vm5, %v2598_v51  ;;  %3376 = vrot.lane.b32.xlu0 %v4528_v54, %s6209_s21  ;;  %4622 = vmatmul.mubr.bf16.gmra.mxu1 %v4711_v55  ;;  %v6111_v54 = vld [vmem:[%s6204_s4] ss:$0 sm:$0xff] }
 0x3c1   : > { %3378 = vrot.lane.b32.xlu1 %v4529_v53, %s6209_s21  ;;  %s3824_s21 = sshll.u32 %s274_s19, 3 }
 0x3c2   : > { %v2600_v58 = vpop.permute.xlu0 %2599  ;;  %s6122_s29 = scalar_lea.vmem %s6206_s6, %s3824_s21 }
 0x3c3   : > { %v2602_v57 = vpop.permute.xlu1 %2601  ;;  %2637 = vst.msk [vmem:[#allocation5 + $0x28] sm:$0xf] %vm841_vm5, %v2600_v58  ;;  %v3648_v58 = vld [vmem:[%s6114_s9 + $0x10] sm:$0xff] }
 0x3c4   : > { %2638 = vst.msk [vmem:[#allocation5 + $0x2c] sm:$0xf] %vm841_vm5, %v2602_v57 }
 0x3c6   : > { %v2724_v46 = vpop.permute.xlu0 %2723 }
 0x3c7   : > { %v2726_v45 = vpop.permute.xlu1 %2725  ;;  %2763 = vst.msk [vmem:[#allocation5 + $0x20] sm:$0xf] %vm1002_vm6, %v2724_v46 }
 0x3c8   : > { %2764 = vst.msk [vmem:[#allocation5 + $0x24] sm:$0xf] %vm1002_vm6, %v2726_v45 }
 0x3ca   : > { %v2728_v38 = vpop.permute.xlu0 %2727 }
 0x3cb   : > { %v2730_v61 = vpop.permute.xlu1 %2729  ;;  %2765 = vst.msk [vmem:[#allocation5 + $0x28] sm:$0xf] %vm1002_vm6, %v2728_v38  ;;  %v3646_v38 = vld [vmem:[%s6114_s9] sm:$0xff] }
 0x3cc   : > { %2766 = vst.msk [vmem:[#allocation5 + $0x2c] sm:$0xf] %vm1002_vm6, %v2730_v61 }
 0x3ce   : > { %v2852_v33 = vpop.permute.xlu0 %2851 }
 0x3cf   : > { %v2854_v0 = vpop.permute.xlu1 %2853  ;;  %2891 = vst.msk [vmem:[#allocation5 + $0x20] sm:$0xf] %vm1163_vm7, %v2852_v33 }
 0x3d0   : > { %2892 = vst.msk [vmem:[#allocation5 + $0x24] sm:$0xf] %vm1163_vm7, %v2854_v0 }
 0x3d2   : > { %v2856_v2 = vpop.permute.xlu0 %2855 }
 0x3d3   : > { %v2858_v1 = vpop.permute.xlu1 %2857  ;;  %2893 = vst.msk [vmem:[#allocation5 + $0x28] sm:$0xf] %vm1163_vm7, %v2856_v2 }
 0x3d4   : > { %2894 = vst.msk [vmem:[#allocation5 + $0x2c] sm:$0xf] %vm1163_vm7, %v2858_v1 }
 0x3d6   : > { %v2980_v3 = vpop.permute.xlu0 %2979 }
 0x3d7   : > { %v2982_v37 = vpop.permute.xlu1 %2981  ;;  %3019 = vst.msk [vmem:[#allocation5 + $0x20] sm:$0xf] %vm1324_vm8, %v2980_v3 }
 0x3d8   : > { %3020 = vst.msk [vmem:[#allocation5 + $0x24] sm:$0xf] %vm1324_vm8, %v2982_v37  ;;  %v3649_v37 = vld [vmem:[%s6114_s9 + $0x18] sm:$0xff] }
 0x3da   : > { %v2984_v5 = vpop.permute.xlu0 %2983 }
 0x3db   : > { %v2986_v4 = vpop.permute.xlu1 %2985  ;;  %3021 = vst.msk [vmem:[#allocation5 + $0x28] sm:$0xf] %vm1324_vm8, %v2984_v5 }
 0x3dc   : > { %3022 = vst.msk [vmem:[#allocation5 + $0x2c] sm:$0xf] %vm1324_vm8, %v2986_v4 }
 0x3de   : > { %v3109_v8 = vpop.permute.xlu0 %3108 }
 0x3df   : > { %v3111_v6 = vpop.permute.xlu1 %3110  ;;  %3148 = vst.msk [vmem:[#allocation5 + $0x20] sm:$0xf] %vm1486_vm9, %v3109_v8  ;;  %v3647_v8 = vld [vmem:[%s6114_s9 + $0x8] sm:$0xff] }
 0x3e0   : > { %3149 = vst.msk [vmem:[#allocation5 + $0x24] sm:$0xf] %vm1486_vm9, %v3111_v6 }
 0x3e2   : > { %v3113_v10 = vpop.permute.xlu0 %3112 }
 0x3e3   : > { %v3115_v9 = vpop.permute.xlu1 %3114  ;;  %3150 = vst.msk [vmem:[#allocation5 + $0x28] sm:$0xf] %vm1486_vm9, %v3113_v10 }
 0x3e4   : > { %3151 = vst.msk [vmem:[#allocation5 + $0x2c] sm:$0xf] %vm1486_vm9, %v3115_v9 }
 0x3e6   : > { %v3237_v12 = vpop.permute.xlu0 %3236 }
 0x3e7   : > { %v3239_v11 = vpop.permute.xlu1 %3238  ;;  %3276 = vst.msk [vmem:[#allocation5 + $0x20] sm:$0xf] %vm1647_vm10, %v3237_v12 }
 0x3e8   : > { %3277 = vst.msk [vmem:[#allocation5 + $0x24] sm:$0xf] %vm1647_vm10, %v3239_v11 }
 0x3ea   : > { %v3241_v14 = vpop.permute.xlu0 %3240 }
 0x3eb   : > { %v3243_v56 = vpop.permute.xlu1 %3242  ;;  %3278 = vst.msk [vmem:[#allocation5 + $0x28] sm:$0xf] %vm1647_vm10, %v3241_v14  ;;  %v3652_v14 = vld [vmem:[%s6114_s9 + $0x30] sm:$0xff] }
 0x3ec   : > { %3279 = vst.msk [vmem:[#allocation5 + $0x2c] sm:$0xf] %vm1647_vm10, %v3243_v56 }
 0x3ee   : > { %v3365_v15 = vpop.permute.xlu0 %3364 }
 0x3ef   : > { %v3367_v13 = vpop.permute.xlu1 %3366  ;;  %3404 = vst.msk [vmem:[#allocation5 + $0x20] sm:$0xf] %vm1808_vm11, %v3365_v15 }
 0x3f0   : > { %3405 = vst.msk [vmem:[#allocation5 + $0x24] sm:$0xf] %vm1808_vm11, %v3367_v13 }
 0x3f2   : > { %v2476_v18 = vpop.permute.xlu0 %2475 }
 0x3f3   : > { %v2478_v17 = vpop.permute.xlu1 %2477  ;;  %2511 = vst.msk [vmem:[#allocation5 + $0x30] sm:$0xf] %vm680_vm4, %v2476_v18  ;;  %v3650_v18 = vld [vmem:[%s6114_s9 + $0x20] sm:$0xff] }
 0x3f4   : > { %2512 = vst.msk [vmem:[#allocation5 + $0x34] sm:$0xf] %vm680_vm4, %v2478_v17 }
 0x3f6   : > { %v3369_v16 = vpop.permute.xlu0 %3368 }
 0x3f7   : > { %v3371_v19 = vpop.permute.xlu1 %3370  ;;  %v4712_v23 = vld [vmem:[#allocation5 + $0x20] sm:$0xff]   ;;  %3406 = vst.msk [vmem:[#allocation5 + $0x28] sm:$0xf] %vm1808_vm11, %v3369_v16 }
 0x3f8   : > { %3407 = vst.msk [vmem:[#allocation5 + $0x2c] sm:$0xf] %vm1808_vm11, %v3371_v19  ;;  %4625 = vmatprep.mubr.bf16.mxu1 %v4712_v23 }
 0x3fa   : > { %v2480_v26 = vpop.permute.xlu0 %2479 }
 0x3fb   : > { %v2482_v21 = vpop.permute.xlu1 %2481  ;;  %2513 = vst.msk [vmem:[#allocation5 + $0x38] sm:$0xf] %vm680_vm4, %v2480_v26  ;;  %v3653_v26 = vld [vmem:[%s6114_s9 + $0x38] sm:$0xff] }
 0x3fc   : > { %2514 = vst.msk [vmem:[#allocation5 + $0x3c] sm:$0xf] %vm680_vm4, %v2482_v21 }
 0x3fe   : > { %v2604_v28 = vpop.permute.xlu0 %2603 }
 0x3ff   : > { %v2606_v27 = vpop.permute.xlu1 %2605  ;;  %v4713_v29 = vld [vmem:[#allocation5 + $0x28] sm:$0xff]   ;;  %2639 = vst.msk [vmem:[#allocation5 + $0x30] sm:$0xf] %vm841_vm5, %v2604_v28 }
 0x400   : > { %2640 = vst.msk [vmem:[#allocation5 + $0x34] sm:$0xf] %vm841_vm5, %v2606_v27  ;;  %4626 = vmatmul.mubr.bf16.gmra.mxu1 %v4713_v29 }
 0x402   : > { %v2608_v20 = vpop.permute.xlu0 %2607 }
 0x403   : > { %v2610_v30 = vpop.permute.xlu1 %2609  ;;  %2641 = vst.msk [vmem:[#allocation5 + $0x38] sm:$0xf] %vm841_vm5, %v2608_v20  ;;  %v3651_v20 = vld [vmem:[%s6114_s9 + $0x28] sm:$0xff] }
 0x404   : > { %2642 = vst.msk [vmem:[#allocation5 + $0x3c] sm:$0xf] %vm841_vm5, %v2610_v30 }
 0x406   : > { %v2732_v59 = vpop.permute.xlu0 %2731 }
 0x407   : > { %v2734_v60 = vpop.permute.xlu1 %2733  ;;  %2767 = vst.msk [vmem:[#allocation5 + $0x30] sm:$0xf] %vm1002_vm6, %v2732_v59 }
 0x408   : > { %2768 = vst.msk [vmem:[#allocation5 + $0x34] sm:$0xf] %vm1002_vm6, %v2734_v60 }
 0x40a   : > { %v2736_v32 = vpop.permute.xlu0 %2735 }
 0x40b   : > { %v2738_v63 = vpop.permute.xlu1 %2737  ;;  %2769 = vst.msk [vmem:[#allocation5 + $0x38] sm:$0xf] %vm1002_vm6, %v2736_v32 }
 0x40c   : > { %2770 = vst.msk [vmem:[#allocation5 + $0x3c] sm:$0xf] %vm1002_vm6, %v2738_v63 }
 0x40e   : > { %v2860_v35 = vpop.permute.xlu0 %2859 }
 0x40f   : > { %v2862_v34 = vpop.permute.xlu1 %2861  ;;  %2895 = vst.msk [vmem:[#allocation5 + $0x30] sm:$0xf] %vm1163_vm7, %v2860_v35  ;;  %v3656_v35 = vld [vmem:[%s6114_s9 + $0x50] sm:$0xff] }
 0x410   : > { %2896 = vst.msk [vmem:[#allocation5 + $0x34] sm:$0xf] %vm1163_vm7, %v2862_v34 }
 0x412   : > { %v2864_v42 = vpop.permute.xlu0 %2863 }
 0x413   : > { %v2866_v24 = vpop.permute.xlu1 %2865  ;;  %2897 = vst.msk [vmem:[#allocation5 + $0x38] sm:$0xf] %vm1163_vm7, %v2864_v42 }
 0x414   : > { %2898 = vst.msk [vmem:[#allocation5 + $0x3c] sm:$0xf] %vm1163_vm7, %v2866_v24 }
 0x416   : > { %v2988_v36 = vpop.permute.xlu0 %2987 }
 0x417   : > { %v2990_v62 = vpop.permute.xlu1 %2989  ;;  %3023 = vst.msk [vmem:[#allocation5 + $0x30] sm:$0xf] %vm1324_vm8, %v2988_v36  ;;  %v3654_v36 = vld [vmem:[%s6114_s9 + $0x40] sm:$0xff] }
 0x418   : > { %3024 = vst.msk [vmem:[#allocation5 + $0x34] sm:$0xf] %vm1324_vm8, %v2990_v62 }
 0x41a   : > { %v2992_v22 = vpop.permute.xlu0 %2991 }
 0x41b   : > { %v2994_v39 = vpop.permute.xlu1 %2993  ;;  %3025 = vst.msk [vmem:[#allocation5 + $0x38] sm:$0xf] %vm1324_vm8, %v2992_v22 }
 0x41c   : > { %3026 = vst.msk [vmem:[#allocation5 + $0x3c] sm:$0xf] %vm1324_vm8, %v2994_v39 }
 0x41e   : > { %v3117_v40 = vpop.permute.xlu0 %3116 }
 0x41f   : > { %v3119_v25 = vpop.permute.xlu1 %3118  ;;  %3152 = vst.msk [vmem:[#allocation5 + $0x30] sm:$0xf] %vm1486_vm9, %v3117_v40 }
 0x420   : > { %3153 = vst.msk [vmem:[#allocation5 + $0x34] sm:$0xf] %vm1486_vm9, %v3119_v25 }
 0x422   : > { %v3121_v43 = vpop.permute.xlu0 %3120 }
 0x423   : > { %v3123_v41 = vpop.permute.xlu1 %3122  ;;  %3154 = vst.msk [vmem:[#allocation5 + $0x38] sm:$0xf] %vm1486_vm9, %v3121_v43 }
 0x424   : > { %3155 = vst.msk [vmem:[#allocation5 + $0x3c] sm:$0xf] %vm1486_vm9, %v3123_v41  ;;  %v3657_v41 = vld [vmem:[%s6114_s9 + $0x58] sm:$0xff] }
 0x426   : > { %v3245_v47 = vpop.permute.xlu0 %3244 }
 0x427   : > { %v3247_v44 = vpop.permute.xlu1 %3246  ;;  %3280 = vst.msk [vmem:[#allocation5 + $0x30] sm:$0xf] %vm1647_vm10, %v3245_v47 }
 0x428   : > { %3281 = vst.msk [vmem:[#allocation5 + $0x34] sm:$0xf] %vm1647_vm10, %v3247_v44 }
 0x42a   : > { %v3249_v48 = vpop.permute.xlu0 %3248 }
 0x42b   : > { %v3251_v50 = vpop.permute.xlu1 %3250  ;;  %3282 = vst.msk [vmem:[#allocation5 + $0x38] sm:$0xf] %vm1647_vm10, %v3249_v48  ;;  %v3655_v48 = vld [vmem:[%s6114_s9 + $0x48] sm:$0xff] }
 0x42c   : > { %3283 = vst.msk [vmem:[#allocation5 + $0x3c] sm:$0xf] %vm1647_vm10, %v3251_v50 }
 0x42e   : > { %v3373_v31 = vpop.permute.xlu0 %3372 }
 0x42f   : > { %v3375_v7 = vpop.permute.xlu1 %3374  ;;  %3408 = vst.msk [vmem:[#allocation5 + $0x30] sm:$0xf] %vm1808_vm11, %v3373_v31 }
 0x430   : > { %3409 = vst.msk [vmem:[#allocation5 + $0x34] sm:$0xf] %vm1808_vm11, %v3375_v7 }
 0x432   : > { %v3377_v51 = vpop.permute.xlu0 %3376 }
 0x433   : > { %v3379_v49 = vpop.permute.xlu1 %3378  ;;  %3410 = vst.msk [vmem:[#allocation5 + $0x38] sm:$0xf] %vm1808_vm11, %v3377_v51 }
 0x434   : > { %3411 = vst.msk [vmem:[#allocation5 + $0x3c] sm:$0xf] %vm1808_vm11, %v3379_v49 }
 0x437   : > { %v4714_v52 = vld [vmem:[#allocation5 + $0x30] sm:$0xff]  }
 0x438   : > { %4629 = vmatprep.mubr.bf16.mxu1 %v4714_v52 }
 0x43b   : > { %v4715_v53 = vld [vmem:[#allocation5 + $0x38] sm:$0xff]  }
 0x43c   : > { %4630 = vmatmul.mubr.bf16.gmra.mxu1 %v4715_v53  ;;  %v3660_v53 = vld [vmem:[%s6114_s9 + $0x70] sm:$0xff] }
 0x45e   : > { %v4619_v55 = vpop.f32.mrf.mxu1 }
 0x45f   : > { %v3590_v57 = vadd.f32 %v4619_v55, %v6111_v54 }
 0x460   : > { %v3581_v45 = vpop.f32.mrf.mxu1 }
 0x461   : > { %v3664_v46 = vmul.f32 0.1, %v3590_v57  ;;  %v3582_v61 = vadd.f32 %v6111_v54, %v3581_v45  ;;  %v3658_v45 = vld [vmem:[%s6114_s9 + $0x60] sm:$0xff] }
 0x462   : > { %v4620_v0 = vpop.f32.mrf.mxu1 }
 0x463   : > { %v3680_v33 = vadd.f32 %v3664_v46, %v3648_v58  ;;  %v3662_v1 = vmul.f32 0.1, %v3582_v61  ;;  %v3593_v2 = vadd.f32 %v4620_v0, %v6111_v54 }
 0x464   : > { %v3584_v3 = vpop.f32.mrf.mxu1 }
 0x465   : > { %3696 = vst.msk [vmem:[%s6122_s29 + $0x10] sm:$0xff] %vm330_vm1, %v3680_v33  ;;  %v3678_v4 = vadd.f32 %v3662_v1, %v3646_v38  ;;  %v3665_v5 = vmul.f32 0.1, %v3593_v2  ;;  %v3585_v6 = vadd.f32 %v6111_v54, %v3584_v3  ;;  %v3661_v33 = vld [vmem:[%s6114_s9 + $0x78] sm:$0xff] }
 0x467   : > { %3694 = vst.msk [vmem:[%s6122_s29] sm:$0xff] %vm330_vm1, %v3678_v4  ;;  %v3681_v9 = vadd.f32 %v3665_v5, %v3649_v37  ;;  %v3663_v10 = vmul.f32 0.1, %v3585_v6  ;;  %v3659_v4 = vld [vmem:[%s6114_s9 + $0x68] sm:$0xff] }
 0x469   : > { %3697 = vst.msk [vmem:[%s6122_s29 + $0x18] sm:$0xff] %vm330_vm1, %v3681_v9  ;;  %v3679_v11 = vadd.f32 %v3663_v10, %v3647_v8 }
 0x46b   : > { %3695 = vst.msk [vmem:[%s6122_s29 + $0x8] sm:$0xff] %vm330_vm1, %v3679_v11 }
 0x480   : > { %v4623_v12 = vpop.f32.mrf.mxu1 }
 0x481   : > { %v3606_v56 = vadd.f32 %v4623_v12, %v6111_v54 }
 0x482   : > { %v3597_v13 = vpop.f32.mrf.mxu1 }
 0x483   : > { %v3668_v15 = vmul.f32 0.1, %v3606_v56  ;;  %v3598_v17 = vadd.f32 %v6111_v54, %v3597_v13 }
 0x484   : > { %v4624_v19 = vpop.f32.mrf.mxu1 }
 0x485   : > { %v3684_v16 = vadd.f32 %v3668_v15, %v3652_v14  ;;  %v3666_v23 = vmul.f32 0.1, %v3598_v17  ;;  %v3609_v21 = vadd.f32 %v4624_v19, %v6111_v54 }
 0x486   : > { %v3600_v27 = vpop.f32.mrf.mxu1 }
 0x487   : > { %3700 = vst.msk [vmem:[%s6122_s29 + $0x30] sm:$0xff] %vm330_vm1, %v3684_v16  ;;  %v3682_v28 = vadd.f32 %v3666_v23, %v3650_v18  ;;  %v3669_v29 = vmul.f32 0.1, %v3609_v21  ;;  %v3601_v30 = vadd.f32 %v6111_v54, %v3600_v27 }
 0x489   : > { %3698 = vst.msk [vmem:[%s6122_s29 + $0x20] sm:$0xff] %vm330_vm1, %v3682_v28  ;;  %v3685_v60 = vadd.f32 %v3669_v29, %v3653_v26  ;;  %v3667_v59 = vmul.f32 0.1, %v3601_v30 }
 0x48b   : > { %3701 = vst.msk [vmem:[%s6122_s29 + $0x38] sm:$0xff] %vm330_vm1, %v3685_v60  ;;  %v3683_v63 = vadd.f32 %v3667_v59, %v3651_v20 }
 0x48d   : > { %3699 = vst.msk [vmem:[%s6122_s29 + $0x28] sm:$0xff] %vm330_vm1, %v3683_v63 }
 0x4c0   : > { %v4627_v32 = vpop.f32.mrf.mxu1 }
 0x4c1   : > { %v3622_v34 = vadd.f32 %v4627_v32, %v6111_v54 }
 0x4c2   : > { %v3613_v24 = vpop.f32.mrf.mxu1 }
 0x4c3   : > { %v3672_v42 = vmul.f32 0.1, %v3622_v34  ;;  %v3614_v62 = vadd.f32 %v6111_v54, %v3613_v24 }
 0x4c4   : > { %v4628_v39 = vpop.f32.mrf.mxu1 }
 0x4c5   : > { %v3688_v22 = vadd.f32 %v3672_v42, %v3656_v35  ;;  %v3670_v25 = vmul.f32 0.1, %v3614_v62  ;;  %v3625_v40 = vadd.f32 %v4628_v39, %v6111_v54 }
 0x4c6   : > { %v3616_v43 = vpop.f32.mrf.mxu1 }
 0x4c7   : > { %3704 = vst.msk [vmem:[%s6122_s29 + $0x50] sm:$0xff] %vm330_vm1, %v3688_v22  ;;  %v3686_v44 = vadd.f32 %v3670_v25, %v3654_v36  ;;  %v3673_v47 = vmul.f32 0.1, %v3625_v40  ;;  %v3617_v50 = vadd.f32 %v6111_v54, %v3616_v43 }
 0x4c9   : > { %3702 = vst.msk [vmem:[%s6122_s29 + $0x40] sm:$0xff] %vm330_vm1, %v3686_v44  ;;  %v3689_v7 = vadd.f32 %v3673_v47, %v3657_v41  ;;  %v3671_v31 = vmul.f32 0.1, %v3617_v50 }
 0x4cb   : > { %3705 = vst.msk [vmem:[%s6122_s29 + $0x58] sm:$0xff] %vm330_vm1, %v3689_v7  ;;  %v3687_v49 = vadd.f32 %v3671_v31, %v3655_v48 }
 0x4cd   : > { %3703 = vst.msk [vmem:[%s6122_s29 + $0x48] sm:$0xff] %vm330_vm1, %v3687_v49 }
 0x4fc   : > { %v4631_v51 = vpop.f32.mrf.mxu1 }
 0x4fd   : > { %v3638_v52 = vadd.f32 %v4631_v51, %v6111_v54 }
 0x4fe   : > { %v3629_v55 = vpop.f32.mrf.mxu1 }
 0x4ff   : > { %v3676_v57 = vmul.f32 0.1, %v3638_v52  ;;  %v3630_v58 = vadd.f32 %v6111_v54, %v3629_v55 }
 0x500   : > { %v4632_v46 = vpop.f32.mrf.mxu1 }
 0x501   : > { %v3692_v61 = vadd.f32 %v3676_v57, %v3660_v53  ;;  %v3674_v38 = vmul.f32 0.1, %v3630_v58  ;;  %v3641_v0 = vadd.f32 %v4632_v46, %v6111_v54 }
 0x502   : > { %v3632_v1 = vpop.f32.mrf.mxu1 }
 0x503   : > { %3708 = vst.msk [vmem:[%s6122_s29 + $0x70] sm:$0xff] %vm330_vm1, %v3692_v61  ;;  %v3690_v2 = vadd.f32 %v3674_v38, %v3658_v45  ;;  %v3677_v37 = vmul.f32 0.1, %v3641_v0  ;;  %v3633_v3 = vadd.f32 %v6111_v54, %v3632_v1 }
 0x505   : > { %3706 = vst.msk [vmem:[%s6122_s29 + $0x60] sm:$0xff] %vm330_vm1, %v3690_v2  ;;  %v3693_v5 = vadd.f32 %v3677_v37, %v3661_v33  ;;  %v3675_v6 = vmul.f32 0.1, %v3633_v3 }
 0x507   : > { %3709 = vst.msk [vmem:[%s6122_s29 + $0x78] sm:$0xff] %vm330_vm1, %v3693_v5  ;;  %v3691_v8 = vadd.f32 %v3675_v6, %v3659_v4 }
 0x509   : > { %3707 = vst.msk [vmem:[%s6122_s29 + $0x68] sm:$0xff] %vm330_vm1, %v3691_v8 }
 0x50a PF: > { %s17_s27 = sadd.s32 1, %s4754_s27   ;;  %s6210_s23 = smov %s4746_s25 }
 0x50b   : > { %p14_p13 = scmp.ge.s32.totalorder %s17_s27, 6   ;;  %s6211_s24 = smov %s4750_s26 }
 0x50c   : > { %s6212_s25 = smov %s6215_s5  ;;  %s6213_s26 = smov %s6219_s28 }
 0x50d   :  { %16 = sbr.rel (!%p14_p13) target bundleno = 3 (0x3), region = 87 }

</bundles_post_ra>
